<compile_context>
chip_gen: v7x
topology: tpu7x:2x2x1
jax: 0.10.0
libtpu: 0.0.40
codegen_flags: <defaults>
</compile_context>

<pallas_src>
import functools
import math

import jax
import jax.numpy as jnp
from jax.experimental import pallas as pl
from jax.experimental.pallas import tpu as pltpu


# ----------------------------- VMEM budgeting --------------------------------

def _vmem_capacity_bytes():
    try:
        return int(pltpu.get_tpu_info().vmem_capacity_bytes)
    except Exception:
        return 64 * 1024 * 1024        # conservative (v7x-sized) fallback


_VMEM_CAP = _vmem_capacity_bytes()
_VMEM_LIMIT = min(_VMEM_CAP * 3 // 4, 100 * 1024 * 1024)
_TILE_BUDGET = _VMEM_LIMIT * 4 // 5


# ----------------------------- small traced helpers --------------------------

_INV_SQRT2 = 1.0 / math.sqrt(2.0)


def _gelu(x):
    # exact GELU (PyTorch nn.GELU default), f32
    return 0.5 * x * (1.0 + jax.lax.erf(x * _INV_SQRT2))


def _layernorm(x, w, b, eps=1e-5):
    mu = jnp.mean(x, axis=-1, keepdims=True)
    var = jnp.mean(jnp.square(x - mu), axis=-1, keepdims=True)
    return (x - mu) * jax.lax.rsqrt(var + eps) * w + b


def _softmax_lastdim(x):
    # f32, exact reciprocal (parity with torch.softmax)
    m = jnp.max(x, axis=-1, keepdims=True)
    e = jnp.exp(x - m)
    return e / jnp.sum(e, axis=-1, keepdims=True)


# ----------------------------- fusion-layer kernel ---------------------------

def _fusion_kernel(x1_ref, x2_ref,
                   w_q1r, b_q1, w_kv1, b_kv1,
                   w_q2r, b_q2, w_kv2, b_kv2,
                   wo1, bo1, wo2, bo2,
                   w_fgg, b_fgg,
                   ln1w, ln1b, ln2w, ln2b,
                   *out_and_scratch,
                   res1_is_proj, res2_is_proj, with_attn):
    if with_attn:
        slab_ref, g1_ref, g2_ref, a12_ref, a21_ref, kv1_s, kv2_s = out_and_scratch
    else:
        slab_ref, g1_ref, g2_ref, kv1_s, kv2_s = out_and_scratch
        a12_ref = a21_ref = None

    bb, S, H1 = x1_ref.shape
    H2 = x2_ref.shape[-1]
    ts = slab_ref.shape[1]
    F = slab_ref.shape[-1] // 3
    inv_scale = 1.0 / (F ** 0.5)          # matches torch: / fusion_output_dim**0.5

    qi = pl.program_id(1)

    def mm(a, w):
        return jnp.dot(a, w, preferred_element_type=jnp.float32)

    # K/V projections for the FULL sequence, computed once per batch tile and
    # cached in VMEM scratch (query axis is 'arbitrary', scratch persists).
    @pl.when(qi == 0)
    def _():
        x1f = x1_ref[...].reshape(bb * S, H1)
        x2f = x2_ref[...].reshape(bb * S, H2)
        kv1 = mm(x1f, w_kv1[...]) + b_kv1[...]
        kv2 = mm(x2f, w_kv2[...]) + b_kv2[...]
        kv1_s[...] = kv1.reshape(bb, S, 2 * F).astype(kv1_s.dtype)
        kv2_s[...] = kv2.reshape(bb, S, 2 * F).astype(kv2_s.dtype)

    # query tile of the raw hidden states
    q0 = pl.multiple_of(qi * ts, ts)
    x1q = x1_ref[:, pl.ds(q0, ts), :]          # (bb, ts, H1) bf16
    x2q = x2_ref[:, pl.ds(q0, ts), :]          # (bb, ts, H2) bf16
    x1q2d = x1q.reshape(bb * ts, H1)
    x2q2d = x2q.reshape(bb * ts, H2)

    # ---------------- direction 1 <- 2 (finished before 2 <- 1 starts) -------
    q1r = mm(x1q2d, w_q1r[...])                              # f32 (bb*ts, F|2F)
    q1 = (q1r[:, :F] + b_q1[...]).astype(jnp.bfloat16).reshape(bb, ts, F)
    if res1_is_proj:
        res1 = q1r[:, F:2 * F]                               # F.linear(x1, W_o1[:, :H1])
    else:
        res1 = x1q2d.astype(jnp.float32)                     # H1 == F -> x1 itself

    k2 = kv2_s[:, :, :F]
    v2 = kv2_s[:, :, F:]
    s12 = jnp.einsum('bqf,bkf->bqk', q1, k2,
                     preferred_element_type=jnp.float32) * inv_scale
    a12 = _softmax_lastdim(s12)                              # f32 (bb, ts, S)
    ctx12 = jnp.einsum('bqk,bkf->bqf', a12.astype(jnp.bfloat16), v2,
                       preferred_element_type=jnp.float32)
    o1 = mm(ctx12.reshape(bb * ts, F).astype(jnp.bfloat16), wo1[...]) + bo1[...]
    o1 = _layernorm(o1 + res1, ln1w[...], ln1b[...])
    slab_ref[:, :, 0:F] = o1.reshape(bb, ts, F).astype(slab_ref.dtype)
    if with_attn:
        a12_ref[...] = a12

    # ---------------- direction 2 <- 1 ---------------------------------------
    q2r = mm(x2q2d, w_q2r[...])
    q2 = (q2r[:, :F] + b_q2[...]).astype(jnp.bfloat16).reshape(bb, ts, F)
    if res2_is_proj:
        res2 = q2r[:, F:2 * F]
    else:
        res2 = x2q2d.astype(jnp.float32)

    k1 = kv1_s[:, :, :F]
    v1 = kv1_s[:, :, F:]
    s21 = jnp.einsum('bqf,bkf->bqk', q2, k1,
                     preferred_element_type=jnp.float32) * inv_scale
    a21 = _softmax_lastdim(s21)
    ctx21 = jnp.einsum('bqk,bkf->bqf', a21.astype(jnp.bfloat16), v1,
                       preferred_element_type=jnp.float32)
    o2 = mm(ctx21.reshape(bb * ts, F).astype(jnp.bfloat16), wo2[...]) + bo2[...]
    o2 = _layernorm(o2 + res2, ln2w[...], ln2b[...])
    slab_ref[:, :, F:2 * F] = o2.reshape(bb, ts, F).astype(slab_ref.dtype)
    if with_attn:
        a21_ref[...] = a21

    # ---------------- fused / gates: ONE wide concat matmul ------------------
    x12q = jnp.concatenate([x1q2d, x2q2d], axis=-1)          # (bb*ts, H1+H2) bf16
    fgg = mm(x12q, w_fgg[...]) + b_fgg[...]                  # f32 (bb*ts, 3F)
    slab_ref[:, :, 2 * F:3 * F] = (
        _gelu(fgg[:, 0:F]).reshape(bb, ts, F).astype(slab_ref.dtype))
    g1_ref[...] = jax.nn.sigmoid(fgg[:, F:2 * F]).reshape(bb, ts, F)
    g2_ref[...] = jax.nn.sigmoid(fgg[:, 2 * F:3 * F]).reshape(bb, ts, F)


def _fusion_step_bytes(bb, ts, S, H1, H2, F, with_attn):
    bf2, f4 = 2, 4
    x_in = 2 * bb * S * (H1 + H2) * bf2                      # double-buffered inputs
    kv = 2 * bb * S * 2 * F * bf2                            # K/V VMEM scratch
    w = ((H1 * 4 * F + H2 * 4 * F + (H1 + H2) * 3 * F + 2 * F * F) * bf2
         + 16 * F * f4)                                      # single-buffered weights
    outs = 2 * (bb * ts * 3 * F * bf2 + 2 * bb * ts * F * f4)
    if with_attn:
        outs += 2 * 2 * bb * ts * S * f4
    live = 4 * bb * ts * S * f4 + 6 * bb * ts * F * f4       # scores / temporaries
    return x_in + kv + w + outs + live


def _largest_divisor_leq(n, cap):
    cap = max(1, min(n, cap))
    for cand in range(cap, 0, -1):
        if n % cand == 0:
            return cand
    return 1


def _pick_fusion_tiles(B, S, H1, H2, F, with_attn, budget):
    ts = S
    if S > 128:
        for cand in (128, 64, 32, 16, 8):
            if S % cand == 0:
                ts = cand
                break
    # batch tile <= 8, and <= B//2 so the 'parallel' axis has >= 2 steps
    bb = _largest_divisor_leq(B, min(8, max(1, B // 2)))
    while bb > 1 and _fusion_step_bytes(bb, ts, S, H1, H2, F, with_attn) > budget:
        bb = _largest_divisor_leq(B, bb - 1)
    return bb, ts


def fusion_layer_pallas(x1, x2, fp, *, with_attn=True):
    B, S, H1 = x1.shape
    H2 = x2.shape[-1]
    F = fp["wo1"].shape[0]

    bb, ts = _pick_fusion_tiles(B, S, H1, H2, F, with_attn, _TILE_BUDGET)
    grid = (B // bb, S // ts)

    weight_names = ("w_q1r", "b_q1", "w_kv1", "b_kv1",
                    "w_q2r", "b_q2", "w_kv2", "b_kv2",
                    "wo1", "bo1", "wo2", "bo2",
                    "w_fgg", "b_fgg",
                    "ln1w", "ln1b", "ln2w", "ln2b")
    weight_args = tuple(fp[n] for n in weight_names)

    kernel = functools.partial(
        _fusion_kernel,
        res1_is_proj=(H1 != F), res2_is_proj=(H2 != F), with_attn=with_attn)

    out_shapes = [jax.ShapeDtypeStruct((B, S, 3 * F), jnp.bfloat16),  # [out1|out2|fused]
                  jax.ShapeDtypeStruct((B, S, F), jnp.float32),       # gate1
                  jax.ShapeDtypeStruct((B, S, F), jnp.float32)]       # gate2
    out_specs = [pl.BlockSpec((bb, ts, 3 * F), lambda b, q: (b, q, 0)),
                 pl.BlockSpec((bb, ts, F), lambda b, q: (b, q, 0)),
                 pl.BlockSpec((bb, ts, F), lambda b, q: (b, q, 0))]
    if with_attn:
        out_shapes += [jax.ShapeDtypeStruct((B, S, S), jnp.float32),
                       jax.ShapeDtypeStruct((B, S, S), jnp.float32)]
        out_specs += [pl.BlockSpec((bb, ts, S), lambda b, q: (b, q, 0)),
                      pl.BlockSpec((bb, ts, S), lambda b, q: (b, q, 0))]

    scratch_shapes = [pltpu.VMEM((bb, S, 2 * F), jnp.bfloat16),   # [k1|v1]
                      pltpu.VMEM((bb, S, 2 * F), jnp.bfloat16)]   # [k2|v2]

    def build(single_buffer_weights):
        if single_buffer_weights:
            weight_specs = [pl.BlockSpec(w.shape, lambda b, q: (0, 0),
                                         pipeline_mode=pl.Buffered(1))
                            for w in weight_args]
        else:
            weight_specs = [pl.BlockSpec(w.shape, lambda b, q: (0, 0))
                            for w in weight_args]
        in_specs = ([pl.BlockSpec((bb, S, H1), lambda b, q: (b, 0, 0)),
                     pl.BlockSpec((bb, S, H2), lambda b, q: (b, 0, 0))]
                    + weight_specs)
        return pl.pallas_call(
            kernel,
            out_shape=tuple(out_shapes),
            grid=grid,
            in_specs=in_specs,
            out_specs=tuple(out_specs),
            scratch_shapes=scratch_shapes,
            compiler_params=pltpu.CompilerParams(
                dimension_semantics=("parallel", "arbitrary"),
                vmem_limit_bytes=_VMEM_LIMIT),
        )

    args = (x1.astype(jnp.bfloat16), x2.astype(jnp.bfloat16)) + weight_args
    try:
        return build(True)(*args)
    except Exception:
        # pipeline_mode / Buffered(1) unsupported on this JAX build -> fall back
        # to default double-buffered weights (identical numerics).
        return build(False)(*args)


# ----------------------------- LM-head kernels --------------------------------

def _lm_head_kernel(x_ref, w_ref, o_ref):
    o_ref[...] = jnp.dot(x_ref[...], w_ref[...],
                         preferred_element_type=jnp.float32)


def _pick_head_tiles(M, F, V, budget):
    tm = min(M, 256)
    tn = min(V, 2048)

    def step_bytes(tm_, tn_):
        # double-buffered bf16 act + weight tiles, f32 output tile
        return 2 * (tm_ * F * 2 + F * tn_ * 2 + tm_ * tn_ * 4)

    while tn > 256 and tn % 256 == 0 and step_bytes(tm, tn) > budget:
        tn //= 2
    while tm > 64 and tm % 16 == 0 and step_bytes(tm, tn) > budget:
        tm //= 2
    return tm, tn


def lm_heads_v1_pallas(slab2d, w_stack, B, S):
    """logits1 = out1 @ W_lm1 and fused_logits = fused @ W_fused in ONE call.

    Head grid axis h selects the slab column block (0 -> out1, 2 -> fused) and
    the stacked weight; activations are read directly from the packed bf16
    [out1|out2|fused] slab (no JAX slicing)."""
    M, three_f = slab2d.shape
    F = three_f // 3
    V = w_stack.shape[-1]
    tm, tn = _pick_head_tiles(M, F, V, _TILE_BUDGET)
    grid = (2, pl.cdiv(M, tm), pl.cdiv(V, tn))
    out = pl.pallas_call(
        _lm_head_kernel,
        out_shape=jax.ShapeDtypeStruct((2, M, V), jnp.float32),
        grid=grid,
        in_specs=[pl.BlockSpec((tm, F), lambda h, i, j: (i, 2 * h)),
                  pl.BlockSpec((None, F, tn), lambda h, i, j: (h, 0, j))],
        out_specs=pl.BlockSpec((None, tm, tn), lambda h, i, j: (h, i, j)),
        compiler_params=pltpu.CompilerParams(
            dimension_semantics=("parallel", "parallel", "parallel"),
            vmem_limit_bytes=_VMEM_LIMIT),
    )(slab2d, w_stack)
    logits1 = out[0].reshape(B, S, V)
    fused_logits = out[1].reshape(B, S, V)
    return logits1, fused_logits


def lm_head2_pallas(slab2d, w2, B, S):
    M, three_f = slab2d.shape
    F = three_f // 3
    V = w2.shape[-1]
    tm, tn = _pick_head_tiles(M, F, V, _TILE_BUDGET)
    grid = (pl.cdiv(M, tm), pl.cdiv(V, tn))
    out = pl.pallas_call(
        _lm_head_kernel,
        out_shape=jax.ShapeDtypeStruct((M, V), jnp.float32),
        grid=grid,
        in_specs=[pl.BlockSpec((tm, F), lambda i, j: (i, 1)),   # col block 1 = out2
                  pl.BlockSpec((F, tn), lambda i, j: (0, j))],
        out_specs=pl.BlockSpec((tm, tn), lambda i, j: (i, j)),
        compiler_params=pltpu.CompilerParams(
            dimension_semantics=("parallel", "parallel"),
            vmem_limit_bytes=_VMEM_LIMIT),
    )(slab2d, w2)
    return out.reshape(B, S, V)


# ----------------------------- parameter construction ------------------------

def _init_linear(key, in_dim, out_dim, bias=True):
    kw, kb = jax.random.split(key)
    bound = 1.0 / math.sqrt(in_dim)
    w = jax.random.uniform(kw, (in_dim, out_dim), jnp.float32, -bound, bound)
    if not bias:
        return w
    b = jax.random.uniform(kb, (1, out_dim), jnp.float32, -bound, bound)
    return w, b


def pack_fusion_params(p, H1, H2, F):
    """Pre-pack EnhancedFusionLayer weights; matmul weights cast to bf16."""
    bf = lambda a: a.astype(jnp.bfloat16)
    fp = {}
    # query (+ residual projection) weights: [q | res], res only when H != F
    wq1 = p["wq1"] if H1 == F else jnp.concatenate([p["wq1"], p["wo1"][:H1, :]], axis=1)
    wq2 = p["wq2"] if H2 == F else jnp.concatenate([p["wq2"], p["wo2"][:H2, :]], axis=1)
    fp["w_q1r"], fp["b_q1"] = bf(wq1), p["bq1"]
    fp["w_q2r"], fp["b_q2"] = bf(wq2), p["bq2"]
    # fused key/value weights: [k | v]
    fp["w_kv1"] = bf(jnp.concatenate([p["wk1"], p["wv1"]], axis=1))
    fp["b_kv1"] = jnp.concatenate([p["bk1"], p["bv1"]], axis=1)
    fp["w_kv2"] = bf(jnp.concatenate([p["wk2"], p["wv2"]], axis=1))
    fp["b_kv2"] = jnp.concatenate([p["bk2"], p["bv2"]], axis=1)
    # output projections
    fp["wo1"], fp["bo1"] = bf(p["wo1"]), p["bo1"]
    fp["wo2"], fp["bo2"] = bf(p["wo2"]), p["bo2"]
    # fused concat projection: columns [fusion_linear | gate1 | gate2]
    fp["w_fgg"] = bf(jnp.concatenate([p["wf"], p["wg1"], p["wg2"]], axis=1))
    fp["b_fgg"] = jnp.concatenate([p["bf"], p["bg1"], p["bg2"]], axis=1)
    # layernorms (f32)
    fp["ln1w"], fp["ln1b"] = p["ln1w"], p["ln1b"]
    fp["ln2w"], fp["ln2b"] = p["ln2w"], p["ln2b"]
    return fp


def make_params(key, H1, H2, F, V1, V2):
    keys = jax.random.split(key, 24)
    p = {}
    p["wq1"], p["bq1"] = _init_linear(keys[0], H1, F)
    p["wk2"], p["bk2"] = _init_linear(keys[1], H2, F)
    p["wv2"], p["bv2"] = _init_linear(keys[2], H2, F)
    p["wq2"], p["bq2"] = _init_linear(keys[3], H2, F)
    p["wk1"], p["bk1"] = _init_linear(keys[4], H1, F)
    p["wv1"], p["bv1"] = _init_linear(keys[5], H1, F)
    p["wo1"], p["bo1"] = _init_linear(keys[6], F, F)
    p["wo2"], p["bo2"] = _init_linear(keys[7], F, F)
    p["wg1"], p["bg1"] = _init_linear(keys[8], H1 + H2, F)
    p["wg2"], p["bg2"] = _init_linear(keys[9], H1 + H2, F)
    p["wf"], p["bf"] = _init_linear(keys[10], H1 + H2, F)
    p["ln1w"] = jnp.ones((1, F), jnp.float32)
    p["ln1b"] = jnp.zeros((1, F), jnp.float32)
    p["ln2w"] = jnp.ones((1, F), jnp.float32)
    p["ln2b"] = jnp.zeros((1, F), jnp.float32)

    params = {"fusion": pack_fusion_params(p, H1, H2, F)}

    # NOTE: DualDecoderModel.proj1/proj2 (hidden*_proj) are dead code in the
    # reference forward -> not materialised.
    w_fused = _init_linear(keys[11], F, V1, bias=False)
    w_lm1 = _init_linear(keys[12], F, V1, bias=False)
    w_lm2 = _init_linear(keys[13], F, V2, bias=False)
    params["w_heads_v1"] = jnp.stack([w_lm1, w_fused]).astype(jnp.bfloat16)  # (2,F,V1)
    params["w_head2"] = w_lm2.astype(jnp.bfloat16)                           # (F,V2)
    params["tc_w1"], params["tc_b1"] = _init_linear(keys[14], H1 + H2, F)
    params["tc_w2"], params["tc_b2"] = _init_linear(keys[15], F, 1)

    # TODO(synk): model1 / model2 are external frozen HF decoders; simulated
    # here as deterministic embedding tables producing last_hidden_state.
    params["emb1"] = 0.02 * jax.random.normal(keys[16], (V1, H1), jnp.float32)
    params["emb2"] = 0.02 * jax.random.normal(keys[17], (V2, H2), jnp.float32)
    return params


# ----------------------------- full forward ----------------------------------

def dual_decoder_forward(params, input_ids1, input_ids2, return_details=True):
    """Mirrors DualDecoderModel.forward(input_ids1, input_ids2, mode='auto')
    with attention masks = None and labels = None."""
    hidden1 = params["emb1"][input_ids1]          # (B, S, H1)
    hidden2 = params["emb2"][input_ids2]          # (B, S, H2)
    B, S, _ = hidden1.shape
    F = params["fusion"]["wo1"].shape[0]

    # mode == 'auto' -> task classifier on CLS positions (a few kFLOPs; plain
    # JAX, and the host sync for the mode string happens only after all device
    # work below has been dispatched).
    cls = jnp.concatenate([hidden1[:, 0, :], hidden2[:, 0, :]], axis=-1)
    h = _gelu(cls @ params["tc_w1"] + params["tc_b1"])
    task_prob = jax.nn.sigmoid(h @ params["tc_w2"] + params["tc_b2"])
    task_mean = jnp.mean(task_prob)

    fusion_out = fusion_layer_pallas(hidden1, hidden2, params["fusion"],
                                     with_attn=return_details)
    if return_details:
        slab, gate1, gate2, attn12, attn21 = fusion_out
    else:
        slab, gate1, gate2 = fusion_out
        attn12 = attn21 = None

    # LM heads read straight from the packed bf16 [out1|out2|fused] slab.
    slab2d = slab.reshape(B * S, 3 * F)
    logits1, fused_logits = lm_heads_v1_pallas(slab2d, params["w_heads_v1"], B, S)
    logits2 = lm_head2_pallas(slab2d, params["w_head2"], B, S)

    # Host sync for the mode string only after all device work is enqueued.
    detected_mode = "multi" if bool(task_mean > 0.5) else "single"

    # labels1 / labels2 are None -> loss stays None (matches reference).
    # TODO(synk): CrossEntropyLoss(ignore_index=-100) path not exercised
    # because no labels are supplied in this synthetic run.
    out = {"loss": None,
           "fused_logits": fused_logits,
           "logits1": logits1,
           "logits2": logits2,
           "mode": detected_mode}
    if return_details:
        out.update({"gate1": gate1, "gate2": gate2,
                    "attn1_2": attn12, "attn2_1": attn21})
    return out


# ----------------------------- main -------------------------------------------

if __name__ == "__main__":
    B, S = 2, 8
    H1, H2 = 32, 48          # hidden_size1, hidden_size2
    F = 128                  # fusion_output_dim (lane-aligned)
    V1, V2 = 256, 384        # vocab sizes

    key = jax.random.PRNGKey(0)
    kp, k1, k2 = jax.random.split(key, 3)

    params = make_params(kp, H1, H2, F, V1, V2)
    input_ids1 = jax.random.randint(k1, (B, S), 0, V1, dtype=jnp.int32)
    input_ids2 = jax.random.randint(k2, (B, S), 0, V2, dtype=jnp.int32)

    out = dual_decoder_forward(params, input_ids1, input_ids2, return_details=True)

    jax.block_until_ready((out["fused_logits"], out["logits1"], out["logits2"],
                           out["gate1"], out["gate2"],
                           out["attn1_2"], out["attn2_1"]))

    assert out["loss"] is None
    assert out["fused_logits"].shape == (B, S, V1)
    assert out["logits1"].shape == (B, S, V1)
    assert out["logits2"].shape == (B, S, V2)
    assert out["gate1"].shape == (B, S, F)
    assert out["gate2"].shape == (B, S, F)
    assert out["attn1_2"].shape == (B, S, S)
    assert out["attn2_1"].shape == (B, S, S)
    assert out["mode"] in ("single", "multi")
    assert bool(jnp.all(jnp.isfinite(out["fused_logits"])))
    assert bool(jnp.all(jnp.isfinite(out["logits2"])))
    assert bool(jnp.allclose(jnp.sum(out["attn1_2"], axis=-1), 1.0, atol=1e-3))
    assert bool(jnp.allclose(jnp.sum(out["attn2_1"], axis=-1), 1.0, atol=1e-3))
    print("KERNEL_OK")
</pallas_src>

<mosaic_0001>
module attributes {stable_mosaic.version = 11 : i64} {
  func.func @_fusion_kernel(%arg0: i32, %arg1: i32, %arg2: memref<1x8x32xbf16, #tpu.memory_space<vmem>>, %arg3: memref<1x8x48xbf16, #tpu.memory_space<vmem>>, %arg4: memref<32x256xbf16, #tpu.memory_space<vmem>>, %arg5: memref<1x128xf32, #tpu.memory_space<vmem>>, %arg6: memref<32x256xbf16, #tpu.memory_space<vmem>>, %arg7: memref<1x256xf32, #tpu.memory_space<vmem>>, %arg8: memref<48x256xbf16, #tpu.memory_space<vmem>>, %arg9: memref<1x128xf32, #tpu.memory_space<vmem>>, %arg10: memref<48x256xbf16, #tpu.memory_space<vmem>>, %arg11: memref<1x256xf32, #tpu.memory_space<vmem>>, %arg12: memref<128x128xbf16, #tpu.memory_space<vmem>>, %arg13: memref<1x128xf32, #tpu.memory_space<vmem>>, %arg14: memref<128x128xbf16, #tpu.memory_space<vmem>>, %arg15: memref<1x128xf32, #tpu.memory_space<vmem>>, %arg16: memref<80x384xbf16, #tpu.memory_space<vmem>>, %arg17: memref<1x384xf32, #tpu.memory_space<vmem>>, %arg18: memref<1x128xf32, #tpu.memory_space<vmem>>, %arg19: memref<1x128xf32, #tpu.memory_space<vmem>>, %arg20: memref<1x128xf32, #tpu.memory_space<vmem>>, %arg21: memref<1x128xf32, #tpu.memory_space<vmem>>, %arg22: memref<1x8x384xbf16, #tpu.memory_space<vmem>>, %arg23: memref<1x8x128xf32, #tpu.memory_space<vmem>>, %arg24: memref<1x8x128xf32, #tpu.memory_space<vmem>>, %arg25: memref<1x8x8xf32, #tpu.memory_space<vmem>>, %arg26: memref<1x8x8xf32, #tpu.memory_space<vmem>>, %arg27: memref<1x8x256xbf16, #tpu.memory_space<vmem>>, %arg28: memref<1x8x256xbf16, #tpu.memory_space<vmem>>) attributes {dimension_semantics = [#tpu.dimension_semantics<parallel>, #tpu.dimension_semantics<arbitrary>], iteration_bounds = array<i64: 2, 1>, scalar_prefetch = 0 : i64, scratch_operands = 2 : i64, tpu.core_type = #tpu.core_type<tc>, window_params = [{transform_indices = @transform_0, window_bounds = array<i64: 1, 8, 32>}, {transform_indices = @transform_1, window_bounds = array<i64: 1, 8, 48>}, {pipeline_mode = #tpu.pipeline_mode<synchronous>, transform_indices = @transform_2, window_bounds = array<i64: 32, 256>}, {pipeline_mode = #tpu.pipeline_mode<synchronous>, transform_indices = @transform_3, window_bounds = array<i64: 1, 128>}, {pipeline_mode = #tpu.pipeline_mode<synchronous>, transform_indices = @transform_4, window_bounds = array<i64: 32, 256>}, {pipeline_mode = #tpu.pipeline_mode<synchronous>, transform_indices = @transform_5, window_bounds = array<i64: 1, 256>}, {pipeline_mode = #tpu.pipeline_mode<synchronous>, transform_indices = @transform_6, window_bounds = array<i64: 48, 256>}, {pipeline_mode = #tpu.pipeline_mode<synchronous>, transform_indices = @transform_7, window_bounds = array<i64: 1, 128>}, {pipeline_mode = #tpu.pipeline_mode<synchronous>, transform_indices = @transform_8, window_bounds = array<i64: 48, 256>}, {pipeline_mode = #tpu.pipeline_mode<synchronous>, transform_indices = @transform_9, window_bounds = array<i64: 1, 256>}, {pipeline_mode = #tpu.pipeline_mode<synchronous>, transform_indices = @transform_10, window_bounds = array<i64: 128, 128>}, {pipeline_mode = #tpu.pipeline_mode<synchronous>, transform_indices = @transform_11, window_bounds = array<i64: 1, 128>}, {pipeline_mode = #tpu.pipeline_mode<synchronous>, transform_indices = @transform_12, window_bounds = array<i64: 128, 128>}, {pipeline_mode = #tpu.pipeline_mode<synchronous>, transform_indices = @transform_13, window_bounds = array<i64: 1, 128>}, {pipeline_mode = #tpu.pipeline_mode<synchronous>, transform_indices = @transform_14, window_bounds = array<i64: 80, 384>}, {pipeline_mode = #tpu.pipeline_mode<synchronous>, transform_indices = @transform_15, window_bounds = array<i64: 1, 384>}, {pipeline_mode = #tpu.pipeline_mode<synchronous>, transform_indices = @transform_16, window_bounds = array<i64: 1, 128>}, {pipeline_mode = #tpu.pipeline_mode<synchronous>, transform_indices = @transform_17, window_bounds = array<i64: 1, 128>}, {pipeline_mode = #tpu.pipeline_mode<synchronous>, transform_indices = @transform_18, window_bounds = array<i64: 1, 128>}, {pipeline_mode = #tpu.pipeline_mode<synchronous>, transform_indices = @transform_19, window_bounds = array<i64: 1, 128>}, {transform_indices = @transform_20, window_bounds = array<i64: 1, 8, 384>}, {transform_indices = @transform_21, window_bounds = array<i64: 1, 8, 128>}, {transform_indices = @transform_22, window_bounds = array<i64: 1, 8, 128>}, {transform_indices = @transform_23, window_bounds = array<i64: 1, 8, 8>}, {transform_indices = @transform_24, window_bounds = array<i64: 1, 8, 8>}]} {
    %c0_i32 = arith.constant 0 : i32
    %0 = arith.cmpi eq, %arg1, %c0_i32 : i32
    %1 = arith.extui %0 : i1 to i32
    %c0_i32_0 = arith.constant 0 : i32
    %2 = arith.cmpi ne, %1, %c0_i32_0 : i32
    scf.if %2 {
      %c0_92 = arith.constant 0 : index
      %c0_93 = arith.constant 0 : index
      %c0_94 = arith.constant 0 : index
      %167 = vector.load %arg2[%c0_92, %c0_93, %c0_94] : memref<1x8x32xbf16, #tpu.memory_space<vmem>>, vector<1x8x32xbf16>
      %168 = vector.shape_cast %167 : vector<1x8x32xbf16> to vector<8x32xbf16>
      %c0_95 = arith.constant 0 : index
      %c0_96 = arith.constant 0 : index
      %c0_97 = arith.constant 0 : index
      %169 = vector.load %arg3[%c0_95, %c0_96, %c0_97] : memref<1x8x48xbf16, #tpu.memory_space<vmem>>, vector<1x8x48xbf16>
      %170 = vector.shape_cast %169 : vector<1x8x48xbf16> to vector<8x48xbf16>
      %c0_98 = arith.constant 0 : index
      %c0_99 = arith.constant 0 : index
      %171 = vector.load %arg6[%c0_98, %c0_99] : memref<32x256xbf16, #tpu.memory_space<vmem>>, vector<32x256xbf16>
      %cst_100 = arith.constant dense<0.000000e+00> : vector<8x256xf32>
      %172 = tpu.matmul %168, %171, %cst_100 {dimension_numbers = #tpu.dot_dimension_numbers<[1], [0], [0], [1], [0, 0, 1, 1], [], []>} : vector<8x32xbf16>, vector<32x256xbf16>, vector<8x256xf32> -> vector<8x256xf32>
      %c0_101 = arith.constant 0 : index
      %c0_102 = arith.constant 0 : index
      %173 = vector.load %arg7[%c0_101, %c0_102] : memref<1x256xf32, #tpu.memory_space<vmem>>, vector<1x256xf32>
      %174 = vector.broadcast %173 : vector<1x256xf32> to vector<8x256xf32>
      %175 = arith.addf %172, %174 : vector<8x256xf32>
      %c0_103 = arith.constant 0 : index
      %c0_104 = arith.constant 0 : index
      %176 = vector.load %arg10[%c0_103, %c0_104] : memref<48x256xbf16, #tpu.memory_space<vmem>>, vector<48x256xbf16>
      %cst_105 = arith.constant dense<0.000000e+00> : vector<8x256xf32>
      %177 = tpu.matmul %170, %176, %cst_105 {dimension_numbers = #tpu.dot_dimension_numbers<[1], [0], [0], [1], [0, 0, 1, 1], [], []>} : vector<8x48xbf16>, vector<48x256xbf16>, vector<8x256xf32> -> vector<8x256xf32>
      %c0_106 = arith.constant 0 : index
      %c0_107 = arith.constant 0 : index
      %178 = vector.load %arg11[%c0_106, %c0_107] : memref<1x256xf32, #tpu.memory_space<vmem>>, vector<1x256xf32>
      %179 = vector.broadcast %178 : vector<1x256xf32> to vector<8x256xf32>
      %180 = arith.addf %177, %179 : vector<8x256xf32>
      %181 = vector.shape_cast %175 : vector<8x256xf32> to vector<1x8x256xf32>
      %182 = arith.truncf %181 : vector<1x8x256xf32> to vector<1x8x256xbf16>
      %c0_108 = arith.constant 0 : index
      %c0_109 = arith.constant 0 : index
      %c0_110 = arith.constant 0 : index
      %183 = vector.load %arg27[%c0_108, %c0_109, %c0_110] : memref<1x8x256xbf16, #tpu.memory_space<vmem>>, vector<1x8x256xbf16>
      tpu.vector_store %arg27[%c0_108, %c0_109, %c0_110], %182 {strides = array<i32>} : memref<1x8x256xbf16, #tpu.memory_space<vmem>>, vector<1x8x256xbf16>,
      %184 = vector.shape_cast %180 : vector<8x256xf32> to vector<1x8x256xf32>
      %185 = arith.truncf %184 : vector<1x8x256xf32> to vector<1x8x256xbf16>
      %c0_111 = arith.constant 0 : index
      %c0_112 = arith.constant 0 : index
      %c0_113 = arith.constant 0 : index
      %186 = vector.load %arg28[%c0_111, %c0_112, %c0_113] : memref<1x8x256xbf16, #tpu.memory_space<vmem>>, vector<1x8x256xbf16>
      tpu.vector_store %arg28[%c0_111, %c0_112, %c0_113], %185 {strides = array<i32>} : memref<1x8x256xbf16, #tpu.memory_space<vmem>>, vector<1x8x256xbf16>,
    } else {
    }
    %c8_i32 = arith.constant 8 : i32
    %3 = arith.muli %arg1, %c8_i32 : i32
    %4 = tpu.assume_multiple %3, 8 : i32
    %c0 = arith.constant 0 : index
    %5 = arith.index_cast %4 : i32 to index
    %c0_1 = arith.constant 0 : index
    %6 = vector.load %arg2[%c0, %5, %c0_1] : memref<1x8x32xbf16, #tpu.memory_space<vmem>>, vector<1x8x32xbf16>
    %c0_2 = arith.constant 0 : index
    %7 = arith.index_cast %4 : i32 to index
    %c0_3 = arith.constant 0 : index
    %8 = vector.load %arg3[%c0_2, %7, %c0_3] : memref<1x8x48xbf16, #tpu.memory_space<vmem>>, vector<1x8x48xbf16>
    %9 = vector.shape_cast %6 : vector<1x8x32xbf16> to vector<8x32xbf16>
    %10 = vector.shape_cast %8 : vector<1x8x48xbf16> to vector<8x48xbf16>
    %c0_4 = arith.constant 0 : index
    %c0_5 = arith.constant 0 : index
    %11 = vector.load %arg4[%c0_4, %c0_5] : memref<32x256xbf16, #tpu.memory_space<vmem>>, vector<32x256xbf16>
    %cst = arith.constant dense<0.000000e+00> : vector<8x256xf32>
    %12 = tpu.matmul %9, %11, %cst {dimension_numbers = #tpu.dot_dimension_numbers<[1], [0], [0], [1], [0, 0, 1, 1], [], []>} : vector<8x32xbf16>, vector<32x256xbf16>, vector<8x256xf32> -> vector<8x256xf32>
    %13 = vector.extract_strided_slice %12 {offsets = [0, 0], sizes = [8, 128], strides = [1, 1]} : vector<8x256xf32> to vector<8x128xf32>
    %c0_6 = arith.constant 0 : index
    %c0_7 = arith.constant 0 : index
    %14 = vector.load %arg5[%c0_6, %c0_7] : memref<1x128xf32, #tpu.memory_space<vmem>>, vector<1x128xf32>
    %15 = vector.broadcast %14 : vector<1x128xf32> to vector<8x128xf32>
    %16 = arith.addf %13, %15 : vector<8x128xf32>
    %17 = arith.truncf %16 : vector<8x128xf32> to vector<8x128xbf16>
    %18 = vector.shape_cast %17 : vector<8x128xbf16> to vector<1x8x128xbf16>
    %19 = vector.extract_strided_slice %12 {offsets = [0, 128], sizes = [8, 128], strides = [1, 1]} : vector<8x256xf32> to vector<8x128xf32>
    %c0_8 = arith.constant 0 : index
    %c0_9 = arith.constant 0 : index
    %c0_10 = arith.constant 0 : index
    %20 = vector.load %arg28[%c0_8, %c0_9, %c0_10] : memref<1x8x256xbf16, #tpu.memory_space<vmem>>, vector<1x8x128xbf16>
    %c0_11 = arith.constant 0 : index
    %c0_12 = arith.constant 0 : index
    %c128 = arith.constant 128 : index
    %21 = vector.load %arg28[%c0_11, %c0_12, %c128] : memref<1x8x256xbf16, #tpu.memory_space<vmem>>, vector<1x8x128xbf16>
    "tpu.trace_start"() <{level = 10 : i32, message = "bqf,bkf->bqk"}> : () -> ()
    %cst_13 = arith.constant dense<0.000000e+00> : vector<1x8x8xf32>
    %22 = tpu.matmul %18, %20, %cst_13 {dimension_numbers = #tpu.dot_dimension_numbers<[2], [2], [1], [1], [0, 0, 0, 1, 1, 1], [0], [0]>} : vector<1x8x128xbf16>, vector<1x8x128xbf16>, vector<1x8x8xf32> -> vector<1x8x8xf32>
    "tpu.trace_stop"() : () -> ()
    %cst_14 = arith.constant 0.0883883461 : f32
    %23 = vector.broadcast %cst_14 : f32 to vector<1x8x8xf32>
    %24 = arith.mulf %22, %23 : vector<1x8x8xf32>
    %cst_15 = arith.constant dense<0xFF800000> : vector<1x8xf32>
    %25 = vector.multi_reduction <maximumf>, %24, %cst_15 [2] : vector<1x8x8xf32> to vector<1x8xf32>
    %26 = vector.shape_cast %25 : vector<1x8xf32> to vector<1x8x1xf32>
    %27 = vector.broadcast %26 : vector<1x8x1xf32> to vector<1x8x8xf32>
    %28 = arith.subf %24, %27 : vector<1x8x8xf32>
    %29 = math.exp %28 : vector<1x8x8xf32>
    %cst_16 = arith.constant dense<0.000000e+00> : vector<1x8xf32>
    %30 = vector.multi_reduction <add>, %29, %cst_16 [2] : vector<1x8x8xf32> to vector<1x8xf32>
    %31 = vector.shape_cast %30 : vector<1x8xf32> to vector<1x8x1xf32>
    %32 = vector.broadcast %31 : vector<1x8x1xf32> to vector<1x8x8xf32>
    %33 = arith.divf %29, %32 : vector<1x8x8xf32>
    %34 = arith.truncf %33 : vector<1x8x8xf32> to vector<1x8x8xbf16>
    "tpu.trace_start"() <{level = 10 : i32, message = "bqk,bkf->bqf"}> : () -> ()
    %cst_17 = arith.constant dense<0.000000e+00> : vector<1x8x128xf32>
    %35 = tpu.matmul %34, %21, %cst_17 {dimension_numbers = #tpu.dot_dimension_numbers<[2], [1], [1], [2], [0, 0, 0, 1, 1, 2], [0], [0]>} : vector<1x8x8xbf16>, vector<1x8x128xbf16>, vector<1x8x128xf32> -> vector<1x8x128xf32>
    "tpu.trace_stop"() : () -> ()
    %36 = vector.shape_cast %35 : vector<1x8x128xf32> to vector<8x128xf32>
    %37 = arith.truncf %36 : vector<8x128xf32> to vector<8x128xbf16>
    %c0_18 = arith.constant 0 : index
    %c0_19 = arith.constant 0 : index
    %38 = vector.load %arg12[%c0_18, %c0_19] : memref<128x128xbf16, #tpu.memory_space<vmem>>, vector<128x128xbf16>
    %cst_20 = arith.constant dense<0.000000e+00> : vector<8x128xf32>
    %39 = tpu.matmul %37, %38, %cst_20 {dimension_numbers = #tpu.dot_dimension_numbers<[1], [0], [0], [1], [0, 0, 1, 1], [], []>} : vector<8x128xbf16>, vector<128x128xbf16>, vector<8x128xf32> -> vector<8x128xf32>
    %c0_21 = arith.constant 0 : index
    %c0_22 = arith.constant 0 : index
    %40 = vector.load %arg13[%c0_21, %c0_22] : memref<1x128xf32, #tpu.memory_space<vmem>>, vector<1x128xf32>
    %41 = vector.broadcast %40 : vector<1x128xf32> to vector<8x128xf32>
    %42 = arith.addf %39, %41 : vector<8x128xf32>
    %43 = arith.addf %42, %19 : vector<8x128xf32>
    %c0_23 = arith.constant 0 : index
    %c0_24 = arith.constant 0 : index
    %44 = vector.load %arg18[%c0_23, %c0_24] : memref<1x128xf32, #tpu.memory_space<vmem>>, vector<1x128xf32>
    %c0_25 = arith.constant 0 : index
    %c0_26 = arith.constant 0 : index
    %45 = vector.load %arg19[%c0_25, %c0_26] : memref<1x128xf32, #tpu.memory_space<vmem>>, vector<1x128xf32>
    %cst_27 = arith.constant dense<0.000000e+00> : vector<8xf32>
    %46 = vector.multi_reduction <add>, %43, %cst_27 [1] : vector<8x128xf32> to vector<8xf32>
    %47 = vector.shape_cast %46 : vector<8xf32> to vector<8x1xf32>
    %cst_28 = arith.constant 1.280000e+02 : f32
    %48 = vector.broadcast %cst_28 : f32 to vector<8x1xf32>
    %49 = arith.divf %47, %48 : vector<8x1xf32>
    %50 = vector.broadcast %49 : vector<8x1xf32> to vector<8x128xf32>
    %51 = arith.subf %43, %50 : vector<8x128xf32>
    %52 = arith.mulf %51, %51 : vector<8x128xf32>
    %cst_29 = arith.constant dense<0.000000e+00> : vector<8xf32>
    %53 = vector.multi_reduction <add>, %52, %cst_29 [1] : vector<8x128xf32> to vector<8xf32>
    %54 = vector.shape_cast %53 : vector<8xf32> to vector<8x1xf32>
    %cst_30 = arith.constant 1.280000e+02 : f32
    %55 = vector.broadcast %cst_30 : f32 to vector<8x1xf32>
    %56 = arith.divf %54, %55 : vector<8x1xf32>
    %57 = vector.broadcast %49 : vector<8x1xf32> to vector<8x128xf32>
    %58 = arith.subf %43, %57 : vector<8x128xf32>
    %cst_31 = arith.constant 9.99999974E-6 : f32
    %59 = vector.broadcast %cst_31 : f32 to vector<8x1xf32>
    %60 = arith.addf %56, %59 : vector<8x1xf32>
    %61 = math.rsqrt %60 : vector<8x1xf32>
    %62 = vector.broadcast %61 : vector<8x1xf32> to vector<8x128xf32>
    %63 = arith.mulf %58, %62 : vector<8x128xf32>
    %64 = vector.broadcast %44 : vector<1x128xf32> to vector<8x128xf32>
    %65 = arith.mulf %63, %64 : vector<8x128xf32>
    %66 = vector.broadcast %45 : vector<1x128xf32> to vector<8x128xf32>
    %67 = arith.addf %65, %66 : vector<8x128xf32>
    %68 = vector.shape_cast %67 : vector<8x128xf32> to vector<1x8x128xf32>
    %69 = arith.truncf %68 : vector<1x8x128xf32> to vector<1x8x128xbf16>
    %c0_32 = arith.constant 0 : index
    %c0_33 = arith.constant 0 : index
    %c0_34 = arith.constant 0 : index
    %70 = vector.load %arg22[%c0_32, %c0_33, %c0_34] : memref<1x8x384xbf16, #tpu.memory_space<vmem>>, vector<1x8x128xbf16>
    tpu.vector_store %arg22[%c0_32, %c0_33, %c0_34], %69 {strides = array<i32>} : memref<1x8x384xbf16, #tpu.memory_space<vmem>>, vector<1x8x128xbf16>,
    %c0_35 = arith.constant 0 : index
    %c0_36 = arith.constant 0 : index
    %c0_37 = arith.constant 0 : index
    %71 = vector.load %arg25[%c0_35, %c0_36, %c0_37] : memref<1x8x8xf32, #tpu.memory_space<vmem>>, vector<1x8x8xf32>
    tpu.vector_store %arg25[%c0_35, %c0_36, %c0_37], %33 {strides = array<i32>} : memref<1x8x8xf32, #tpu.memory_space<vmem>>, vector<1x8x8xf32>,
    %c0_38 = arith.constant 0 : index
    %c0_39 = arith.constant 0 : index
    %72 = vector.load %arg8[%c0_38, %c0_39] : memref<48x256xbf16, #tpu.memory_space<vmem>>, vector<48x256xbf16>
    %cst_40 = arith.constant dense<0.000000e+00> : vector<8x256xf32>
    %73 = tpu.matmul %10, %72, %cst_40 {dimension_numbers = #tpu.dot_dimension_numbers<[1], [0], [0], [1], [0, 0, 1, 1], [], []>} : vector<8x48xbf16>, vector<48x256xbf16>, vector<8x256xf32> -> vector<8x256xf32>
    %74 = vector.extract_strided_slice %73 {offsets = [0, 0], sizes = [8, 128], strides = [1, 1]} : vector<8x256xf32> to vector<8x128xf32>
    %c0_41 = arith.constant 0 : index
    %c0_42 = arith.constant 0 : index
    %75 = vector.load %arg9[%c0_41, %c0_42] : memref<1x128xf32, #tpu.memory_space<vmem>>, vector<1x128xf32>
    %76 = vector.broadcast %75 : vector<1x128xf32> to vector<8x128xf32>
    %77 = arith.addf %74, %76 : vector<8x128xf32>
    %78 = arith.truncf %77 : vector<8x128xf32> to vector<8x128xbf16>
    %79 = vector.shape_cast %78 : vector<8x128xbf16> to vector<1x8x128xbf16>
    %80 = vector.extract_strided_slice %73 {offsets = [0, 128], sizes = [8, 128], strides = [1, 1]} : vector<8x256xf32> to vector<8x128xf32>
    %c0_43 = arith.constant 0 : index
    %c0_44 = arith.constant 0 : index
    %c0_45 = arith.constant 0 : index
    %81 = vector.load %arg27[%c0_43, %c0_44, %c0_45] : memref<1x8x256xbf16, #tpu.memory_space<vmem>>, vector<1x8x128xbf16>
    %c0_46 = arith.constant 0 : index
    %c0_47 = arith.constant 0 : index
    %c128_48 = arith.constant 128 : index
    %82 = vector.load %arg27[%c0_46, %c0_47, %c128_48] : memref<1x8x256xbf16, #tpu.memory_space<vmem>>, vector<1x8x128xbf16>
    "tpu.trace_start"() <{level = 10 : i32, message = "bqf,bkf->bqk"}> : () -> ()
    %cst_49 = arith.constant dense<0.000000e+00> : vector<1x8x8xf32>
    %83 = tpu.matmul %79, %81, %cst_49 {dimension_numbers = #tpu.dot_dimension_numbers<[2], [2], [1], [1], [0, 0, 0, 1, 1, 1], [0], [0]>} : vector<1x8x128xbf16>, vector<1x8x128xbf16>, vector<1x8x8xf32> -> vector<1x8x8xf32>
    "tpu.trace_stop"() : () -> ()
    %cst_50 = arith.constant 0.0883883461 : f32
    %84 = vector.broadcast %cst_50 : f32 to vector<1x8x8xf32>
    %85 = arith.mulf %83, %84 : vector<1x8x8xf32>
    %cst_51 = arith.constant dense<0xFF800000> : vector<1x8xf32>
    %86 = vector.multi_reduction <maximumf>, %85, %cst_51 [2] : vector<1x8x8xf32> to vector<1x8xf32>
    %87 = vector.shape_cast %86 : vector<1x8xf32> to vector<1x8x1xf32>
    %88 = vector.broadcast %87 : vector<1x8x1xf32> to vector<1x8x8xf32>
    %89 = arith.subf %85, %88 : vector<1x8x8xf32>
    %90 = math.exp %89 : vector<1x8x8xf32>
    %cst_52 = arith.constant dense<0.000000e+00> : vector<1x8xf32>
    %91 = vector.multi_reduction <add>, %90, %cst_52 [2] : vector<1x8x8xf32> to vector<1x8xf32>
    %92 = vector.shape_cast %91 : vector<1x8xf32> to vector<1x8x1xf32>
    %93 = vector.broadcast %92 : vector<1x8x1xf32> to vector<1x8x8xf32>
    %94 = arith.divf %90, %93 : vector<1x8x8xf32>
    %95 = arith.truncf %94 : vector<1x8x8xf32> to vector<1x8x8xbf16>
    "tpu.trace_start"() <{level = 10 : i32, message = "bqk,bkf->bqf"}> : () -> ()
    %cst_53 = arith.constant dense<0.000000e+00> : vector<1x8x128xf32>
    %96 = tpu.matmul %95, %82, %cst_53 {dimension_numbers = #tpu.dot_dimension_numbers<[2], [1], [1], [2], [0, 0, 0, 1, 1, 2], [0], [0]>} : vector<1x8x8xbf16>, vector<1x8x128xbf16>, vector<1x8x128xf32> -> vector<1x8x128xf32>
    "tpu.trace_stop"() : () -> ()
    %97 = vector.shape_cast %96 : vector<1x8x128xf32> to vector<8x128xf32>
    %98 = arith.truncf %97 : vector<8x128xf32> to vector<8x128xbf16>
    %c0_54 = arith.constant 0 : index
    %c0_55 = arith.constant 0 : index
    %99 = vector.load %arg14[%c0_54, %c0_55] : memref<128x128xbf16, #tpu.memory_space<vmem>>, vector<128x128xbf16>
    %cst_56 = arith.constant dense<0.000000e+00> : vector<8x128xf32>
    %100 = tpu.matmul %98, %99, %cst_56 {dimension_numbers = #tpu.dot_dimension_numbers<[1], [0], [0], [1], [0, 0, 1, 1], [], []>} : vector<8x128xbf16>, vector<128x128xbf16>, vector<8x128xf32> -> vector<8x128xf32>
    %c0_57 = arith.constant 0 : index
    %c0_58 = arith.constant 0 : index
    %101 = vector.load %arg15[%c0_57, %c0_58] : memref<1x128xf32, #tpu.memory_space<vmem>>, vector<1x128xf32>
    %102 = vector.broadcast %101 : vector<1x128xf32> to vector<8x128xf32>
    %103 = arith.addf %100, %102 : vector<8x128xf32>
    %104 = arith.addf %103, %80 : vector<8x128xf32>
    %c0_59 = arith.constant 0 : index
    %c0_60 = arith.constant 0 : index
    %105 = vector.load %arg20[%c0_59, %c0_60] : memref<1x128xf32, #tpu.memory_space<vmem>>, vector<1x128xf32>
    %c0_61 = arith.constant 0 : index
    %c0_62 = arith.constant 0 : index
    %106 = vector.load %arg21[%c0_61, %c0_62] : memref<1x128xf32, #tpu.memory_space<vmem>>, vector<1x128xf32>
    %cst_63 = arith.constant dense<0.000000e+00> : vector<8xf32>
    %107 = vector.multi_reduction <add>, %104, %cst_63 [1] : vector<8x128xf32> to vector<8xf32>
    %108 = vector.shape_cast %107 : vector<8xf32> to vector<8x1xf32>
    %cst_64 = arith.constant 1.280000e+02 : f32
    %109 = vector.broadcast %cst_64 : f32 to vector<8x1xf32>
    %110 = arith.divf %108, %109 : vector<8x1xf32>
    %111 = vector.broadcast %110 : vector<8x1xf32> to vector<8x128xf32>
    %112 = arith.subf %104, %111 : vector<8x128xf32>
    %113 = arith.mulf %112, %112 : vector<8x128xf32>
    %cst_65 = arith.constant dense<0.000000e+00> : vector<8xf32>
    %114 = vector.multi_reduction <add>, %113, %cst_65 [1] : vector<8x128xf32> to vector<8xf32>
    %115 = vector.shape_cast %114 : vector<8xf32> to vector<8x1xf32>
    %cst_66 = arith.constant 1.280000e+02 : f32
    %116 = vector.broadcast %cst_66 : f32 to vector<8x1xf32>
    %117 = arith.divf %115, %116 : vector<8x1xf32>
    %118 = vector.broadcast %110 : vector<8x1xf32> to vector<8x128xf32>
    %119 = arith.subf %104, %118 : vector<8x128xf32>
    %cst_67 = arith.constant 9.99999974E-6 : f32
    %120 = vector.broadcast %cst_67 : f32 to vector<8x1xf32>
    %121 = arith.addf %117, %120 : vector<8x1xf32>
    %122 = math.rsqrt %121 : vector<8x1xf32>
    %123 = vector.broadcast %122 : vector<8x1xf32> to vector<8x128xf32>
    %124 = arith.mulf %119, %123 : vector<8x128xf32>
    %125 = vector.broadcast %105 : vector<1x128xf32> to vector<8x128xf32>
    %126 = arith.mulf %124, %125 : vector<8x128xf32>
    %127 = vector.broadcast %106 : vector<1x128xf32> to vector<8x128xf32>
    %128 = arith.addf %126, %127 : vector<8x128xf32>
    %129 = vector.shape_cast %128 : vector<8x128xf32> to vector<1x8x128xf32>
    %130 = arith.truncf %129 : vector<1x8x128xf32> to vector<1x8x128xbf16>
    %c0_68 = arith.constant 0 : index
    %c0_69 = arith.constant 0 : index
    %c128_70 = arith.constant 128 : index
    %131 = vector.load %arg22[%c0_68, %c0_69, %c128_70] : memref<1x8x384xbf16, #tpu.memory_space<vmem>>, vector<1x8x128xbf16>
    tpu.vector_store %arg22[%c0_68, %c0_69, %c128_70], %130 {strides = array<i32>} : memref<1x8x384xbf16, #tpu.memory_space<vmem>>, vector<1x8x128xbf16>,
    %c0_71 = arith.constant 0 : index
    %c0_72 = arith.constant 0 : index
    %c0_73 = arith.constant 0 : index
    %132 = vector.load %arg26[%c0_71, %c0_72, %c0_73] : memref<1x8x8xf32, #tpu.memory_space<vmem>>, vector<1x8x8xf32>
    tpu.vector_store %arg26[%c0_71, %c0_72, %c0_73], %94 {strides = array<i32>} : memref<1x8x8xf32, #tpu.memory_space<vmem>>, vector<1x8x8xf32>,
    %133 = tpu.concatenate %9, %10 in 1 : vector<8x32xbf16>, vector<8x48xbf16> -> vector<8x80xbf16>
    %c0_74 = arith.constant 0 : index
    %c0_75 = arith.constant 0 : index
    %134 = vector.load %arg16[%c0_74, %c0_75] : memref<80x384xbf16, #tpu.memory_space<vmem>>, vector<80x384xbf16>
    %cst_76 = arith.constant dense<0.000000e+00> : vector<8x384xf32>
    %135 = tpu.matmul %133, %134, %cst_76 {dimension_numbers = #tpu.dot_dimension_numbers<[1], [0], [0], [1], [0, 0, 1, 1], [], []>} : vector<8x80xbf16>, vector<80x384xbf16>, vector<8x384xf32> -> vector<8x384xf32>
    %c0_77 = arith.constant 0 : index
    %c0_78 = arith.constant 0 : index
    %136 = vector.load %arg17[%c0_77, %c0_78] : memref<1x384xf32, #tpu.memory_space<vmem>>, vector<1x384xf32>
    %137 = vector.broadcast %136 : vector<1x384xf32> to vector<8x384xf32>
    %138 = arith.addf %135, %137 : vector<8x384xf32>
    %139 = vector.extract_strided_slice %138 {offsets = [0, 0], sizes = [8, 128], strides = [1, 1]} : vector<8x384xf32> to vector<8x128xf32>
    %cst_79 = arith.constant 5.000000e-01 : f32
    %140 = vector.broadcast %cst_79 : f32 to vector<8x128xf32>
    %141 = arith.mulf %140, %139 : vector<8x128xf32>
    %cst_80 = arith.constant 0.707106769 : f32
    %142 = vector.broadcast %cst_80 : f32 to vector<8x128xf32>
    %143 = arith.mulf %139, %142 : vector<8x128xf32>
    %144 = math.erf %143 : vector<8x128xf32>
    %cst_81 = arith.constant 1.000000e+00 : f32
    %145 = vector.broadcast %cst_81 : f32 to vector<8x128xf32>
    %146 = arith.addf %145, %144 : vector<8x128xf32>
    %147 = arith.mulf %141, %146 : vector<8x128xf32>
    %148 = vector.shape_cast %147 : vector<8x128xf32> to vector<1x8x128xf32>
    %149 = arith.truncf %148 : vector<1x8x128xf32> to vector<1x8x128xbf16>
    %c0_82 = arith.constant 0 : index
    %c0_83 = arith.constant 0 : index
    %c256 = arith.constant 256 : index
    %150 = vector.load %arg22[%c0_82, %c0_83, %c256] : memref<1x8x384xbf16, #tpu.memory_space<vmem>>, vector<1x8x128xbf16>
    tpu.vector_store %arg22[%c0_82, %c0_83, %c256], %149 {strides = array<i32>} : memref<1x8x384xbf16, #tpu.memory_space<vmem>>, vector<1x8x128xbf16>,
    %151 = vector.extract_strided_slice %138 {offsets = [0, 128], sizes = [8, 128], strides = [1, 1]} : vector<8x384xf32> to vector<8x128xf32>
    %152 = arith.negf %151 : vector<8x128xf32>
    %153 = math.exp %152 : vector<8x128xf32>
    %cst_84 = arith.constant 1.000000e+00 : f32
    %154 = vector.broadcast %cst_84 : f32 to vector<8x128xf32>
    %155 = arith.addf %154, %153 : vector<8x128xf32>
    %156 = arith.divf %154, %155 : vector<8x128xf32>
    %157 = vector.shape_cast %156 : vector<8x128xf32> to vector<1x8x128xf32>
    %c0_85 = arith.constant 0 : index
    %c0_86 = arith.constant 0 : index
    %c0_87 = arith.constant 0 : index
    %158 = vector.load %arg23[%c0_85, %c0_86, %c0_87] : memref<1x8x128xf32, #tpu.memory_space<vmem>>, vector<1x8x128xf32>
    tpu.vector_store %arg23[%c0_85, %c0_86, %c0_87], %157 {strides = array<i32>} : memref<1x8x128xf32, #tpu.memory_space<vmem>>, vector<1x8x128xf32>,
    %159 = vector.extract_strided_slice %138 {offsets = [0, 256], sizes = [8, 128], strides = [1, 1]} : vector<8x384xf32> to vector<8x128xf32>
    %160 = arith.negf %159 : vector<8x128xf32>
    %161 = math.exp %160 : vector<8x128xf32>
    %cst_88 = arith.constant 1.000000e+00 : f32
    %162 = vector.broadcast %cst_88 : f32 to vector<8x128xf32>
    %163 = arith.addf %162, %161 : vector<8x128xf32>
    %164 = arith.divf %162, %163 : vector<8x128xf32>
    %165 = vector.shape_cast %164 : vector<8x128xf32> to vector<1x8x128xf32>
    %c0_89 = arith.constant 0 : index
    %c0_90 = arith.constant 0 : index
    %c0_91 = arith.constant 0 : index
    %166 = vector.load %arg24[%c0_89, %c0_90, %c0_91] : memref<1x8x128xf32, #tpu.memory_space<vmem>>, vector<1x8x128xf32>
    tpu.vector_store %arg24[%c0_89, %c0_90, %c0_91], %165 {strides = array<i32>} : memref<1x8x128xf32, #tpu.memory_space<vmem>>, vector<1x8x128xf32>,
    return
  }
  func.func @transform_0(%arg0: i32, %arg1: i32) -> (i32, i32, i32) {
    %c0_i32 = arith.constant 0 : i32
    %c0_i32_0 = arith.constant 0 : i32
    %c0_i32_1 = arith.constant 0 : i32
    return %arg0, %c0_i32, %c0_i32_0 : i32, i32, i32
  }
  func.func @transform_1(%arg0: i32, %arg1: i32) -> (i32, i32, i32) {
    %c0_i32 = arith.constant 0 : i32
    %c0_i32_0 = arith.constant 0 : i32
    %c0_i32_1 = arith.constant 0 : i32
    return %arg0, %c0_i32, %c0_i32_0 : i32, i32, i32
  }
  func.func @transform_2(%arg0: i32, %arg1: i32) -> (i32, i32) {
    %c0_i32 = arith.constant 0 : i32
    %c0_i32_0 = arith.constant 0 : i32
    %c0_i32_1 = arith.constant 0 : i32
    return %c0_i32, %c0_i32_0 : i32, i32
  }
  func.func @transform_3(%arg0: i32, %arg1: i32) -> (i32, i32) {
    %c0_i32 = arith.constant 0 : i32
    %c0_i32_0 = arith.constant 0 : i32
    %c0_i32_1 = arith.constant 0 : i32
    return %c0_i32, %c0_i32_0 : i32, i32
  }
  func.func @transform_4(%arg0: i32, %arg1: i32) -> (i32, i32) {
    %c0_i32 = arith.constant 0 : i32
    %c0_i32_0 = arith.constant 0 : i32
    %c0_i32_1 = arith.constant 0 : i32
    return %c0_i32, %c0_i32_0 : i32, i32
  }
  func.func @transform_5(%arg0: i32, %arg1: i32) -> (i32, i32) {
    %c0_i32 = arith.constant 0 : i32
    %c0_i32_0 = arith.constant 0 : i32
    %c0_i32_1 = arith.constant 0 : i32
    return %c0_i32, %c0_i32_0 : i32, i32
  }
  func.func @transform_6(%arg0: i32, %arg1: i32) -> (i32, i32) {
    %c0_i32 = arith.constant 0 : i32
    %c0_i32_0 = arith.constant 0 : i32
    %c0_i32_1 = arith.constant 0 : i32
    return %c0_i32, %c0_i32_0 : i32, i32
  }
  func.func @transform_7(%arg0: i32, %arg1: i32) -> (i32, i32) {
    %c0_i32 = arith.constant 0 : i32
    %c0_i32_0 = arith.constant 0 : i32
    %c0_i32_1 = arith.constant 0 : i32
    return %c0_i32, %c0_i32_0 : i32, i32
  }
  func.func @transform_8(%arg0: i32, %arg1: i32) -> (i32, i32) {
    %c0_i32 = arith.constant 0 : i32
    %c0_i32_0 = arith.constant 0 : i32
    %c0_i32_1 = arith.constant 0 : i32
    return %c0_i32, %c0_i32_0 : i32, i32
  }
  func.func @transform_9(%arg0: i32, %arg1: i32) -> (i32, i32) {
    %c0_i32 = arith.constant 0 : i32
    %c0_i32_0 = arith.constant 0 : i32
    %c0_i32_1 = arith.constant 0 : i32
    return %c0_i32, %c0_i32_0 : i32, i32
  }
  func.func @transform_10(%arg0: i32, %arg1: i32) -> (i32, i32) {
    %c0_i32 = arith.constant 0 : i32
    %c0_i32_0 = arith.constant 0 : i32
    %c0_i32_1 = arith.constant 0 : i32
    return %c0_i32, %c0_i32_0 : i32, i32
  }
  func.func @transform_11(%arg0: i32, %arg1: i32) -> (i32, i32) {
    %c0_i32 = arith.constant 0 : i32
    %c0_i32_0 = arith.constant 0 : i32
    %c0_i32_1 = arith.constant 0 : i32
    return %c0_i32, %c0_i32_0 : i32, i32
  }
  func.func @transform_12(%arg0: i32, %arg1: i32) -> (i32, i32) {
    %c0_i32 = arith.constant 0 : i32
    %c0_i32_0 = arith.constant 0 : i32
    %c0_i32_1 = arith.constant 0 : i32
    return %c0_i32, %c0_i32_0 : i32, i32
  }
  func.func @transform_13(%arg0: i32, %arg1: i32) -> (i32, i32) {
    %c0_i32 = arith.constant 0 : i32
    %c0_i32_0 = arith.constant 0 : i32
    %c0_i32_1 = arith.constant 0 : i32
    return %c0_i32, %c0_i32_0 : i32, i32
  }
  func.func @transform_14(%arg0: i32, %arg1: i32) -> (i32, i32) {
    %c0_i32 = arith.constant 0 : i32
    %c0_i32_0 = arith.constant 0 : i32
    %c0_i32_1 = arith.constant 0 : i32
    return %c0_i32, %c0_i32_0 : i32, i32
  }
  func.func @transform_15(%arg0: i32, %arg1: i32) -> (i32, i32) {
    %c0_i32 = arith.constant 0 : i32
    %c0_i32_0 = arith.constant 0 : i32
    %c0_i32_1 = arith.constant 0 : i32
    return %c0_i32, %c0_i32_0 : i32, i32
  }
  func.func @transform_16(%arg0: i32, %arg1: i32) -> (i32, i32) {
    %c0_i32 = arith.constant 0 : i32
    %c0_i32_0 = arith.constant 0 : i32
    %c0_i32_1 = arith.constant 0 : i32
    return %c0_i32, %c0_i32_0 : i32, i32
  }
  func.func @transform_17(%arg0: i32, %arg1: i32) -> (i32, i32) {
    %c0_i32 = arith.constant 0 : i32
    %c0_i32_0 = arith.constant 0 : i32
    %c0_i32_1 = arith.constant 0 : i32
    return %c0_i32, %c0_i32_0 : i32, i32
  }
  func.func @transform_18(%arg0: i32, %arg1: i32) -> (i32, i32) {
    %c0_i32 = arith.constant 0 : i32
    %c0_i32_0 = arith.constant 0 : i32
    %c0_i32_1 = arith.constant 0 : i32
    return %c0_i32, %c0_i32_0 : i32, i32
  }
  func.func @transform_19(%arg0: i32, %arg1: i32) -> (i32, i32) {
    %c0_i32 = arith.constant 0 : i32
    %c0_i32_0 = arith.constant 0 : i32
    %c0_i32_1 = arith.constant 0 : i32
    return %c0_i32, %c0_i32_0 : i32, i32
  }
  func.func @transform_20(%arg0: i32, %arg1: i32) -> (i32, i32, i32) {
    %c0_i32 = arith.constant 0 : i32
    %c0_i32_0 = arith.constant 0 : i32
    return %arg0, %arg1, %c0_i32 : i32, i32, i32
  }
  func.func @transform_21(%arg0: i32, %arg1: i32) -> (i32, i32, i32) {
    %c0_i32 = arith.constant 0 : i32
    %c0_i32_0 = arith.constant 0 : i32
    return %arg0, %arg1, %c0_i32 : i32, i32, i32
  }
  func.func @transform_22(%arg0: i32, %arg1: i32) -> (i32, i32, i32) {
    %c0_i32 = arith.constant 0 : i32
    %c0_i32_0 = arith.constant 0 : i32
    return %arg0, %arg1, %c0_i32 : i32, i32, i32
  }
  func.func @transform_23(%arg0: i32, %arg1: i32) -> (i32, i32, i32) {
    %c0_i32 = arith.constant 0 : i32
    %c0_i32_0 = arith.constant 0 : i32
    return %arg0, %arg1, %c0_i32 : i32, i32, i32
  }
  func.func @transform_24(%arg0: i32, %arg1: i32) -> (i32, i32, i32) {
    %c0_i32 = arith.constant 0 : i32
    %c0_i32_0 = arith.constant 0 : i32
    return %arg0, %arg1, %c0_i32 : i32, i32, i32
  }
}

module attributes {stable_mosaic.version = 11 : i64} {
  func.func @_fusion_kernel(%arg0: i32, %arg1: i32, %arg2: memref<1x8x32xbf16, #tpu.memory_space<vmem>>, %arg3: memref<1x8x48xbf16, #tpu.memory_space<vmem>>, %arg4: memref<32x256xbf16, #tpu.memory_space<vmem>>, %arg5: memref<1x128xf32, #tpu.memory_space<vmem>>, %arg6: memref<32x256xbf16, #tpu.memory_space<vmem>>, %arg7: memref<1x256xf32, #tpu.memory_space<vmem>>, %arg8: memref<48x256xbf16, #tpu.memory_space<vmem>>, %arg9: memref<1x128xf32, #tpu.memory_space<vmem>>, %arg10: memref<48x256xbf16, #tpu.memory_space<vmem>>, %arg11: memref<1x256xf32, #tpu.memory_space<vmem>>, %arg12: memref<128x128xbf16, #tpu.memory_space<vmem>>, %arg13: memref<1x128xf32, #tpu.memory_space<vmem>>, %arg14: memref<128x128xbf16, #tpu.memory_space<vmem>>, %arg15: memref<1x128xf32, #tpu.memory_space<vmem>>, %arg16: memref<80x384xbf16, #tpu.memory_space<vmem>>, %arg17: memref<1x384xf32, #tpu.memory_space<vmem>>, %arg18: memref<1x128xf32, #tpu.memory_space<vmem>>, %arg19: memref<1x128xf32, #tpu.memory_space<vmem>>, %arg20: memref<1x128xf32, #tpu.memory_space<vmem>>, %arg21: memref<1x128xf32, #tpu.memory_space<vmem>>, %arg22: memref<1x8x384xbf16, #tpu.memory_space<vmem>>, %arg23: memref<1x8x128xf32, #tpu.memory_space<vmem>>, %arg24: memref<1x8x128xf32, #tpu.memory_space<vmem>>, %arg25: memref<1x8x8xf32, #tpu.memory_space<vmem>>, %arg26: memref<1x8x8xf32, #tpu.memory_space<vmem>>, %arg27: memref<1x8x256xbf16, #tpu.memory_space<vmem>>, %arg28: memref<1x8x256xbf16, #tpu.memory_space<vmem>>) attributes {dimension_semantics = [#tpu.dimension_semantics<parallel>, #tpu.dimension_semantics<arbitrary>], iteration_bounds = array<i64: 2, 1>, scalar_prefetch = 0 : i64, scratch_operands = 2 : i64, tpu.core_type = #tpu.core_type<tc>, window_params = [{transform_indices = @transform_0, window_bounds = array<i64: 1, 8, 32>}, {transform_indices = @transform_1, window_bounds = array<i64: 1, 8, 48>}, {pipeline_mode = #tpu.pipeline_mode<synchronous>, transform_indices = @transform_2, window_bounds = array<i64: 32, 256>}, {pipeline_mode = #tpu.pipeline_mode<synchronous>, transform_indices = @transform_3, window_bounds = array<i64: 1, 128>}, {pipeline_mode = #tpu.pipeline_mode<synchronous>, transform_indices = @transform_4, window_bounds = array<i64: 32, 256>}, {pipeline_mode = #tpu.pipeline_mode<synchronous>, transform_indices = @transform_5, window_bounds = array<i64: 1, 256>}, {pipeline_mode = #tpu.pipeline_mode<synchronous>, transform_indices = @transform_6, window_bounds = array<i64: 48, 256>}, {pipeline_mode = #tpu.pipeline_mode<synchronous>, transform_indices = @transform_7, window_bounds = array<i64: 1, 128>}, {pipeline_mode = #tpu.pipeline_mode<synchronous>, transform_indices = @transform_8, window_bounds = array<i64: 48, 256>}, {pipeline_mode = #tpu.pipeline_mode<synchronous>, transform_indices = @transform_9, window_bounds = array<i64: 1, 256>}, {pipeline_mode = #tpu.pipeline_mode<synchronous>, transform_indices = @transform_10, window_bounds = array<i64: 128, 128>}, {pipeline_mode = #tpu.pipeline_mode<synchronous>, transform_indices = @transform_11, window_bounds = array<i64: 1, 128>}, {pipeline_mode = #tpu.pipeline_mode<synchronous>, transform_indices = @transform_12, window_bounds = array<i64: 128, 128>}, {pipeline_mode = #tpu.pipeline_mode<synchronous>, transform_indices = @transform_13, window_bounds = array<i64: 1, 128>}, {pipeline_mode = #tpu.pipeline_mode<synchronous>, transform_indices = @transform_14, window_bounds = array<i64: 80, 384>}, {pipeline_mode = #tpu.pipeline_mode<synchronous>, transform_indices = @transform_15, window_bounds = array<i64: 1, 384>}, {pipeline_mode = #tpu.pipeline_mode<synchronous>, transform_indices = @transform_16, window_bounds = array<i64: 1, 128>}, {pipeline_mode = #tpu.pipeline_mode<synchronous>, transform_indices = @transform_17, window_bounds = array<i64: 1, 128>}, {pipeline_mode = #tpu.pipeline_mode<synchronous>, transform_indices = @transform_18, window_bounds = array<i64: 1, 128>}, {pipeline_mode = #tpu.pipeline_mode<synchronous>, transform_indices = @transform_19, window_bounds = array<i64: 1, 128>}, {transform_indices = @transform_20, window_bounds = array<i64: 1, 8, 384>}, {transform_indices = @transform_21, window_bounds = array<i64: 1, 8, 128>}, {transform_indices = @transform_22, window_bounds = array<i64: 1, 8, 128>}, {transform_indices = @transform_23, window_bounds = array<i64: 1, 8, 8>}, {transform_indices = @transform_24, window_bounds = array<i64: 1, 8, 8>}]} {
    %c0_i32 = arith.constant 0 : i32
    %0 = arith.cmpi eq, %arg1, %c0_i32 : i32
    %1 = arith.extui %0 : i1 to i32
    %c0_i32_0 = arith.constant 0 : i32
    %2 = arith.cmpi ne, %1, %c0_i32_0 : i32
    scf.if %2 {
      %c0_92 = arith.constant 0 : index
      %c0_93 = arith.constant 0 : index
      %c0_94 = arith.constant 0 : index
      %167 = vector.load %arg2[%c0_92, %c0_93, %c0_94] : memref<1x8x32xbf16, #tpu.memory_space<vmem>>, vector<1x8x32xbf16>
      %168 = vector.shape_cast %167 : vector<1x8x32xbf16> to vector<8x32xbf16>
      %c0_95 = arith.constant 0 : index
      %c0_96 = arith.constant 0 : index
      %c0_97 = arith.constant 0 : index
      %169 = vector.load %arg3[%c0_95, %c0_96, %c0_97] : memref<1x8x48xbf16, #tpu.memory_space<vmem>>, vector<1x8x48xbf16>
      %170 = vector.shape_cast %169 : vector<1x8x48xbf16> to vector<8x48xbf16>
      %c0_98 = arith.constant 0 : index
      %c0_99 = arith.constant 0 : index
      %171 = vector.load %arg6[%c0_98, %c0_99] : memref<32x256xbf16, #tpu.memory_space<vmem>>, vector<32x256xbf16>
      %cst_100 = arith.constant dense<0.000000e+00> : vector<8x256xf32>
      %172 = tpu.matmul %168, %171, %cst_100 {dimension_numbers = #tpu.dot_dimension_numbers<[1], [0], [0], [1], [0, 0, 1, 1], [], []>} : vector<8x32xbf16>, vector<32x256xbf16>, vector<8x256xf32> -> vector<8x256xf32>
      %c0_101 = arith.constant 0 : index
      %c0_102 = arith.constant 0 : index
      %173 = vector.load %arg7[%c0_101, %c0_102] : memref<1x256xf32, #tpu.memory_space<vmem>>, vector<1x256xf32>
      %174 = vector.broadcast %173 : vector<1x256xf32> to vector<8x256xf32>
      %175 = arith.addf %172, %174 : vector<8x256xf32>
      %c0_103 = arith.constant 0 : index
      %c0_104 = arith.constant 0 : index
      %176 = vector.load %arg10[%c0_103, %c0_104] : memref<48x256xbf16, #tpu.memory_space<vmem>>, vector<48x256xbf16>
      %cst_105 = arith.constant dense<0.000000e+00> : vector<8x256xf32>
      %177 = tpu.matmul %170, %176, %cst_105 {dimension_numbers = #tpu.dot_dimension_numbers<[1], [0], [0], [1], [0, 0, 1, 1], [], []>} : vector<8x48xbf16>, vector<48x256xbf16>, vector<8x256xf32> -> vector<8x256xf32>
      %c0_106 = arith.constant 0 : index
      %c0_107 = arith.constant 0 : index
      %178 = vector.load %arg11[%c0_106, %c0_107] : memref<1x256xf32, #tpu.memory_space<vmem>>, vector<1x256xf32>
      %179 = vector.broadcast %178 : vector<1x256xf32> to vector<8x256xf32>
      %180 = arith.addf %177, %179 : vector<8x256xf32>
      %181 = vector.shape_cast %175 : vector<8x256xf32> to vector<1x8x256xf32>
      %182 = arith.truncf %181 : vector<1x8x256xf32> to vector<1x8x256xbf16>
      %c0_108 = arith.constant 0 : index
      %c0_109 = arith.constant 0 : index
      %c0_110 = arith.constant 0 : index
      %183 = vector.load %arg27[%c0_108, %c0_109, %c0_110] : memref<1x8x256xbf16, #tpu.memory_space<vmem>>, vector<1x8x256xbf16>
      tpu.vector_store %arg27[%c0_108, %c0_109, %c0_110], %182 {strides = array<i32>} : memref<1x8x256xbf16, #tpu.memory_space<vmem>>, vector<1x8x256xbf16>,
      %184 = vector.shape_cast %180 : vector<8x256xf32> to vector<1x8x256xf32>
      %185 = arith.truncf %184 : vector<1x8x256xf32> to vector<1x8x256xbf16>
      %c0_111 = arith.constant 0 : index
      %c0_112 = arith.constant 0 : index
      %c0_113 = arith.constant 0 : index
      %186 = vector.load %arg28[%c0_111, %c0_112, %c0_113] : memref<1x8x256xbf16, #tpu.memory_space<vmem>>, vector<1x8x256xbf16>
      tpu.vector_store %arg28[%c0_111, %c0_112, %c0_113], %185 {strides = array<i32>} : memref<1x8x256xbf16, #tpu.memory_space<vmem>>, vector<1x8x256xbf16>,
    } else {
    }
    %c8_i32 = arith.constant 8 : i32
    %3 = arith.muli %arg1, %c8_i32 : i32
    %4 = tpu.assume_multiple %3, 8 : i32
    %c0 = arith.constant 0 : index
    %5 = arith.index_cast %4 : i32 to index
    %c0_1 = arith.constant 0 : index
    %6 = vector.load %arg2[%c0, %5, %c0_1] : memref<1x8x32xbf16, #tpu.memory_space<vmem>>, vector<1x8x32xbf16>
    %c0_2 = arith.constant 0 : index
    %7 = arith.index_cast %4 : i32 to index
    %c0_3 = arith.constant 0 : index
    %8 = vector.load %arg3[%c0_2, %7, %c0_3] : memref<1x8x48xbf16, #tpu.memory_space<vmem>>, vector<1x8x48xbf16>
    %9 = vector.shape_cast %6 : vector<1x8x32xbf16> to vector<8x32xbf16>
    %10 = vector.shape_cast %8 : vector<1x8x48xbf16> to vector<8x48xbf16>
    %c0_4 = arith.constant 0 : index
    %c0_5 = arith.constant 0 : index
    %11 = vector.load %arg4[%c0_4, %c0_5] : memref<32x256xbf16, #tpu.memory_space<vmem>>, vector<32x256xbf16>
    %cst = arith.constant dense<0.000000e+00> : vector<8x256xf32>
    %12 = tpu.matmul %9, %11, %cst {dimension_numbers = #tpu.dot_dimension_numbers<[1], [0], [0], [1], [0, 0, 1, 1], [], []>} : vector<8x32xbf16>, vector<32x256xbf16>, vector<8x256xf32> -> vector<8x256xf32>
    %13 = vector.extract_strided_slice %12 {offsets = [0, 0], sizes = [8, 128], strides = [1, 1]} : vector<8x256xf32> to vector<8x128xf32>
    %c0_6 = arith.constant 0 : index
    %c0_7 = arith.constant 0 : index
    %14 = vector.load %arg5[%c0_6, %c0_7] : memref<1x128xf32, #tpu.memory_space<vmem>>, vector<1x128xf32>
    %15 = vector.broadcast %14 : vector<1x128xf32> to vector<8x128xf32>
    %16 = arith.addf %13, %15 : vector<8x128xf32>
    %17 = arith.truncf %16 : vector<8x128xf32> to vector<8x128xbf16>
    %18 = vector.shape_cast %17 : vector<8x128xbf16> to vector<1x8x128xbf16>
    %19 = vector.extract_strided_slice %12 {offsets = [0, 128], sizes = [8, 128], strides = [1, 1]} : vector<8x256xf32> to vector<8x128xf32>
    %c0_8 = arith.constant 0 : index
    %c0_9 = arith.constant 0 : index
    %c0_10 = arith.constant 0 : index
    %20 = vector.load %arg28[%c0_8, %c0_9, %c0_10] : memref<1x8x256xbf16, #tpu.memory_space<vmem>>, vector<1x8x128xbf16>
    %c0_11 = arith.constant 0 : index
    %c0_12 = arith.constant 0 : index
    %c128 = arith.constant 128 : index
    %21 = vector.load %arg28[%c0_11, %c0_12, %c128] : memref<1x8x256xbf16, #tpu.memory_space<vmem>>, vector<1x8x128xbf16>
    "tpu.trace_start"() <{level = 10 : i32, message = "bqf,bkf->bqk"}> : () -> ()
    %cst_13 = arith.constant dense<0.000000e+00> : vector<1x8x8xf32>
    %22 = tpu.matmul %18, %20, %cst_13 {dimension_numbers = #tpu.dot_dimension_numbers<[2], [2], [1], [1], [0, 0, 0, 1, 1, 1], [0], [0]>} : vector<1x8x128xbf16>, vector<1x8x128xbf16>, vector<1x8x8xf32> -> vector<1x8x8xf32>
    "tpu.trace_stop"() : () -> ()
    %cst_14 = arith.constant 0.0883883461 : f32
    %23 = vector.broadcast %cst_14 : f32 to vector<1x8x8xf32>
    %24 = arith.mulf %22, %23 : vector<1x8x8xf32>
    %cst_15 = arith.constant dense<0xFF800000> : vector<1x8xf32>
    %25 = vector.multi_reduction <maximumf>, %24, %cst_15 [2] : vector<1x8x8xf32> to vector<1x8xf32>
    %26 = vector.shape_cast %25 : vector<1x8xf32> to vector<1x8x1xf32>
    %27 = vector.broadcast %26 : vector<1x8x1xf32> to vector<1x8x8xf32>
    %28 = arith.subf %24, %27 : vector<1x8x8xf32>
    %29 = math.exp %28 : vector<1x8x8xf32>
    %cst_16 = arith.constant dense<0.000000e+00> : vector<1x8xf32>
    %30 = vector.multi_reduction <add>, %29, %cst_16 [2] : vector<1x8x8xf32> to vector<1x8xf32>
    %31 = vector.shape_cast %30 : vector<1x8xf32> to vector<1x8x1xf32>
    %32 = vector.broadcast %31 : vector<1x8x1xf32> to vector<1x8x8xf32>
    %33 = arith.divf %29, %32 : vector<1x8x8xf32>
    %34 = arith.truncf %33 : vector<1x8x8xf32> to vector<1x8x8xbf16>
    "tpu.trace_start"() <{level = 10 : i32, message = "bqk,bkf->bqf"}> : () -> ()
    %cst_17 = arith.constant dense<0.000000e+00> : vector<1x8x128xf32>
    %35 = tpu.matmul %34, %21, %cst_17 {dimension_numbers = #tpu.dot_dimension_numbers<[2], [1], [1], [2], [0, 0, 0, 1, 1, 2], [0], [0]>} : vector<1x8x8xbf16>, vector<1x8x128xbf16>, vector<1x8x128xf32> -> vector<1x8x128xf32>
    "tpu.trace_stop"() : () -> ()
    %36 = vector.shape_cast %35 : vector<1x8x128xf32> to vector<8x128xf32>
    %37 = arith.truncf %36 : vector<8x128xf32> to vector<8x128xbf16>
    %c0_18 = arith.constant 0 : index
    %c0_19 = arith.constant 0 : index
    %38 = vector.load %arg12[%c0_18, %c0_19] : memref<128x128xbf16, #tpu.memory_space<vmem>>, vector<128x128xbf16>
    %cst_20 = arith.constant dense<0.000000e+00> : vector<8x128xf32>
    %39 = tpu.matmul %37, %38, %cst_20 {dimension_numbers = #tpu.dot_dimension_numbers<[1], [0], [0], [1], [0, 0, 1, 1], [], []>} : vector<8x128xbf16>, vector<128x128xbf16>, vector<8x128xf32> -> vector<8x128xf32>
    %c0_21 = arith.constant 0 : index
    %c0_22 = arith.constant 0 : index
    %40 = vector.load %arg13[%c0_21, %c0_22] : memref<1x128xf32, #tpu.memory_space<vmem>>, vector<1x128xf32>
    %41 = vector.broadcast %40 : vector<1x128xf32> to vector<8x128xf32>
    %42 = arith.addf %39, %41 : vector<8x128xf32>
    %43 = arith.addf %42, %19 : vector<8x128xf32>
    %c0_23 = arith.constant 0 : index
    %c0_24 = arith.constant 0 : index
    %44 = vector.load %arg18[%c0_23, %c0_24] : memref<1x128xf32, #tpu.memory_space<vmem>>, vector<1x128xf32>
    %c0_25 = arith.constant 0 : index
    %c0_26 = arith.constant 0 : index
    %45 = vector.load %arg19[%c0_25, %c0_26] : memref<1x128xf32, #tpu.memory_space<vmem>>, vector<1x128xf32>
    %cst_27 = arith.constant dense<0.000000e+00> : vector<8xf32>
    %46 = vector.multi_reduction <add>, %43, %cst_27 [1] : vector<8x128xf32> to vector<8xf32>
    %47 = vector.shape_cast %46 : vector<8xf32> to vector<8x1xf32>
    %cst_28 = arith.constant 1.280000e+02 : f32
    %48 = vector.broadcast %cst_28 : f32 to vector<8x1xf32>
    %49 = arith.divf %47, %48 : vector<8x1xf32>
    %50 = vector.broadcast %49 : vector<8x1xf32> to vector<8x128xf32>
    %51 = arith.subf %43, %50 : vector<8x128xf32>
    %52 = arith.mulf %51, %51 : vector<8x128xf32>
    %cst_29 = arith.constant dense<0.000000e+00> : vector<8xf32>
    %53 = vector.multi_reduction <add>, %52, %cst_29 [1] : vector<8x128xf32> to vector<8xf32>
    %54 = vector.shape_cast %53 : vector<8xf32> to vector<8x1xf32>
    %cst_30 = arith.constant 1.280000e+02 : f32
    %55 = vector.broadcast %cst_30 : f32 to vector<8x1xf32>
    %56 = arith.divf %54, %55 : vector<8x1xf32>
    %57 = vector.broadcast %49 : vector<8x1xf32> to vector<8x128xf32>
    %58 = arith.subf %43, %57 : vector<8x128xf32>
    %cst_31 = arith.constant 9.99999974E-6 : f32
    %59 = vector.broadcast %cst_31 : f32 to vector<8x1xf32>
    %60 = arith.addf %56, %59 : vector<8x1xf32>
    %61 = math.rsqrt %60 : vector<8x1xf32>
    %62 = vector.broadcast %61 : vector<8x1xf32> to vector<8x128xf32>
    %63 = arith.mulf %58, %62 : vector<8x128xf32>
    %64 = vector.broadcast %44 : vector<1x128xf32> to vector<8x128xf32>
    %65 = arith.mulf %63, %64 : vector<8x128xf32>
    %66 = vector.broadcast %45 : vector<1x128xf32> to vector<8x128xf32>
    %67 = arith.addf %65, %66 : vector<8x128xf32>
    %68 = vector.shape_cast %67 : vector<8x128xf32> to vector<1x8x128xf32>
    %69 = arith.truncf %68 : vector<1x8x128xf32> to vector<1x8x128xbf16>
    %c0_32 = arith.constant 0 : index
    %c0_33 = arith.constant 0 : index
    %c0_34 = arith.constant 0 : index
    %70 = vector.load %arg22[%c0_32, %c0_33, %c0_34] : memref<1x8x384xbf16, #tpu.memory_space<vmem>>, vector<1x8x128xbf16>
    tpu.vector_store %arg22[%c0_32, %c0_33, %c0_34], %69 {strides = array<i32>} : memref<1x8x384xbf16, #tpu.memory_space<vmem>>, vector<1x8x128xbf16>,
    %c0_35 = arith.constant 0 : index
    %c0_36 = arith.constant 0 : index
    %c0_37 = arith.constant 0 : index
    %71 = vector.load %arg25[%c0_35, %c0_36, %c0_37] : memref<1x8x8xf32, #tpu.memory_space<vmem>>, vector<1x8x8xf32>
    tpu.vector_store %arg25[%c0_35, %c0_36, %c0_37], %33 {strides = array<i32>} : memref<1x8x8xf32, #tpu.memory_space<vmem>>, vector<1x8x8xf32>,
    %c0_38 = arith.constant 0 : index
    %c0_39 = arith.constant 0 : index
    %72 = vector.load %arg8[%c0_38, %c0_39] : memref<48x256xbf16, #tpu.memory_space<vmem>>, vector<48x256xbf16>
    %cst_40 = arith.constant dense<0.000000e+00> : vector<8x256xf32>
    %73 = tpu.matmul %10, %72, %cst_40 {dimension_numbers = #tpu.dot_dimension_numbers<[1], [0], [0], [1], [0, 0, 1, 1], [], []>} : vector<8x48xbf16>, vector<48x256xbf16>, vector<8x256xf32> -> vector<8x256xf32>
    %74 = vector.extract_strided_slice %73 {offsets = [0, 0], sizes = [8, 128], strides = [1, 1]} : vector<8x256xf32> to vector<8x128xf32>
    %c0_41 = arith.constant 0 : index
    %c0_42 = arith.constant 0 : index
    %75 = vector.load %arg9[%c0_41, %c0_42] : memref<1x128xf32, #tpu.memory_space<vmem>>, vector<1x128xf32>
    %76 = vector.broadcast %75 : vector<1x128xf32> to vector<8x128xf32>
    %77 = arith.addf %74, %76 : vector<8x128xf32>
    %78 = arith.truncf %77 : vector<8x128xf32> to vector<8x128xbf16>
    %79 = vector.shape_cast %78 : vector<8x128xbf16> to vector<1x8x128xbf16>
    %80 = vector.extract_strided_slice %73 {offsets = [0, 128], sizes = [8, 128], strides = [1, 1]} : vector<8x256xf32> to vector<8x128xf32>
    %c0_43 = arith.constant 0 : index
    %c0_44 = arith.constant 0 : index
    %c0_45 = arith.constant 0 : index
    %81 = vector.load %arg27[%c0_43, %c0_44, %c0_45] : memref<1x8x256xbf16, #tpu.memory_space<vmem>>, vector<1x8x128xbf16>
    %c0_46 = arith.constant 0 : index
    %c0_47 = arith.constant 0 : index
    %c128_48 = arith.constant 128 : index
    %82 = vector.load %arg27[%c0_46, %c0_47, %c128_48] : memref<1x8x256xbf16, #tpu.memory_space<vmem>>, vector<1x8x128xbf16>
    "tpu.trace_start"() <{level = 10 : i32, message = "bqf,bkf->bqk"}> : () -> ()
    %cst_49 = arith.constant dense<0.000000e+00> : vector<1x8x8xf32>
    %83 = tpu.matmul %79, %81, %cst_49 {dimension_numbers = #tpu.dot_dimension_numbers<[2], [2], [1], [1], [0, 0, 0, 1, 1, 1], [0], [0]>} : vector<1x8x128xbf16>, vector<1x8x128xbf16>, vector<1x8x8xf32> -> vector<1x8x8xf32>
    "tpu.trace_stop"() : () -> ()
    %cst_50 = arith.constant 0.0883883461 : f32
    %84 = vector.broadcast %cst_50 : f32 to vector<1x8x8xf32>
    %85 = arith.mulf %83, %84 : vector<1x8x8xf32>
    %cst_51 = arith.constant dense<0xFF800000> : vector<1x8xf32>
    %86 = vector.multi_reduction <maximumf>, %85, %cst_51 [2] : vector<1x8x8xf32> to vector<1x8xf32>
    %87 = vector.shape_cast %86 : vector<1x8xf32> to vector<1x8x1xf32>
    %88 = vector.broadcast %87 : vector<1x8x1xf32> to vector<1x8x8xf32>
    %89 = arith.subf %85, %88 : vector<1x8x8xf32>
    %90 = math.exp %89 : vector<1x8x8xf32>
    %cst_52 = arith.constant dense<0.000000e+00> : vector<1x8xf32>
    %91 = vector.multi_reduction <add>, %90, %cst_52 [2] : vector<1x8x8xf32> to vector<1x8xf32>
    %92 = vector.shape_cast %91 : vector<1x8xf32> to vector<1x8x1xf32>
    %93 = vector.broadcast %92 : vector<1x8x1xf32> to vector<1x8x8xf32>
    %94 = arith.divf %90, %93 : vector<1x8x8xf32>
    %95 = arith.truncf %94 : vector<1x8x8xf32> to vector<1x8x8xbf16>
    "tpu.trace_start"() <{level = 10 : i32, message = "bqk,bkf->bqf"}> : () -> ()
    %cst_53 = arith.constant dense<0.000000e+00> : vector<1x8x128xf32>
    %96 = tpu.matmul %95, %82, %cst_53 {dimension_numbers = #tpu.dot_dimension_numbers<[2], [1], [1], [2], [0, 0, 0, 1, 1, 2], [0], [0]>} : vector<1x8x8xbf16>, vector<1x8x128xbf16>, vector<1x8x128xf32> -> vector<1x8x128xf32>
    "tpu.trace_stop"() : () -> ()
    %97 = vector.shape_cast %96 : vector<1x8x128xf32> to vector<8x128xf32>
    %98 = arith.truncf %97 : vector<8x128xf32> to vector<8x128xbf16>
    %c0_54 = arith.constant 0 : index
    %c0_55 = arith.constant 0 : index
    %99 = vector.load %arg14[%c0_54, %c0_55] : memref<128x128xbf16, #tpu.memory_space<vmem>>, vector<128x128xbf16>
    %cst_56 = arith.constant dense<0.000000e+00> : vector<8x128xf32>
    %100 = tpu.matmul %98, %99, %cst_56 {dimension_numbers = #tpu.dot_dimension_numbers<[1], [0], [0], [1], [0, 0, 1, 1], [], []>} : vector<8x128xbf16>, vector<128x128xbf16>, vector<8x128xf32> -> vector<8x128xf32>
    %c0_57 = arith.constant 0 : index
    %c0_58 = arith.constant 0 : index
    %101 = vector.load %arg15[%c0_57, %c0_58] : memref<1x128xf32, #tpu.memory_space<vmem>>, vector<1x128xf32>
    %102 = vector.broadcast %101 : vector<1x128xf32> to vector<8x128xf32>
    %103 = arith.addf %100, %102 : vector<8x128xf32>
    %104 = arith.addf %103, %80 : vector<8x128xf32>
    %c0_59 = arith.constant 0 : index
    %c0_60 = arith.constant 0 : index
    %105 = vector.load %arg20[%c0_59, %c0_60] : memref<1x128xf32, #tpu.memory_space<vmem>>, vector<1x128xf32>
    %c0_61 = arith.constant 0 : index
    %c0_62 = arith.constant 0 : index
    %106 = vector.load %arg21[%c0_61, %c0_62] : memref<1x128xf32, #tpu.memory_space<vmem>>, vector<1x128xf32>
    %cst_63 = arith.constant dense<0.000000e+00> : vector<8xf32>
    %107 = vector.multi_reduction <add>, %104, %cst_63 [1] : vector<8x128xf32> to vector<8xf32>
    %108 = vector.shape_cast %107 : vector<8xf32> to vector<8x1xf32>
    %cst_64 = arith.constant 1.280000e+02 : f32
    %109 = vector.broadcast %cst_64 : f32 to vector<8x1xf32>
    %110 = arith.divf %108, %109 : vector<8x1xf32>
    %111 = vector.broadcast %110 : vector<8x1xf32> to vector<8x128xf32>
    %112 = arith.subf %104, %111 : vector<8x128xf32>
    %113 = arith.mulf %112, %112 : vector<8x128xf32>
    %cst_65 = arith.constant dense<0.000000e+00> : vector<8xf32>
    %114 = vector.multi_reduction <add>, %113, %cst_65 [1] : vector<8x128xf32> to vector<8xf32>
    %115 = vector.shape_cast %114 : vector<8xf32> to vector<8x1xf32>
    %cst_66 = arith.constant 1.280000e+02 : f32
    %116 = vector.broadcast %cst_66 : f32 to vector<8x1xf32>
    %117 = arith.divf %115, %116 : vector<8x1xf32>
    %118 = vector.broadcast %110 : vector<8x1xf32> to vector<8x128xf32>
    %119 = arith.subf %104, %118 : vector<8x128xf32>
    %cst_67 = arith.constant 9.99999974E-6 : f32
    %120 = vector.broadcast %cst_67 : f32 to vector<8x1xf32>
    %121 = arith.addf %117, %120 : vector<8x1xf32>
    %122 = math.rsqrt %121 : vector<8x1xf32>
    %123 = vector.broadcast %122 : vector<8x1xf32> to vector<8x128xf32>
    %124 = arith.mulf %119, %123 : vector<8x128xf32>
    %125 = vector.broadcast %105 : vector<1x128xf32> to vector<8x128xf32>
    %126 = arith.mulf %124, %125 : vector<8x128xf32>
    %127 = vector.broadcast %106 : vector<1x128xf32> to vector<8x128xf32>
    %128 = arith.addf %126, %127 : vector<8x128xf32>
    %129 = vector.shape_cast %128 : vector<8x128xf32> to vector<1x8x128xf32>
    %130 = arith.truncf %129 : vector<1x8x128xf32> to vector<1x8x128xbf16>
    %c0_68 = arith.constant 0 : index
    %c0_69 = arith.constant 0 : index
    %c128_70 = arith.constant 128 : index
    %131 = vector.load %arg22[%c0_68, %c0_69, %c128_70] : memref<1x8x384xbf16, #tpu.memory_space<vmem>>, vector<1x8x128xbf16>
    tpu.vector_store %arg22[%c0_68, %c0_69, %c128_70], %130 {strides = array<i32>} : memref<1x8x384xbf16, #tpu.memory_space<vmem>>, vector<1x8x128xbf16>,
    %c0_71 = arith.constant 0 : index
    %c0_72 = arith.constant 0 : index
    %c0_73 = arith.constant 0 : index
    %132 = vector.load %arg26[%c0_71, %c0_72, %c0_73] : memref<1x8x8xf32, #tpu.memory_space<vmem>>, vector<1x8x8xf32>
    tpu.vector_store %arg26[%c0_71, %c0_72, %c0_73], %94 {strides = array<i32>} : memref<1x8x8xf32, #tpu.memory_space<vmem>>, vector<1x8x8xf32>,
    %133 = tpu.concatenate %9, %10 in 1 : vector<8x32xbf16>, vector<8x48xbf16> -> vector<8x80xbf16>
    %c0_74 = arith.constant 0 : index
    %c0_75 = arith.constant 0 : index
    %134 = vector.load %arg16[%c0_74, %c0_75] : memref<80x384xbf16, #tpu.memory_space<vmem>>, vector<80x384xbf16>
    %cst_76 = arith.constant dense<0.000000e+00> : vector<8x384xf32>
    %135 = tpu.matmul %133, %134, %cst_76 {dimension_numbers = #tpu.dot_dimension_numbers<[1], [0], [0], [1], [0, 0, 1, 1], [], []>} : vector<8x80xbf16>, vector<80x384xbf16>, vector<8x384xf32> -> vector<8x384xf32>
    %c0_77 = arith.constant 0 : index
    %c0_78 = arith.constant 0 : index
    %136 = vector.load %arg17[%c0_77, %c0_78] : memref<1x384xf32, #tpu.memory_space<vmem>>, vector<1x384xf32>
    %137 = vector.broadcast %136 : vector<1x384xf32> to vector<8x384xf32>
    %138 = arith.addf %135, %137 : vector<8x384xf32>
    %139 = vector.extract_strided_slice %138 {offsets = [0, 0], sizes = [8, 128], strides = [1, 1]} : vector<8x384xf32> to vector<8x128xf32>
    %cst_79 = arith.constant 5.000000e-01 : f32
    %140 = vector.broadcast %cst_79 : f32 to vector<8x128xf32>
    %141 = arith.mulf %140, %139 : vector<8x128xf32>
    %cst_80 = arith.constant 0.707106769 : f32
    %142 = vector.broadcast %cst_80 : f32 to vector<8x128xf32>
    %143 = arith.mulf %139, %142 : vector<8x128xf32>
    %144 = math.erf %143 : vector<8x128xf32>
    %cst_81 = arith.constant 1.000000e+00 : f32
    %145 = vector.broadcast %cst_81 : f32 to vector<8x128xf32>
    %146 = arith.addf %145, %144 : vector<8x128xf32>
    %147 = arith.mulf %141, %146 : vector<8x128xf32>
    %148 = vector.shape_cast %147 : vector<8x128xf32> to vector<1x8x128xf32>
    %149 = arith.truncf %148 : vector<1x8x128xf32> to vector<1x8x128xbf16>
    %c0_82 = arith.constant 0 : index
    %c0_83 = arith.constant 0 : index
    %c256 = arith.constant 256 : index
    %150 = vector.load %arg22[%c0_82, %c0_83, %c256] : memref<1x8x384xbf16, #tpu.memory_space<vmem>>, vector<1x8x128xbf16>
    tpu.vector_store %arg22[%c0_82, %c0_83, %c256], %149 {strides = array<i32>} : memref<1x8x384xbf16, #tpu.memory_space<vmem>>, vector<1x8x128xbf16>,
    %151 = vector.extract_strided_slice %138 {offsets = [0, 128], sizes = [8, 128], strides = [1, 1]} : vector<8x384xf32> to vector<8x128xf32>
    %152 = arith.negf %151 : vector<8x128xf32>
    %153 = math.exp %152 : vector<8x128xf32>
    %cst_84 = arith.constant 1.000000e+00 : f32
    %154 = vector.broadcast %cst_84 : f32 to vector<8x128xf32>
    %155 = arith.addf %154, %153 : vector<8x128xf32>
    %156 = arith.divf %154, %155 : vector<8x128xf32>
    %157 = vector.shape_cast %156 : vector<8x128xf32> to vector<1x8x128xf32>
    %c0_85 = arith.constant 0 : index
    %c0_86 = arith.constant 0 : index
    %c0_87 = arith.constant 0 : index
    %158 = vector.load %arg23[%c0_85, %c0_86, %c0_87] : memref<1x8x128xf32, #tpu.memory_space<vmem>>, vector<1x8x128xf32>
    tpu.vector_store %arg23[%c0_85, %c0_86, %c0_87], %157 {strides = array<i32>} : memref<1x8x128xf32, #tpu.memory_space<vmem>>, vector<1x8x128xf32>,
    %159 = vector.extract_strided_slice %138 {offsets = [0, 256], sizes = [8, 128], strides = [1, 1]} : vector<8x384xf32> to vector<8x128xf32>
    %160 = arith.negf %159 : vector<8x128xf32>
    %161 = math.exp %160 : vector<8x128xf32>
    %cst_88 = arith.constant 1.000000e+00 : f32
    %162 = vector.broadcast %cst_88 : f32 to vector<8x128xf32>
    %163 = arith.addf %162, %161 : vector<8x128xf32>
    %164 = arith.divf %162, %163 : vector<8x128xf32>
    %165 = vector.shape_cast %164 : vector<8x128xf32> to vector<1x8x128xf32>
    %c0_89 = arith.constant 0 : index
    %c0_90 = arith.constant 0 : index
    %c0_91 = arith.constant 0 : index
    %166 = vector.load %arg24[%c0_89, %c0_90, %c0_91] : memref<1x8x128xf32, #tpu.memory_space<vmem>>, vector<1x8x128xf32>
    tpu.vector_store %arg24[%c0_89, %c0_90, %c0_91], %165 {strides = array<i32>} : memref<1x8x128xf32, #tpu.memory_space<vmem>>, vector<1x8x128xf32>,
    return
  }
  func.func @transform_0(%arg0: i32, %arg1: i32) -> (i32, i32, i32) {
    %c0_i32 = arith.constant 0 : i32
    %c0_i32_0 = arith.constant 0 : i32
    %c0_i32_1 = arith.constant 0 : i32
    return %arg0, %c0_i32, %c0_i32_0 : i32, i32, i32
  }
  func.func @transform_1(%arg0: i32, %arg1: i32) -> (i32, i32, i32) {
    %c0_i32 = arith.constant 0 : i32
    %c0_i32_0 = arith.constant 0 : i32
    %c0_i32_1 = arith.constant 0 : i32
    return %arg0, %c0_i32, %c0_i32_0 : i32, i32, i32
  }
  func.func @transform_2(%arg0: i32, %arg1: i32) -> (i32, i32) {
    %c0_i32 = arith.constant 0 : i32
    %c0_i32_0 = arith.constant 0 : i32
    %c0_i32_1 = arith.constant 0 : i32
    return %c0_i32, %c0_i32_0 : i32, i32
  }
  func.func @transform_3(%arg0: i32, %arg1: i32) -> (i32, i32) {
    %c0_i32 = arith.constant 0 : i32
    %c0_i32_0 = arith.constant 0 : i32
    %c0_i32_1 = arith.constant 0 : i32
    return %c0_i32, %c0_i32_0 : i32, i32
  }
  func.func @transform_4(%arg0: i32, %arg1: i32) -> (i32, i32) {
    %c0_i32 = arith.constant 0 : i32
    %c0_i32_0 = arith.constant 0 : i32
    %c0_i32_1 = arith.constant 0 : i32
    return %c0_i32, %c0_i32_0 : i32, i32
  }
  func.func @transform_5(%arg0: i32, %arg1: i32) -> (i32, i32) {
    %c0_i32 = arith.constant 0 : i32
    %c0_i32_0 = arith.constant 0 : i32
    %c0_i32_1 = arith.constant 0 : i32
    return %c0_i32, %c0_i32_0 : i32, i32
  }
  func.func @transform_6(%arg0: i32, %arg1: i32) -> (i32, i32) {
    %c0_i32 = arith.constant 0 : i32
    %c0_i32_0 = arith.constant 0 : i32
    %c0_i32_1 = arith.constant 0 : i32
    return %c0_i32, %c0_i32_0 : i32, i32
  }
  func.func @transform_7(%arg0: i32, %arg1: i32) -> (i32, i32) {
    %c0_i32 = arith.constant 0 : i32
    %c0_i32_0 = arith.constant 0 : i32
    %c0_i32_1 = arith.constant 0 : i32
    return %c0_i32, %c0_i32_0 : i32, i32
  }
  func.func @transform_8(%arg0: i32, %arg1: i32) -> (i32, i32) {
    %c0_i32 = arith.constant 0 : i32
    %c0_i32_0 = arith.constant 0 : i32
    %c0_i32_1 = arith.constant 0 : i32
    return %c0_i32, %c0_i32_0 : i32, i32
  }
  func.func @transform_9(%arg0: i32, %arg1: i32) -> (i32, i32) {
    %c0_i32 = arith.constant 0 : i32
    %c0_i32_0 = arith.constant 0 : i32
    %c0_i32_1 = arith.constant 0 : i32
    return %c0_i32, %c0_i32_0 : i32, i32
  }
  func.func @transform_10(%arg0: i32, %arg1: i32) -> (i32, i32) {
    %c0_i32 = arith.constant 0 : i32
    %c0_i32_0 = arith.constant 0 : i32
    %c0_i32_1 = arith.constant 0 : i32
    return %c0_i32, %c0_i32_0 : i32, i32
  }
  func.func @transform_11(%arg0: i32, %arg1: i32) -> (i32, i32) {
    %c0_i32 = arith.constant 0 : i32
    %c0_i32_0 = arith.constant 0 : i32
    %c0_i32_1 = arith.constant 0 : i32
    return %c0_i32, %c0_i32_0 : i32, i32
  }
  func.func @transform_12(%arg0: i32, %arg1: i32) -> (i32, i32) {
    %c0_i32 = arith.constant 0 : i32
    %c0_i32_0 = arith.constant 0 : i32
    %c0_i32_1 = arith.constant 0 : i32
    return %c0_i32, %c0_i32_0 : i32, i32
  }
  func.func @transform_13(%arg0: i32, %arg1: i32) -> (i32, i32) {
    %c0_i32 = arith.constant 0 : i32
    %c0_i32_0 = arith.constant 0 : i32
    %c0_i32_1 = arith.constant 0 : i32
    return %c0_i32, %c0_i32_0 : i32, i32
  }
  func.func @transform_14(%arg0: i32, %arg1: i32) -> (i32, i32) {
    %c0_i32 = arith.constant 0 : i32
    %c0_i32_0 = arith.constant 0 : i32
    %c0_i32_1 = arith.constant 0 : i32
    return %c0_i32, %c0_i32_0 : i32, i32
  }
  func.func @transform_15(%arg0: i32, %arg1: i32) -> (i32, i32) {
    %c0_i32 = arith.constant 0 : i32
    %c0_i32_0 = arith.constant 0 : i32
    %c0_i32_1 = arith.constant 0 : i32
    return %c0_i32, %c0_i32_0 : i32, i32
  }
  func.func @transform_16(%arg0: i32, %arg1: i32) -> (i32, i32) {
    %c0_i32 = arith.constant 0 : i32
    %c0_i32_0 = arith.constant 0 : i32
    %c0_i32_1 = arith.constant 0 : i32
    return %c0_i32, %c0_i32_0 : i32, i32
  }
  func.func @transform_17(%arg0: i32, %arg1: i32) -> (i32, i32) {
    %c0_i32 = arith.constant 0 : i32
    %c0_i32_0 = arith.constant 0 : i32
    %c0_i32_1 = arith.constant 0 : i32
    return %c0_i32, %c0_i32_0 : i32, i32
  }
  func.func @transform_18(%arg0: i32, %arg1: i32) -> (i32, i32) {
    %c0_i32 = arith.constant 0 : i32
    %c0_i32_0 = arith.constant 0 : i32
    %c0_i32_1 = arith.constant 0 : i32
    return %c0_i32, %c0_i32_0 : i32, i32
  }
  func.func @transform_19(%arg0: i32, %arg1: i32) -> (i32, i32) {
    %c0_i32 = arith.constant 0 : i32
    %c0_i32_0 = arith.constant 0 : i32
    %c0_i32_1 = arith.constant 0 : i32
    return %c0_i32, %c0_i32_0 : i32, i32
  }
  func.func @transform_20(%arg0: i32, %arg1: i32) -> (i32, i32, i32) {
    %c0_i32 = arith.constant 0 : i32
    %c0_i32_0 = arith.constant 0 : i32
    return %arg0, %arg1, %c0_i32 : i32, i32, i32
  }
  func.func @transform_21(%arg0: i32, %arg1: i32) -> (i32, i32, i32) {
    %c0_i32 = arith.constant 0 : i32
    %c0_i32_0 = arith.constant 0 : i32
    return %arg0, %arg1, %c0_i32 : i32, i32, i32
  }
  func.func @transform_22(%arg0: i32, %arg1: i32) -> (i32, i32, i32) {
    %c0_i32 = arith.constant 0 : i32
    %c0_i32_0 = arith.constant 0 : i32
    return %arg0, %arg1, %c0_i32 : i32, i32, i32
  }
  func.func @transform_23(%arg0: i32, %arg1: i32) -> (i32, i32, i32) {
    %c0_i32 = arith.constant 0 : i32
    %c0_i32_0 = arith.constant 0 : i32
    return %arg0, %arg1, %c0_i32 : i32, i32, i32
  }
  func.func @transform_24(%arg0: i32, %arg1: i32) -> (i32, i32, i32) {
    %c0_i32 = arith.constant 0 : i32
    %c0_i32_0 = arith.constant 0 : i32
    return %arg0, %arg1, %c0_i32 : i32, i32, i32
  }
}

</mosaic_0001>

<bundles_post_ra>
// kernel: tpu_custom_call.1
= control target key start
LH: loop header
LB: loop body
LE: loop exit
PB: predicated region body
PF: predicated region fallthrough
CT: control target
= control target key end

     0   :  { %s4235_s0 = inlined_call_operand.hbm [shape: bf16[2,8,32], index: 0, kind: input, shape index: {}]   ;;  %s4236_s1 = inlined_call_operand.hbm [shape: bf16[2,8,48], index: 1, kind: input, shape index: {}]   ;;  %s4237_s2 = inlined_call_operand.hbm [shape: bf16[32,256], index: 2, kind: input, shape index: {}]   ;;  %s4238_s3 = inlined_call_operand.vmem [shape: f32[1,128], index: 3, kind: input, shape index: {}]   ;;  %s4239_s4 = inlined_call_operand.hbm [shape: bf16[32,256], index: 4, kind: input, shape index: {}]   ;;  %s4240_s5 = inlined_call_operand.vmem [shape: f32[1,256], index: 5, kind: input, shape index: {}]   ;;  %s4241_s6 = inlined_call_operand.hbm [shape: bf16[48,256], index: 6, kind: input, shape index: {}]   ;;  %s4242_s7 = inlined_call_operand.vmem [shape: f32[1,128], index: 7, kind: input, shape index: {}]   ;;  %s4243_s8 = inlined_call_operand.hbm [shape: bf16[48,256], index: 8, kind: input, shape index: {}]   ;;  %s4244_s9 = inlined_call_operand.vmem [shape: f32[1,256], index: 9, kind: input, shape index: {}]   ;;  %s4245_s10 = inlined_call_operand.hbm [shape: bf16[128,128], index: 10, kind: input, shape index: {}]   ;;  %s4246_s11 = inlined_call_operand.vmem [shape: f32[1,128], index: 11, kind: input, shape index: {}]   ;;  %s4247_s12 = inlined_call_operand.hbm [shape: bf16[128,128], index: 12, kind: input, shape index: {}]   ;;  %s4248_s13 = inlined_call_operand.vmem [shape: f32[1,128], index: 13, kind: input, shape index: {}]   ;;  %s4249_s14 = inlined_call_operand.hbm [shape: bf16[80,384], index: 14, kind: input, shape index: {}]   ;;  %s4250_s15 = inlined_call_operand.vmem [shape: f32[1,384], index: 15, kind: input, shape index: {}]   ;;  %s4251_s16 = inlined_call_operand.vmem [shape: f32[1,128], index: 16, kind: input, shape index: {}]   ;;  %s4252_s17 = inlined_call_operand.vmem [shape: f32[1,128], index: 17, kind: input, shape index: {}]   ;;  %s4253_s18 = inlined_call_operand.vmem [shape: f32[1,128], index: 18, kind: input, shape index: {}]   ;;  %s4254_s19 = inlined_call_operand.vmem [shape: f32[1,128], index: 19, kind: input, shape index: {}]   ;;  %s4255_s20 = inlined_call_operand.hbm [shape: bf16[2,8,384], index: 20, kind: output, shape index: {0}]   ;;  %s4256_s21 = inlined_call_operand.hbm [shape: f32[2,8,128], index: 21, kind: output, shape index: {1}]   ;;  %s4257_s22 = inlined_call_operand.hbm [shape: f32[2,8,128], index: 22, kind: output, shape index: {2}]   ;;  %s4258_s23 = inlined_call_operand.hbm [shape: f32[2,8,8], index: 23, kind: output, shape index: {3}]   ;;  %s4259_s24 = inlined_call_operand.hbm [shape: f32[2,8,8], index: 24, kind: output, shape index: {4}]  }
   0x1   :  { %4290 = sst [smem:[#allocation38_spill]] %s4235_s0 }
   0x2   :  { %4291 = sst [smem:[#allocation39_spill]] %s4236_s1 }
   0x3   :  { %4292 = sst [smem:[#allocation40_spill]] %s4237_s2 }
   0x4   :  { %4293 = sst [smem:[#allocation41_spill]] %s4238_s3 }
   0x5   :  { %4294 = sst [smem:[#allocation42_spill]] %s4239_s4 }
   0x6   :  { %4295 = sst [smem:[#allocation43_spill]] %s4240_s5 }
   0x7   :  { %4296 = sst [smem:[#allocation44_spill]] %s4241_s6 }
   0x8   :  { %4297 = sst [smem:[#allocation45_spill]] %s4242_s7 }
   0x9   :  { %4298 = sst [smem:[#allocation46_spill]] %s4243_s8 }
   0xa   :  { %4299 = sst [smem:[#allocation47_spill]] %s4244_s9 }
   0xb   :  { %4300 = sst [smem:[#allocation48_spill]] %s4245_s10 }
   0xc   :  { %4301 = sst [smem:[#allocation49_spill]] %s4246_s11 }
   0xd   :  { %4302 = sst [smem:[#allocation50_spill]] %s4247_s12 }
   0xe   :  { %4303 = sst [smem:[#allocation51_spill]] %s4248_s13 }
   0xf   :  { %4304 = sst [smem:[#allocation52_spill]] %s4249_s14 }
  0x10   :  { %4305 = sst [smem:[#allocation53_spill]] %s4250_s15 }
  0x11   :  { %4306 = sst [smem:[#allocation54_spill]] %s4251_s16 }
  0x12   :  { %4307 = sst [smem:[#allocation55_spill]] %s4252_s17 }
  0x13   :  { %4308 = sst [smem:[#allocation56_spill]] %s4253_s18 }
  0x14   :  { %4309 = sst [smem:[#allocation57_spill]] %s4254_s19 }
  0x15   :  { %4310 = sst [smem:[#allocation58_spill]] %s4255_s20 }
  0x16   :  { %4311 = sst [smem:[#allocation59_spill]] %s4256_s21 }
  0x17   :  { %4312 = sst [smem:[#allocation60_spill]] %s4257_s22 }
  0x18   :  { %4313 = sst [smem:[#allocation61_spill]] %s4258_s23 }
  0x19   :  { %4314 = sst [smem:[#allocation62_spill]] %s4259_s24 }
  0x1a   :  { %30 = vsyncpa [#allocation5], 0 }
  0x1b   :  { %32 = vsyncpa [#allocation5 + $0x1], 0 }
  0x1c   :  { %33 = vsyncpa [#allocation8], 0 }
  0x1d   :  { %35 = vsyncpa [#allocation8 + $0x1], 0 }
  0x1e   :  { %36 = vsyncpa [#allocation11], 0 }
  0x1f   :  { %37 = vsyncpa [#allocation14], 0 }
  0x20   :  { %38 = vsyncpa [#allocation17], 0 }
  0x21   :  { %39 = vsyncpa [#allocation6], 0 }
  0x22   :  { %41 = vsyncpa [#allocation6 + $0x1], 0 }
  0x23   :  { %42 = vsyncpa [#allocation21], 0 }
  0x24   :  { %44 = vsyncpa [#allocation21 + $0x1], 0 }
  0x25   :  { %45 = vsyncpa [#allocation24], 0 }
  0x26   :  { %47 = vsyncpa [#allocation24 + $0x1], 0  ;;  %s3549_s5 = smov 0   ;;  %s3551_s26 = smov 0  }
  0x27   :  { %s3553_s27 = smov 0   ;;  %s3555_s28 = smov 0  }
  0x28   :  { %s3557_s6 = smov 0   ;;  %s3559_s2 = smov 0  }
  0x29 LB: > { %4315 = sst [smem:[#allocation35_spill]] %s3390_s28  ;;  %s3580_s29 = sadd.s32 4294967295, %s3398_s2   ;;  %s3398_s2 = sphi %s3559_s2, %s53_s2   ;;  %s3394_s6 = sphi %s3557_s6, %s4374_s6   ;;  %s3390_s28 = sphi %s3555_s28, %s4373_s28   ;;  %s3386_s27 = sphi %s3553_s27, %s4377_s27   ;;  %s3382_s26 = sphi %s3551_s26, %s4376_s26   ;;  %s3378_s5 = sphi %s3549_s5, %s4375_s5  }
  0x2a   : > { %4316 = sst [smem:[#allocation36_spill]] %s3394_s6  ;;  %p2439_p0 = scmp.ge.s32.totalorder %s3398_s2, 1 }
  0x2b   : > { %p4272_p1 = scmp.eq.s32.totalorder %s3580_s29, 0  ;;  %p640_p2 = scmp.lt.s32.totalorder %s3398_s2, 3 }
  0x2c   : > { %s3400_s7 = smov [#allocation9]   ;;  %s3401_s25 = smov [#allocation10]  }
  0x2d   : > { %p3585_p3 = pnand %p2439_p0, %p640_p2  ;;  %s652_s30 = sshll.u32 %s3400_s7, 4  ;;  %s3589_s30 = int_to_ptr.vmem [resolvable:$true] %s652_s30 }
  0x2e   : > { %s668_s8 = sshll.u32 %s3401_s25, 4  ;;  %s3402_s4 = smov [#allocation13]   ;;  %s3600_s8 = int_to_ptr.vmem [resolvable:$true] %s668_s8 }
  0x2f   : > { %s4317_s0 = scalar_select %p3585_p3, 1, 0 }
  0x30   : > { %p2705_p4 = pneg %p3585_p3  ;;  %s3602_s1 = sshll.u32 %s3402_s4, 4  ;;  %s701_s1 = int_to_ptr.vmem [resolvable:$true] %s3602_s1 }
  0x31   : > { %s4319_s19 = sld [smem:[#allocation40_spill]] }
  0x32   : > { %p3596_p6 = pnand %p2705_p4, %p4272_p1 }
  0x34   : > { %p3612_p8 = pneg %p3596_p6 }
  0x37   : > { %s2920_s18 = scalar_lea.hbm %s4319_s19, 512 }
  0x38   : > { %p2921_p7 = scmp.ne.s32.totalorder %s4319_s19, %s2920_s18  ;;  %p2927_p11 = scmp.lt.u32.totalorder %s2920_s18, %s4319_s19 }
  0x3a   : > { %p2923_p9 = pnand %p3612_p8, %p2921_p7 }
  0x3c   : > { %p2924_p10 = pneg %p2923_p9 }
  0x3e   : > { %p2929_p12 = pnand %p2927_p11, %p2924_p10 }
  0x40   : > { %2932 = shalt.err (!%p2929_p12)
}
  0x41   : > { %s2933_s20 = scalar_lea.vmem %s3589_s30, 512  ;;  %p2941_p4 = scmp.lt.s32.totalorder %s3589_s30, %s3589_s30 }
  0x42   : > { %p2934_p13 = scmp.ne.s32.totalorder %s3589_s30, %s2933_s20  ;;  %p2942_p5 = scmp.lt.s32.totalorder %s2933_s20, %s2933_s20 }
  0x44   : > { %p2936_p0 = pnand %p2934_p13, %p3612_p8  ;;  %p2943_p7 = por %p2942_p5, %p2941_p4 }
  0x46   : > { %p2937_p2 = pneg %p2936_p0 }
  0x48   : > { %p2944_p9 = pnand %p2943_p7, %p2937_p2 }
  0x4a   : > { %2947 = shalt.err (!%p2944_p9)
}
  0x4b   : > { %s4276_s22 = smov 128   ;;  %s3404_s18 = smov 8  }
  0x4c   : > { %2708 = dma.hbm_to_vmem [thread:$0]  (!%p3596_p6), %s4319_s19, 512, %s3589_s30, [#allocation8], %s4276_s22, %s4276_s22, %s3404_s18  }
  0x4d   : > { %s4321_s21 = sld [smem:[#allocation42_spill]] }
  0x53   : > { %s2948_s20 = scalar_lea.hbm %s4321_s21, 512 }
  0x54   : > { %p2949_p5 = scmp.ne.s32.totalorder %s4321_s21, %s2948_s20  ;;  %p2955_p12 = scmp.lt.u32.totalorder %s2948_s20, %s4321_s21 }
  0x56   : > { %p2951_p10 = pnand %p2949_p5, %p3612_p8 }
  0x58   : > { %p2952_p11 = pneg %p2951_p10 }
  0x5a   : > { %p2957_p13 = pnand %p2955_p12, %p2952_p11 }
  0x5c   : > { %2960 = shalt.err (!%p2957_p13)
}
  0x5d   : > { %s2961_s30 = scalar_lea.vmem %s3600_s8, 512  ;;  %p2969_p7 = scmp.lt.s32.totalorder %s3600_s8, %s3600_s8 }
  0x5e   : > { %p2962_p0 = scmp.ne.s32.totalorder %s3600_s8, %s2961_s30  ;;  %p2970_p9 = scmp.lt.s32.totalorder %s2961_s30, %s2961_s30 }
  0x60   : > { %p2964_p2 = pnand %p2962_p0, %p3612_p8  ;;  %p2971_p5 = por %p2970_p9, %p2969_p7 }
  0x62   : > { %p2965_p4 = pneg %p2964_p2 }
  0x64   : > { %p2972_p10 = pnand %p2971_p5, %p2965_p4 }
  0x66   : > { %2975 = shalt.err (!%p2972_p10)
}
  0x67   : > { %2711 = dma.hbm_to_vmem [thread:$0]  (!%p3596_p6), %s4321_s21, 512, %s3600_s8, [#allocation11], %s4276_s22, %s4276_s22, %s3404_s18  }
  0x68   : > { %s4322_s24 = sld [smem:[#allocation46_spill]] }
  0x6e   : > { %s2976_s7 = scalar_lea.hbm %s4322_s24, 768 }
  0x6f   : > { %p2977_p11 = scmp.ne.s32.totalorder %s4322_s24, %s2976_s7  ;;  %p2983_p0 = scmp.lt.u32.totalorder %s2976_s7, %s4322_s24 }
  0x71   : > { %p2979_p12 = pnand %p2977_p11, %p3612_p8 }
  0x73   : > { %p2980_p13 = pneg %p2979_p12 }
  0x75   : > { %p2985_p2 = pnand %p2983_p0, %p2980_p13 }
  0x77   : > { %2988 = shalt.err (!%p2985_p2)
}
  0x78   : > { %s2989_s15 = scalar_lea.vmem %s701_s1, 768  ;;  %p2997_p5 = scmp.lt.s32.totalorder %s701_s1, %s701_s1 }
  0x79   : > { %p2990_p4 = scmp.ne.s32.totalorder %s701_s1, %s2989_s15  ;;  %p2998_p10 = scmp.lt.s32.totalorder %s2989_s15, %s2989_s15 }
  0x7b   : > { %p2992_p7 = pnand %p2990_p4, %p3612_p8  ;;  %p2999_p1 = por %p2998_p10, %p2997_p5 }
  0x7d   : > { %p2993_p9 = pneg %p2992_p7 }
  0x7f   : > { %p3000_p3 = pnand %p2999_p1, %p2993_p9 }
  0x81   : > { %3003 = shalt.err (!%p3000_p3)
}
  0x82   : > { %2717 = dma.hbm_to_vmem [thread:$0]  (!%p3596_p6), %s4322_s24, 768, %s701_s1, [#allocation14], %s4276_s22, %s4276_s22, %s3404_s18  }
  0x83   : > { %s3405_s17 = smov [#allocation16]   ;;  %s3406_s7 = smov [#allocation12]  }
  0x84   : > { %s732_s28 = sshll.u32 %s3405_s17, 4  ;;  %s684_s25 = sshll.u32 %s3406_s7, 4  ;;  %s733_s28 = int_to_ptr.vmem [resolvable:$true] %s732_s28  ;;  %s685_s25 = int_to_ptr.vmem [resolvable:$true] %s684_s25 }
  0x85   : > { %s4323_s12 = sld [smem:[#allocation50_spill]] }
  0x8b   : > { %s3004_s30 = scalar_lea.hbm %s4323_s12, 1024 }
  0x8c   : > { %p3005_p1 = scmp.ne.s32.totalorder %s4323_s12, %s3004_s30  ;;  %p3011_p12 = scmp.lt.u32.totalorder %s3004_s30, %s4323_s12 }
  0x8e   : > { %p3007_p3 = pnand %p3005_p1, %p3612_p8 }
  0x90   : > { %p3008_p11 = pneg %p3007_p3 }
  0x92   : > { %p3013_p13 = pnand %p3011_p12, %p3008_p11 }
  0x94   : > { %3016 = shalt.err (!%p3013_p13)
}
  0x95   : > { %s3017_s1 = scalar_lea.vmem %s733_s28, 1024  ;;  %p3025_p7 = scmp.lt.s32.totalorder %s733_s28, %s733_s28 }
  0x96   : > { %p3018_p0 = scmp.ne.s32.totalorder %s733_s28, %s3017_s1  ;;  %p3026_p9 = scmp.lt.s32.totalorder %s3017_s1, %s3017_s1 }
  0x98   : > { %p3020_p2 = pnand %p3018_p0, %p3612_p8  ;;  %p3027_p5 = por %p3026_p9, %p3025_p7 }
  0x9a   : > { %p3021_p4 = pneg %p3020_p2 }
  0x9c   : > { %p3028_p10 = pnand %p3027_p5, %p3021_p4 }
  0x9e   : > { %3031 = shalt.err (!%p3028_p10)
}
  0x9f   : > { %s4277_s19 = smov 64   ;;  %s4278_s16 = smov 4  }
  0xa0   : > { %2723 = dma.hbm_to_vmem [thread:$0]  (!%p3596_p6), %s4323_s12, 1024, %s733_s28, [#allocation17], %s4277_s19, %s4277_s19, %s4278_s16  }
  0xa1   : > { %s4324_s20 = sld [smem:[#allocation44_spill]] }
  0xa7   : > { %s3032_s30 = scalar_lea.hbm %s4324_s20, 768 }
  0xa8   : > { %p3033_p1 = scmp.ne.s32.totalorder %s4324_s20, %s3032_s30  ;;  %p3039_p12 = scmp.lt.u32.totalorder %s3032_s30, %s4324_s20 }
  0xaa   : > { %p3035_p3 = pnand %p3033_p1, %p3612_p8 }
  0xac   : > { %p3036_p11 = pneg %p3035_p3 }
  0xae   : > { %p3041_p13 = pnand %p3039_p12, %p3036_p11 }
  0xb0   : > { %3044 = shalt.err (!%p3041_p13)
}
  0xb1   : > { %s3045_s21 = scalar_lea.vmem %s685_s25, 768  ;;  %p3053_p7 = scmp.lt.s32.totalorder %s685_s25, %s685_s25 }
  0xb2   : > { %p3046_p0 = scmp.ne.s32.totalorder %s685_s25, %s3045_s21  ;;  %p3054_p9 = scmp.lt.s32.totalorder %s3045_s21, %s3045_s21 }
  0xb4   : > { %p3048_p2 = pnand %p3046_p0, %p3612_p8  ;;  %p3055_p5 = por %p3054_p9, %p3053_p7 }
  0xb6   : > { %p3049_p4 = pneg %p3048_p2 }
  0xb8   : > { %p3056_p10 = pnand %p3055_p5, %p3049_p4 }
  0xba   : > { %3059 = shalt.err (!%p3056_p10)
}
  0xbb   : > { %s4325_s28 = smov 128   ;;  %s3409_s7 = smov [#allocation15]  }
  0xbc   : > { %2714 = dma.hbm_to_vmem [thread:$0]  (!%p3596_p6), %s4324_s20, 768, %s685_s25, [#allocation11], %s4325_s28, %s4325_s28, %s3404_s18  }
  0xbd   : > { %s716_s4 = sshll.u32 %s3409_s7, 4  ;;  %s3410_s30 = smov [#allocation18]   ;;  %s717_s4 = int_to_ptr.vmem [resolvable:$true] %s716_s4 }
  0xbe   : > { %s748_s15 = sshll.u32 %s3410_s30, 4  ;;  %s4326_s10 = sld [smem:[#allocation48_spill]]  ;;  %s749_s15 = int_to_ptr.vmem [resolvable:$true] %s748_s15 }
  0xc4   : > { %s3060_s21 = scalar_lea.hbm %s4326_s10, 1024 }
  0xc5   : > { %p3061_p1 = scmp.ne.s32.totalorder %s4326_s10, %s3060_s21  ;;  %p3067_p12 = scmp.lt.u32.totalorder %s3060_s21, %s4326_s10 }
  0xc7   : > { %p3063_p3 = pnand %p3061_p1, %p3612_p8 }
  0xc9   : > { %p3064_p11 = pneg %p3063_p3 }
  0xcb   : > { %p3069_p13 = pnand %p3067_p12, %p3064_p11 }
  0xcd   : > { %3072 = shalt.err (!%p3069_p13)
}
  0xce   : > { %s3073_s18 = scalar_lea.vmem %s717_s4, 1024  ;;  %p3081_p7 = scmp.lt.s32.totalorder %s717_s4, %s717_s4 }
  0xcf   : > { %p3074_p0 = scmp.ne.s32.totalorder %s717_s4, %s3073_s18  ;;  %p3082_p9 = scmp.lt.s32.totalorder %s3073_s18, %s3073_s18 }
  0xd1   : > { %p3076_p2 = pnand %p3074_p0, %p3612_p8  ;;  %p3083_p5 = por %p3082_p9, %p3081_p7 }
  0xd3   : > { %p3077_p4 = pneg %p3076_p2 }
  0xd5   : > { %p3084_p10 = pnand %p3083_p5, %p3077_p4 }
  0xd7   : > { %3087 = shalt.err (!%p3084_p10)
}
  0xd8   : > { %s4327_s25 = smov 4   ;;  %s4328_s19 = smov 64  }
  0xd9   : > { %2720 = dma.hbm_to_vmem [thread:$0]  (!%p3596_p6), %s4326_s10, 1024, %s717_s4, [#allocation14], %s4328_s19, %s4328_s19, %s4327_s25  }
  0xda   : > { %s4329_s14 = sld [smem:[#allocation52_spill]] }
  0xe0   : > { %s3088_s7 = scalar_lea.hbm %s4329_s14, 1920 }
  0xe1   : > { %p3089_p1 = scmp.ne.s32.totalorder %s4329_s14, %s3088_s7  ;;  %p3095_p12 = scmp.lt.u32.totalorder %s3088_s7, %s4329_s14 }
  0xe3   : > { %p3091_p3 = pnand %p3089_p1, %p3612_p8 }
  0xe5   : > { %p3092_p11 = pneg %p3091_p3 }
  0xe7   : > { %p3097_p13 = pnand %p3095_p12, %p3092_p11 }
  0xe9   : > { %3100 = shalt.err (!%p3097_p13)
}
  0xea   : > { %s3101_s22 = scalar_lea.vmem %s749_s15, 1920  ;;  %p3109_p7 = scmp.lt.s32.totalorder %s749_s15, %s749_s15 }
  0xeb   : > { %p3102_p0 = scmp.ne.s32.totalorder %s749_s15, %s3101_s22  ;;  %p3110_p9 = scmp.lt.s32.totalorder %s3101_s22, %s3101_s22 }
  0xed   : > { %p3104_p2 = pnand %p3102_p0, %p3612_p8  ;;  %p3111_p5 = por %p3110_p9, %p3109_p7 }
  0xef   : > { %p3105_p4 = pneg %p3104_p2 }
  0xf1   : > { %p3112_p10 = pnand %p3111_p5, %p3105_p4 }
  0xf3   : > { %3115 = shalt.err (!%p3112_p10)
}
  0xf4   : > { %s3411_s4 = smov 192   ;;  %s3412_s23 = smov 12  }
  0xf5   : > { %2726 = dma.hbm_to_vmem [thread:$0]  (!%p3596_p6), %s4329_s14, 1920, %s749_s15, [#allocation17], %s3411_s4, %s3411_s4, %s3412_s23  }
  0xf6   : > { %s4279_s19 = sadd.s32 4294967294, %s3398_s2   ;;  %s65_s12 = sadd.s32 1, %s3394_s6 }
  0xf7   : > { %s72_s16 = sadd.s32 1, %s3386_s27  ;;  %p67_p8 = scmp.ge.s32.totalorder %s65_s12, 2 }
  0xf8   : > { %p79_p1 = scmp.ne.s32.totalorder %s3386_s27, %s3382_s26  ;;  %p80_p3 = scmp.eq.s32.totalorder %s3398_s2, 0 }
  0xf9   : > { %p85_p11 = scmp.ne.s32.totalorder %s3382_s26, %s3378_s5  ;;  %s4379_s12 = smov (%p67_p8, %s65_s12), 0 }
  0xfa   : > { %4330 = sst [smem:[#allocation37_spill]] %s4379_s12  ;;  %p3775_p12 = por %p80_p3, %p79_p1 }
  0xfb   : > { %p4332_p13 = scmp.eq.s32.totalorder %s3580_s29, 0  ;;  %s69_s28 = ssub.s32 %s3394_s6, %s4379_s12 }
  0xfc   : > { %p515_p0 = scmp.eq.s32.totalorder %s3580_s29, 1  ;;  %p70_p2 = scmp.eq.s32.totalorder %s69_s28, 0 }
  0xfd   : > { %p3781_p6 = por %p4332_p13, %p85_p11  ;;  %p521_p4 = scmp.eq.s32.totalorder %s4279_s19, 1 }
  0xfe   : > { %p3790_p7 = por %p515_p0, %p79_p1  ;;  %p2757_p9 = scmp.lt.s32.totalorder %s3398_s2, 2 }
  0xff   : > { %s4333_s15 = scalar_select %p3781_p6, 1, 0 }
 0x100   : > { %s4334_s17 = scalar_select %p3790_p7, 1, 0 }
 0x101   : > { %s3796_s7 = scalar_select %p70_p2, %s3386_s27, %s72_s16  }
 0x102   : > { %p3798_p5 = por %p521_p4, %p85_p11  ;;  %s777_s8 = sand.u32 1, %s3386_s27  }
 0x103   : > { %s3803_s1 = sshll.u32 %s777_s8, 2  ;;  %s2449_s21 = sshll.u32 %s3394_s6, 6 }
 0x104   : > { %s4335_s30 = scalar_select %p3798_p5, 1, 0 }
 0x105   : > { %s4336_s23 = sld [smem:[#allocation38_spill]]  ;;  %s781_s25 = scalar_lea.vmem [#allocation4], %s3803_s1 }
 0x106   : > { %s788_s16 = sshll.u32 %s781_s25, 4  ;;  %p3816_p10 = pnand %p2757_p9, %p3775_p12  ;;  %s3812_s16 = int_to_ptr.vmem [resolvable:$true] %s788_s16 }
 0x107   : > { %s4338_s14 = sld [smem:[#allocation39_spill]]  ;;  %s795_s4 = sand.u32 1, %s3398_s2  }
 0x108   : > { %s778_s20 = scalar_lea.sflag [#allocation5], %s777_s8  ;;  %p3118_p1 = pneg %p3816_p10 }
 0x10b   : > { %s3809_s18 = scalar_lea.hbm %s4336_s23, %s2449_s21  ;;  %s3121_s12 = scalar_lea.hbm %s4336_s23, 128 }
 0x10c   : > { %s3116_s24 = scalar_lea.hbm %s3809_s18, 64  ;;  %p3122_p12 = scmp.lt.u32.totalorder %s3809_s18, %s4336_s23 }
 0x10d   : > { %s3823_s22 = scalar_lea.hbm %s4338_s14, %s2449_s21  ;;  %p3117_p8 = scmp.ne.s32.totalorder %s3809_s18, %s3116_s24 }
 0x10e   : > { %p3123_p13 = scmp.lt.u32.totalorder %s3121_s12, %s3116_s24  ;;  %p3125_p2 = scmp.lt.u32.totalorder %s3116_s24, %s3809_s18 }
 0x10f   : > { %p3119_p3 = pnand %p3118_p1, %p3117_p8 }
 0x110   : > { %p3124_p0 = por %p3123_p13, %p3122_p12 }
 0x111   : > { %p3120_p11 = pneg %p3119_p3 }
 0x112   : > { %p3126_p4 = por %p3125_p2, %p3124_p0 }
 0x114   : > { %p3127_p9 = pnand %p3126_p4, %p3120_p11 }
 0x116   : > { %3130 = shalt.err (!%p3127_p9)
}
 0x117   : > { %s3131_s19 = scalar_lea.vmem %s3812_s16, 64  ;;  %s3413_s8 = smov [#allocation4]  }
 0x118   : > { %p3132_p8 = scmp.ne.s32.totalorder %s3812_s16, %s3131_s19  ;;  %s3136_s21 = sshll.u32 %s3413_s8, 4  ;;  %s3137_s21 = int_to_ptr.vmem [resolvable:$false] %s3136_s21 }
 0x119   : > { %s3138_s6 = scalar_lea.vmem %s3137_s21, 128  ;;  %p3139_p7 = scmp.lt.s32.totalorder %s3812_s16, %s3137_s21 }
 0x11a   : > { %p3134_p3 = pnand %p3132_p8, %p3118_p1  ;;  %p3140_p12 = scmp.lt.s32.totalorder %s3138_s6, %s3131_s19 }
 0x11c   : > { %p3135_p5 = pneg %p3134_p3  ;;  %p3141_p13 = por %p3140_p12, %p3139_p7 }
 0x11e   : > { %p3142_p0 = pnand %p3141_p13, %p3135_p5 }
 0x120   : > { %3145 = shalt.err (!%p3142_p0)
}
 0x121   : > { %2730 = dma.hbm_to_vmem [thread:$0]  (!%p3816_p10), %s3809_s18, 64, %s3812_s16, %s778_s20  }
 0x122   : > { %s799_s24 = scalar_lea.vmem [#allocation7], %s3803_s1  ;;  %s796_s3 = scalar_lea.sflag [#allocation8], %s795_s4 }
 0x123   : > { %s806_s12 = sshll.u32 %s799_s24, 4  ;;  %s3146_s25 = scalar_lea.hbm %s3823_s22, 64  ;;  %s807_s12 = int_to_ptr.vmem [resolvable:$true] %s806_s12 }
 0x124   : > { %p3147_p7 = scmp.ne.s32.totalorder %s3823_s22, %s3146_s25  ;;  %s3151_s8 = scalar_lea.hbm %s4338_s14, 128 }
 0x125   : > { %p3152_p2 = scmp.lt.u32.totalorder %s3823_s22, %s4338_s14  ;;  %p3153_p4 = scmp.lt.u32.totalorder %s3151_s8, %s3146_s25 }
 0x126   : > { %p3149_p5 = pnand %p3147_p7, %p3118_p1  ;;  %p3155_p8 = scmp.lt.u32.totalorder %s3146_s25, %s3823_s22 }
 0x127   : > { %p3154_p9 = por %p3153_p4, %p3152_p2 }
 0x128   : > { %p3150_p11 = pneg %p3149_p5 }
 0x129   : > { %p3156_p3 = por %p3155_p8, %p3154_p9 }
 0x12b   : > { %p3157_p12 = pnand %p3156_p3, %p3150_p11 }
 0x12d   : > { %3160 = shalt.err (!%p3157_p12)
}
 0x12e   : > { %s3161_s20 = scalar_lea.vmem %s807_s12, 64  ;;  %s3414_s1 = smov [#allocation7]  }
 0x12f   : > { %p3162_p13 = scmp.ne.s32.totalorder %s807_s12, %s3161_s20  ;;  %s3166_s18 = sshll.u32 %s3414_s1, 4  ;;  %s3167_s18 = int_to_ptr.vmem [resolvable:$false] %s3166_s18 }
 0x130   : > { %s3168_s16 = scalar_lea.vmem %s3167_s18, 128  ;;  %p3169_p5 = scmp.lt.s32.totalorder %s807_s12, %s3167_s18 }
 0x131   : > { %p3164_p0 = pnand %p3162_p13, %p3118_p1  ;;  %p3170_p6 = scmp.lt.s32.totalorder %s3168_s16, %s3161_s20 }
 0x133   : > { %p3165_p7 = pneg %p3164_p0  ;;  %p3171_p2 = por %p3170_p6, %p3169_p5 }
 0x135   : > { %p3172_p4 = pnand %p3171_p2, %p3165_p7 }
 0x137   : > { %3175 = shalt.err (!%p3172_p4)
}
 0x138   : > { %2733 = dma.hbm_to_vmem [thread:$0]  (!%p3816_p10), %s3823_s22, 64, %s807_s12, %s796_s3  }
 0x139   : > { %p4339_p11 = scmp.ne.s32.totalorder %s4317_s0, 0 }
 0x13a   : > { %s3876_s4 = sand.u32 (!%p4339_p11), 1, %s3382_s26   ;;  %p4340_p6 = scmp.ne.s32.totalorder (!%p4339_p11), %s4333_s15, 0 }
 0x13b   : > { %815 = sbr.rel (%p4339_p11) target bundleno = 2630 (0xa46), region = 100  ;;  %s2453_s24 = sshll.u32 (!%p4339_p11), %s3876_s4, 2 }
 0x13c   : > { %s818_s25 = scalar_lea.sflag (!%p4339_p11), [#allocation5], %s3876_s4  ;;  %s3880_s10 = scalar_lea.vmem (!%p4339_p11), [#allocation4], %s2453_s24 }
 0x142   : > { %3341 = dma.done.wait (%p4340_p6), %s818_s25, 64  }
 0x143   : > { %3343 = vsyncadd (%p4340_p6), %s818_s25, 4294967232  ;;  %s3887_s28 = sand.u32 1, %s3580_s29   ;;  %s3890_s22 = scalar_lea.vmem [#allocation7], %s2453_s24 }
 0x144   : > { %s827_s0 = scalar_lea.sflag [#allocation8], %s3887_s28 }
 0x145   : > { %3345 = dma.done.wait (%p4340_p6), %s827_s0, 64  }
 0x146   : > { %3347 = vsyncadd (%p4340_p6), %s827_s0, 4294967232  ;;  %p4341_p10 = scmp.eq.s32.totalorder %s3580_s29, 0 }
 0x148   : > { %3349 = dma.done.wait (%p4341_p10), [#allocation8], 512   ;;  %p4342_p1 = pmov %p4341_p10 }
 0x14a   : > { %3351 = vsyncadd (%p4342_p1), [#allocation8], 4294966784  ;;  %p4343_p9 = pmov %p4342_p1 }
 0x14b   : > { %p4344_p8 = pmov %p4342_p1 }
 0x14c   : > { %3353 = dma.done.wait (%p4343_p9), [#allocation11], 1280  }
 0x14d   : > { %3355 = vsyncadd (%p4344_p8), [#allocation11], 4294966016  ;;  %p4345_p3 = pmov %p4342_p1 }
 0x14e   : > { %p4346_p12 = pmov %p4342_p1 }
 0x14f   : > { %3357 = dma.done.wait (%p4345_p3), [#allocation14], 1792  }
 0x150   : > { %3359 = vsyncadd (%p4346_p12), [#allocation14], 4294965504  ;;  %p4347_p13 = pmov %p4342_p1 }
 0x151   : > { %p4348_p0 = pmov %p4342_p1 }
 0x152   : > { %3361 = dma.done.wait (%p4347_p13), [#allocation17], 2944  }
 0x153   : > { %3363 = vsyncadd (%p4348_p0), [#allocation17], 4294964352  ;;  %v3415_v0 = vmov 0   ;;  %v2831_v1 = vld [vmem:[#allocation13 + $0x4] ss:$8 sps:$4 sm:$0xff]   ;;  %vm1084_vm0 = vcmask 392192   ;;  %v961_v19 = vlaneseq }
 0x154   : > { %1120 = vmatprep.mubr.bf16.mxu1 %v3415_v0  ;;  %1027 = vmatprep.mubr.bf16.mxu0 %v3415_v0  ;;  %v2833_v2 = vld [vmem:[#allocation13] ss:$8 sps:$4 sm:$0xff]   ;;  %v2834_v3 = vld [vmem:[#allocation13 + $0x14] ss:$8 sps:$4 sm:$0xff]   ;;  %v2836_v4 = vld [vmem:[#allocation13 + $0x10] ss:$8 sps:$4 sm:$0xff]  }
 0x155   : > { %1088 = vmatprep.subr.bf16.mxu1 %v2831_v1  ;;  %v2837_v5 = vld [vmem:[#allocation13 + $0x24] ss:$8 sps:$4 sm:$0xff]   ;;  %v2840_v6 = vld [vmem:[#allocation10 + $0x4] ss:$8 sps:$4 sm:$0xff]   ;;  %v2842_v7 = vld [vmem:[#allocation10] ss:$8 sps:$4 sm:$0xff]  }
 0x156   : > { %1089 = vmatpush1.bf16.msra.mxu1 %v2833_v2  ;;  %v2839_v8 = vld [vmem:[#allocation13 + $0x20] ss:$8 sps:$4 sm:$0xff]   ;;  %995 = vmatprep.subr.bf16.mxu0 %v2840_v6  ;;  %v2843_v9 = vld [vmem:[#allocation10 + $0x14] ss:$8 sps:$4 sm:$0xff]   ;;  %v2848_v11 = vld [vmem:[#allocation9 + $0x4] ss:$8 sps:$4 sm:$0xff]  }
 0x157   : > { %1090 = vmatprep.subr.bf16.mxu1 %v2834_v3  ;;  %996 = vmatpush1.bf16.msra.mxu0 %v2842_v7  ;;  %v2845_v10 = vld [vmem:[#allocation10 + $0x10] ss:$8 sps:$4 sm:$0xff]   ;;  %v2846_v14 = vld [vmem:[#allocation9] ss:$8 sps:$4 sm:$0xff]   ;;  %v2851_v15 = vld [vmem:[#allocation9 + $0x14] ss:$8 sps:$4 sm:$0xff]  }
 0x158   : > { %997 = vmatprep.subr.bf16.mxu0 %v2843_v9  ;;  %v954_v12 = vld [vmem:[%s3890_s22] sm:$0xf]  ;;  %v953_v13 = vld [vmem:[%s3880_s10] sm:$0xf]  ;;  %vm991_vm1 = vcmask 261120   ;;  %v3416_v18 = vmov 0.0  }
 0x159   : > { %v2849_v16 = vld [vmem:[#allocation9 + $0x10] ss:$8 sps:$4 sm:$0xff]   ;;  %vm3417_vm2 = vmmov 0   ;;  %v3930_v20 = vshrl.u32 %v961_v19, 7  ;;  %s4349_s9 = sld [smem:[#allocation47_spill]]  ;;  %s4350_s19 = sld [smem:[#allocation43_spill]] }
 0x15a   : > { %1091 = vmatpush1.bf16.msra.mxu1 %v2836_v4  ;;  %v3920_v17 = vld [vmem:[%s3880_s10] sm:$0xf]  ;;  %s4351_s6 = sld [smem:[#allocation41_spill]]  ;;  %vm1293_vm3 = vcmask 1043456   ;;  %vm1277_vm4 = vcmask 64512   ;;  %v2861_v2 = vld [vmem:[#allocation15] sm:$0xff]  }
 0x15b   : > { %1092 = vmatprep.subr.bf16.mxu1 %v2837_v5  ;;  %998 = vmatpush1.bf16.msra.mxu0 %v2845_v10  ;;  %v3933_v21 = vsub.s32 0, %v3930_v20  ;;  %v3939_v23 = vsub.s32 1, %v3930_v20  ;;  %v2854_v1 = vld [vmem:[#allocation12 + $0x4] ss:$8 sps:$4 sm:$0xff]   ;;  %v2863_v4 = vld [vmem:[#allocation15 + $0x10] sm:$0xff]   ;;  %v2864_v5 = vld [vmem:[#allocation15 + $0x18] sm:$0xff]  }
 0x15c   : > { %1184 = vmatprep.subr.bf16.mxu0 %v2848_v11  ;;  %v2862_v3 = vld [vmem:[#allocation15 + $0x8] sm:$0xff]   ;;  %v2865_v6 = vld [vmem:[#allocation15 + $0x20] sm:$0xff]   ;;  %s3967_s20 = sshll.u32 %s3876_s4, 3  ;;  %s4352_s24 = sld [smem:[#allocation45_spill]]  ;;  %vm1939_vm5 = vcmask 654336  }
 0x15d   : > { %v2866_v7 = vld [vmem:[#allocation15 + $0x28] sm:$0xff]   ;;  %s940_s1 = scalar_lea.vmem [#allocation23], %s3967_s20  ;;  %s4353_s11 = sld [smem:[#allocation49_spill]] }
 0x15e   : > { %1093 = vmatpush1.bf16.msra.mxu1 %v2839_v8  ;;  %2470 = vmatmul.mubr.msk.bf16.vlgmr.msra.gmra.mrb[0].mxu0 %vm991_vm1, %v953_v13  ;;  %v2867_v8 = vld [vmem:[#allocation15 + $0x30] sm:$0xff]   ;;  %v2858_v19 = vld [vmem:[#allocation12 + $0x20] ss:$8 sps:$4 sm:$0xff]   ;;  %s4286_s0 = scalar_lea.vmem [#allocation25], %s3967_s20  ;;  %s4354_s13 = sld [smem:[#allocation51_spill]] }
 0x15f   : > { %1185 = vmatpush1.bf16.msra.mxu0 %v2846_v14  ;;  %1216 = vmatprep.mubr.bf16.mxu0 %v3415_v0  ;;  %v1042_v22 = vld [vmem:[%s4349_s9] sm:$0x3]  ;;  %v2857_v14 = vld [vmem:[#allocation12 + $0x14] ss:$8 sps:$4 sm:$0xff]   ;;  %s2661_s8 = smul.u32 12, %s3876_s4  ;;  %s926_s29 = scalar_lea.vmem [#allocation20], %s3967_s20 }
 0x160   : > { %1186 = vmatprep.subr.bf16.mxu0 %v2851_v15  ;;  %2583 = vmatprep.subr.bf16.mxu1 %v3416_v18  ;;  %v959_v24 = vld [vmem:[%s4350_s19] sm:$0x3]  ;;  %v1047_v25 = vrot.slane %v1042_v22, %v3933_v21  ;;  %v1051_v27 = vrot.slane %v1042_v22, %v3939_v23  ;;  %v2855_v15 = vld [vmem:[#allocation12 + $0x10] ss:$8 sps:$4 sm:$0xff]   ;;  %s4355_s19 = sld [smem:[#allocation53_spill]]  ;;  %s4287_s15 = scalar_lea.vmem [#allocation22], %s3967_s20 }
 0x161   : > { %2477 = vmatmul.mubr.msk.bf16.vlgmr.msra.gmra.mrb[0].mxu1 %vm1084_vm0, %v954_v12  ;;  %v964_v26 = vrot.slane %v959_v24, %v3933_v21  ;;  %v968_v28 = vrot.slane %v959_v24, %v3939_v23  ;;  %v2485_v45 = vld [vmem:[%s4351_s6] ss:$0 sm:$0xff]  ;;  %v3976_v22 = vld [vmem:[%s3890_s22] sm:$0xf]  ;;  %s3418_s22 = smov 32   ;;  %s4042_s21 = scalar_lea.vmem [#allocation19], %s2661_s8 }
 0x162   : > { %2585 = vmatprep.mubr.msk.bf16.mxu1 %vm3417_vm2, %v3416_v18  ;;  %v2852_v12 = vld [vmem:[#allocation12] ss:$8 sps:$4 sm:$0xff]   ;;  %s4356_s6 = sld [smem:[#allocation35_spill]]  ;;  %s4359_s8 = sld [smem:[#allocation59_spill]] }
 0x163   : > { %1187 = vmatpush1.bf16.msra.mxu0 %v2849_v16  ;;  %v2860_v16 = vld [vmem:[#allocation12 + $0x24] ss:$8 sps:$4 sm:$0xff]   ;;  %s2095_s16 = sshll.u32 %s926_s29, 4  ;;  %p4360_p5 = scmp.ne.s32.totalorder %s4334_s17, 0  ;;  %s2096_s16 = int_to_ptr.vmem [resolvable:$true] %s2095_s16 }
 0x164   : > { %2589 = vmatprep.subr.bf16.mxu0 %v3416_v18  ;;  %s3176_s25 = scalar_lea.vmem %s2096_s16, 128  ;;  %s3419_s10 = smov [#allocation20]  }
 0x165   : > { %p3177_p7 = scmp.ne.s32.totalorder %s2096_s16, %s3176_s25 }
 0x166   : > { %2484 = vmatmul.mubr.msk.bf16.vlgmr.msra.gmra.mrb[4].mxu0 %vm991_vm1, %v3920_v17 }
 0x167   : > { %2591 = vmatprep.mubr.msk.bf16.mxu0 %vm3417_vm2, %v3416_v18  ;;  %p3178_p2 = pnand %p3177_p7, %p4360_p5 }
 0x168   : > { %s4061_s12 = sshll.u32 %s4356_s6, 7 }
 0x169   : > { %s4067_s18 = scalar_lea.hbm %s4359_s8, %s4061_s12  ;;  %p3179_p4 = pneg %p3178_p2 }
 0x231   : > { %v1029_v30 = vpop.f32.mrb[0].mxu0 }
 0x232   : > { %v1030_v33 = vadd.f32 %v1029_v30, %v964_v26  ;;  %v1031_v34 = vpop.f32.mrb[1].mxu0 }
 0x233   : > { %v1032_v37 = vadd.f32 %v1031_v34, %v968_v28  ;;  %v1033_v38 = vpop.f32.mrb[2].mxu0 }
 0x234   : > { %v1122_v29 = vpop.f32.mrb[0].mxu1  ;;  %v1034_v40 = vpop.f32.mrb[3].mxu0 }
 0x235   : > { %v1123_v31 = vadd.f32 %v1122_v29, %v1047_v25  ;;  %v1124_v32 = vpop.f32.mrb[1].mxu1  ;;  %v2549_v42 = vpack.c.bf16 %v1032_v37, %v1030_v33  ;;  %v2868_v25 = vld [vmem:[#allocation15 + $0x38] sm:$0xff]  }
 0x236   : > { %v1125_v35 = vadd.f32 %v1124_v32, %v1051_v27  ;;  %v1126_v36 = vpop.f32.mrb[2].mxu1 }
 0x237   : > { %v1127_v39 = vpop.f32.mrb[3].mxu1  ;;  %1137 = vst [vmem:[#allocation2] sm:$0xff] %v2549_v42 }
 0x238   : > { %v2550_v41 = vpack.c.bf16 %v1125_v35, %v1123_v31  ;;  %v2505_v31 = vld [vmem:[%s4352_s24] ss:$0 sm:$0xff]  ;;  %s4357_s24 = sld [smem:[#allocation54_spill]] }
 0x239   : > { %v1218_v43 = vpop.f32.mrb[4].mxu0 }
 0x23a   : > { %1146 = vst [vmem:[#allocation3] sm:$0xff] %v2550_v41  ;;  %v3948_v44 = vpop.f32.mrb[5].mxu0  ;;  %v1232_v48 = vadd.f32 %v2485_v45, %v1218_v43 }
 0x23b   : > { %v1222_v46 = vpop.f32.mrb[6].mxu0 }
 0x23c   : > { %v1223_v47 = vpop.f32.mrb[7].mxu0  ;;  %v1233_v52 = vpack.c.bf16 %v1232_v48, %v1232_v48 }
 0x23e   : > { %v1571_v24 = vld [vmem:[#allocation2] sm:$0xf]  ;;  %v1572_v36 = vld [vmem:[#allocation2 + $0x4] sm:$0xf] }
 0x23f   : > { %v1630_v39 = vsel %vm1293_vm3, %v1572_v36, 0 }
 0x241   : > { %v1234_v49 = vld [vmem:[#allocation3] sm:$0xf]  ;;  %v1235_v50 = vld [vmem:[#allocation3 + $0x4] sm:$0xf] }
 0x242   : > { %2584 = vmatpush3.bf16.xpose.msra.mxu1 %v1234_v49  ;;  %v1295_v51 = vsel %vm1293_vm3, %v1235_v50, 0 }
 0x243   : > { %2590 = vmatpush3.bf16.msra.mxu0 %v1295_v51  ;;  %2595 = vmatprep.subr.bf16.mxu1 %v3416_v18 }
 0x244   : > { %1521 = vmatprep.subr.bf16.mxu0 %v2854_v1  ;;  %v2872_v1 = vld [vmem:[#allocation16 + $0x18] sm:$0xff]  }
 0x249   : > { %2586 = vmatmul.mubr.bf16.vlgmr.msra.gmra.mrb[4].mxu1 %v1233_v52 }
 0x24a   : > { %2611 = vmatprep.mubr.msk.bf16.mxu1 %vm3417_vm2, %v3416_v18  ;;  %2596 = vmatpush3.bf16.msra.mxu1 %v2861_v2  ;;  %v2873_v2 = vld [vmem:[#allocation16 + $0x20] sm:$0xff]  }
 0x24b   : > { %2597 = vmatprep.subr.bf16.mxu1 %v3416_v18 }
 0x24e   : > { %2598 = vmatpush3.bf16.msra.mxu1 %v2862_v3  ;;  %v2874_v3 = vld [vmem:[#allocation16 + $0x28] sm:$0xff]  }
 0x24f   : > { %2599 = vmatprep.subr.bf16.mxu1 %v3416_v18 }
 0x252   : > { %2600 = vmatpush3.bf16.msra.mxu1 %v2863_v4  ;;  %v2875_v4 = vld [vmem:[#allocation16 + $0x30] sm:$0xff]  }
 0x253   : > { %2601 = vmatprep.subr.bf16.mxu1 %v3416_v18 }
 0x256   : > { %2602 = vmatpush3.bf16.msra.mxu1 %v2864_v5  ;;  %v2876_v5 = vld [vmem:[#allocation16 + $0x38] sm:$0xff]  }
 0x257   : > { %2603 = vmatprep.subr.bf16.mxu1 %v3416_v18 }
 0x25a   : > { %2604 = vmatpush3.bf16.msra.mxu1 %v2865_v6  ;;  %v2518_v6 = vcombine.low %v3976_v22, %v3976_v22 }
 0x25b   : > { %2605 = vmatprep.subr.bf16.mxu1 %v3416_v18 }
 0x25e   : > { %2606 = vmatpush3.bf16.msra.mxu1 %v2866_v7 }
 0x25f   : > { %2607 = vmatprep.subr.bf16.mxu1 %v3416_v18 }
 0x262   : > { %2608 = vmatpush3.bf16.msra.mxu1 %v2867_v8 }
 0x263   : > { %2609 = vmatprep.subr.bf16.mxu1 %v3416_v18 }
 0x266   : > { %2610 = vmatpush3.bf16.msra.mxu1 %v2868_v25  ;;  %v2892_v25 = vld [vmem:[#allocation18 + $0x64] ss:$12 sps:$4 sm:$0xff]  }
 0x31c   : > { %v1270_v53 = vpop.f32.mrb[4].mxu1 }
 0x31d   : > { %v1276_v54 = vmul.f32 0.088388346, %v1270_v53  ;;  %v2587_v55 = vpop.f32.mrb[5].mxu1 }
 0x31e   : > { %v1273_v56 = vpop.f32.mrb[6].mxu1 }
 0x31f   : > { %v2588_v57 = vpop.f32.mrb[7].mxu1  ;;  %v1278_v58 = vsel %vm1277_vm4, %v1276_v54, -inf }
 0x320   : > { %1279 = vmax.xlane.f32.xlu0 %v1278_v58 }
 0x3ad   : > { %v1280_v59 = vpop.xlane.xlu0 %1279 }
 0x3ae   : > { %v1281_v60 = vsub.f32 %v1276_v54, %v1280_v59 }
 0x3b0   : > { %v1282_v61 = vmul.f32 1.442695, %v1281_v60  ;;  %v2869_v60 = vld [vmem:[#allocation16] sm:$0xff]  }
 0x3b2   : > { %2898 = vpow2.f32 %v1282_v61 }
 0x3bc   : > { %v2899_v62 = vpop.eup %2898 }
 0x3bd   : > { %v1284_v63 = vsel %vm1277_vm4, %v2899_v62, 0.0 }
 0x3be   : > { %1285 = vadd.xlane.f32.xlu0 %v1284_v63  ;;  %v2871_v63 = vld [vmem:[#allocation16 + $0x10] sm:$0xff]  }
 0x3d4   : > { %1818 = vrot.lane.b32.xlu0 %v2518_v6, %s3418_s22  ;;  %s4358_s22 = sld [smem:[#allocation55_spill]] }
 0x44b   : > { %v1286_v9 = vpop.xlane.xlu0 %1285 }
 0x44c   : > { %2900 = vrcp.f32 %v1286_v9 }
 0x456   : > { %v2901_v10 = vpop.eup %2900 }
 0x457   : > { %v1288_v11 = vmul.f32 %v2901_v10, %v2899_v62  ;;  %v2870_v62 = vld [vmem:[#allocation16 + $0x8] sm:$0xff]  }
 0x459   : > { %v1289_v13 = vpack.c.bf16 %v1288_v11, %v1288_v11  ;;  %1480 = vst.msk [vmem:[%s940_s1] sm:$0xff] %vm1277_vm4, %v1288_v11 }
 0x45b   : > { %2592 = vmatmul.mubr.msk.bf16.vlgmr.msra.gmra.mrb[8].mxu0 %vm1277_vm4, %v1289_v13  ;;  %v2880_v13 = vld [vmem:[#allocation18 + $0x4] ss:$12 sps:$4 sm:$0xff]  }
 0x45c   : > { %1522 = vmatpush1.bf16.msra.mxu0 %v2852_v12  ;;  %1553 = vmatprep.mubr.bf16.mxu0 %v3415_v0  ;;  %v2878_v12 = vld [vmem:[#allocation18] ss:$12 sps:$4 sm:$0xff]  }
 0x45d   : > { %1523 = vmatprep.subr.bf16.mxu0 %v2857_v14  ;;  %v2883_v14 = vld [vmem:[#allocation18 + $0x1c] ss:$12 sps:$4 sm:$0xff]   ;;  %1942 = vmatprep.subr.bf16.mxu1 %v2880_v13 }
 0x460   : > { %1524 = vmatpush1.bf16.msra.mxu0 %v2855_v15  ;;  %v2881_v15 = vld [vmem:[#allocation18 + $0x18] ss:$12 sps:$4 sm:$0xff]  }
 0x461   : > { %1525 = vmatprep.subr.bf16.mxu0 %v2860_v16  ;;  %v2886_v16 = vld [vmem:[#allocation18 + $0x34] ss:$12 sps:$4 sm:$0xff]  }
 0x464   : > { %1526 = vmatpush1.bf16.msra.mxu0 %v2858_v19  ;;  %v2884_v19 = vld [vmem:[#allocation18 + $0x30] ss:$12 sps:$4 sm:$0xff]  }
 0x465   : > { %2615 = vmatprep.subr.bf16.mxu0 %v3416_v18 }
 0x467   : > { %2504 = vmatmul.mubr.msk.bf16.vlgmr.msra.gmra.mrb[12].mxu0 %vm1084_vm0, %v3976_v22  ;;  %v2889_v22 = vld [vmem:[#allocation18 + $0x4c] ss:$12 sps:$4 sm:$0xff]  }
 0x468   : > { %2617 = vmatprep.mubr.msk.bf16.mxu0 %vm3417_vm2, %v3416_v18 }
 0x46d   : > { %2616 = vmatpush3.bf16.xpose.msra.mxu0 %v1571_v24  ;;  %v2887_v24 = vld [vmem:[#allocation18 + $0x48] ss:$12 sps:$4 sm:$0xff]  }
 0x46e   : > { %2621 = vmatprep.subr.bf16.mxu0 %v3416_v18 }
 0x52e   : > { %v1331_v26 = vpop.f32.mrb[8].mxu0 }
 0x52f   : > { %v1337_v27 = vpack.c.bf16 %v1331_v26, %v1331_v26  ;;  %v2593_v28 = vpop.f32.mrb[9].mxu0  ;;  %v2890_v26 = vld [vmem:[#allocation18 + $0x60] ss:$12 sps:$4 sm:$0xff]  }
 0x530   : > { %v1334_v29 = vpop.f32.mrb[10].mxu0 }
 0x531   : > { %v2594_v30 = vpop.f32.mrb[11].mxu0  ;;  %2612 = vmatmul.mubr.bf16.vlgmr.msra.gmra.mrb[8].mxu1 %v1337_v27  ;;  %v1819_v27 = vpop.permute.xlu0 %1818  ;;  %v2893_v29 = vld [vmem:[#allocation18 + $0x8] ss:$12 sps:$4 sm:$0xff]  }
 0x532   : > { %1974 = vmatprep.mubr.bf16.mxu1 %v3415_v0  ;;  %v2487_v0 = vld [vmem:[%s4353_s11] ss:$0 sm:$0xff]  ;;  %1943 = vmatpush1.bf16.msra.mxu1 %v2878_v12  ;;  %v1821_v28 = vsel %vm991_vm1, %v3920_v17, %v1819_v27  ;;  %v2897_v17 = vld [vmem:[#allocation18 + $0x68] ss:$12 sps:$4 sm:$0xff]  }
 0x533   : > { %1944 = vmatprep.subr.bf16.mxu1 %v2883_v14  ;;  %v2894_v30 = vld [vmem:[#allocation18 + $0x20] ss:$12 sps:$4 sm:$0xff]  }
 0x534   : > { %v2496_v12 = vld [vmem:[%s4357_s24] ss:$0 sm:$0xff]  ;;  %s4289_s24 = scalar_lea.sflag [#allocation21], %s3887_s28 }
 0x535   : > { %v2497_v14 = vld [vmem:[%s4358_s22] ss:$0 sm:$0xff]  ;;  %s3180_s22 = sshll.u32 %s3419_s10, 4  ;;  %s3181_s22 = int_to_ptr.vmem [resolvable:$false] %s3180_s22 }
 0x536   : > { %1945 = vmatpush1.bf16.msra.mxu1 %v2881_v15  ;;  %p3183_p11 = scmp.lt.s32.totalorder %s2096_s16, %s3181_s22 }
 0x537   : > { %1946 = vmatprep.subr.bf16.mxu1 %v2886_v16 }
 0x53a   : > { %v1555_v32 = vpop.f32.mrb[12].mxu0  ;;  %1947 = vmatpush1.bf16.msra.mxu1 %v2884_v19 }
 0x53b   : > { %v1569_v33 = vadd.f32 %v2505_v31, %v1555_v32  ;;  %v3988_v34 = vpop.f32.mrb[13].mxu0  ;;  %1948 = vmatprep.subr.bf16.mxu1 %v2889_v22  ;;  %v2895_v31 = vld [vmem:[#allocation18 + $0x38] ss:$12 sps:$4 sm:$0xff]   ;;  %v2896_v32 = vld [vmem:[#allocation18 + $0x50] ss:$12 sps:$4 sm:$0xff]  }
 0x53c   : > { %v1559_v35 = vpop.f32.mrb[14].mxu0 }
 0x53d   : > { %v1570_v37 = vpack.c.bf16 %v1569_v33, %v1569_v33  ;;  %v1560_v38 = vpop.f32.mrb[15].mxu0  ;;  %v2507_v35 = vld [vmem:[%s4354_s13] ss:$0 sm:$0xff] }
 0x53e   : > { %1949 = vmatpush1.bf16.msra.mxu1 %v2887_v24 }
 0x53f   : > { %2618 = vmatmul.mubr.bf16.vlgmr.msra.gmra.mrb[16].mxu0 %v1570_v37  ;;  %1950 = vmatprep.subr.bf16.mxu1 %v2892_v25 }
 0x540   : > { %2622 = vmatpush3.bf16.msra.mxu0 %v1630_v39  ;;  %2623 = vmatprep.mubr.msk.bf16.mxu0 %vm3417_vm2, %v3416_v18 }
 0x541   : > { %2627 = vmatprep.subr.bf16.mxu0 %v3416_v18 }
 0x542   : > { %1951 = vmatpush1.bf16.msra.mxu1 %v2890_v26 }
 0x543   : > { %2647 = vmatprep.subr.bf16.mxu1 %v3416_v18 }
 0x545   : > { %2534 = vmatmul.mubr.msk.bf16.vlgmr.msra.gmra.mrb[12].mxu1 %vm1939_vm5, %v1821_v28 }
 0x546   : > { %2648 = vmatpush3.bf16.msra.mxu1 %v2893_v29  ;;  %2657 = vmatprep.mubr.msk.bf16.mxu1 %vm3417_vm2, %v3416_v18 }
 0x547   : > { %2649 = vmatprep.subr.bf16.mxu1 %v3416_v18 }
 0x54a   : > { %2650 = vmatpush3.bf16.msra.mxu1 %v2894_v30 }
 0x54b   : > { %2651 = vmatprep.subr.bf16.mxu1 %v3416_v18 }
 0x54e   : > { %2652 = vmatpush3.bf16.msra.mxu1 %v2895_v31 }
 0x54f   : > { %2653 = vmatprep.subr.bf16.mxu1 %v3416_v18 }
 0x552   : > { %2654 = vmatpush3.bf16.msra.mxu1 %v2896_v32 }
 0x553   : > { %2655 = vmatprep.subr.bf16.mxu1 %v3416_v18 }
 0x556   : > { %2656 = vmatpush3.bf16.msra.mxu1 %v2897_v17 }
 0x559   : > { %2658 = vmatmul.mubr.msk.bf16.vlgmr.msra.gmra.mrb[16].mxu1 %vm1939_vm5, %v1821_v28 }
 0x604   : > { %v1443_v40 = vpop.f32.mrb[8].mxu1 }
 0x605   : > { %v1444_v41 = vadd.f32 %v2487_v0, %v1443_v40  ;;  %v2613_v42 = vpop.f32.mrb[9].mxu1 }
 0x606   : > { %v1446_v43 = vpop.f32.mrb[10].mxu1 }
 0x607   : > { %v2614_v45 = vpop.f32.mrb[11].mxu1  ;;  %v3998_v46 = vadd.f32 %v1444_v41, %v3948_v44  ;;  %v1842_v43 = vld [vmem:[%s4355_s19] sm:$0x7] }
 0x608   : > { %v1847_v45 = vrot.slane %v1842_v43, %v3933_v21 }
 0x612   : > { %v1607_v47 = vpop.f32.mrb[16].mxu0 }
 0x613   : > { %v1613_v48 = vmul.f32 0.088388346, %v1607_v47  ;;  %v2619_v49 = vpop.f32.mrb[17].mxu0 }
 0x614   : > { %v1610_v50 = vpop.f32.mrb[18].mxu0 }
 0x615   : > { %v2620_v51 = vpop.f32.mrb[19].mxu0  ;;  %v1614_v52 = vsel %vm1277_vm4, %v1613_v48, -inf }
 0x616   : > { %1615 = vmax.xlane.f32.xlu1 %v1614_v52 }
 0x618   : > { %v1976_v47 = vpop.f32.mrb[12].mxu1 }
 0x619   : > { %v1978_v49 = vpop.f32.mrb[13].mxu1 }
 0x61a   : > { %v1980_v50 = vpop.f32.mrb[14].mxu1 }
 0x61b   : > { %v1981_v52 = vpop.f32.mrb[15].mxu1 }
 0x62c   : > { %v2017_v21 = vpop.f32.mrb[16].mxu1 }
 0x6a3   : > { %v1616_v53 = vpop.xlane.xlu1 %1615 }
 0x6a4   : > { %v1617_v54 = vsub.f32 %v1613_v48, %v1616_v53  ;;  %v1977_v48 = vadd.f32 %v1976_v47, %v1847_v45 }
 0x6a6   : > { %v1618_v55 = vmul.f32 1.442695, %v1617_v54  ;;  %v2024_v51 = vmul.f32 0.70710677, %v1977_v48  ;;  %v1851_v54 = vrot.slane %v1842_v43, %v3939_v23 }
 0x6a8   : > { %2902 = vpow2.f32 %v1618_v55 }
 0x6b2   : > { %v2903_v56 = vpop.eup %2902 }
 0x6b3   : > { %v1620_v57 = vsel %vm1277_vm4, %v2903_v56, 0.0 }
 0x6b4   : > { %1621 = vadd.xlane.f32.xlu1 %v1620_v57 }
 0x6b8   : > { %1452 = vadd.xlane.f32.xlu1 %v3998_v46 }
 0x741   : > { %v1622_v44 = vpop.xlane.xlu1 %1621 }
 0x742   : > { %2904 = vrcp.f32 %v1622_v44  ;;  %v1979_v44 = vadd.f32 %v1978_v49, %v1851_v54 }
 0x743   : > { %2906 = verf.f32 %v2024_v51 }
 0x745   : > { %v1453_v33 = vpop.xlane.xlu1 %1452 }
 0x746   : > { %v1455_v36 = vmul.f32 0.0078125, %v1453_v33 }
 0x748   : > { %v1456_v40 = vsub.f32 %v3998_v46, %v1455_v36  ;;  %v1854_v46 = vsub.s32 2, %v3930_v20 }
 0x74c   : > { %v2905_v58 = vpop.eup %2904 }
 0x74d   : > { %v1624_v59 = vmul.f32 %v2905_v58, %v2903_v56  ;;  %v2907_v53 = vpop.eup %2906  ;;  %v1855_v56 = vrot.slane %v1842_v43, %v1854_v46 }
 0x74e   : > { %v2026_v55 = vadd.f32 1.0, %v2907_v53 }
 0x74f   : > { %v1625_v61 = vpack.c.bf16 %v1624_v59, %v1624_v59  ;;  %1814 = vst.msk [vmem:[%s4286_s0] sm:$0xff] %vm1277_vm4, %v1624_v59  ;;  %v2018_v59 = vadd.f32 %v2017_v21, %v1855_v56  ;;  %s3182_s0 = scalar_lea.vmem %s3181_s22, 256 }
 0x750   : > { %p3184_p6 = scmp.lt.s32.totalorder %s3182_s0, %s3176_s25 }
 0x751   : > { %2624 = vmatmul.mubr.msk.bf16.vlgmr.msra.gmra.mrb[20].mxu0 %vm1277_vm4, %v1625_v61 }
 0x752   : > { %2628 = vmatpush3.bf16.msra.mxu0 %v2869_v60  ;;  %2643 = vmatprep.mubr.msk.bf16.mxu0 %vm3417_vm2, %v3416_v18  ;;  %v2659_v60 = vpop.f32.mrb[17].mxu1  ;;  %p3185_p10 = por %p3184_p6, %p3183_p11 }
 0x753   : > { %2629 = vmatprep.subr.bf16.mxu0 %v3416_v18  ;;  %v2020_v61 = vpop.f32.mrb[18].mxu1 }
 0x754   : > { %v2660_v20 = vpop.f32.mrb[19].mxu1  ;;  %p3186_p1 = pnand %p3185_p10, %p3179_p4 }
 0x756   : > { %2630 = vmatpush3.bf16.msra.mxu0 %v2870_v62  ;;  %v2536_v62 = vmul.f32 -1.442695, %v1979_v44 }
 0x757   : > { %2631 = vmatprep.subr.bf16.mxu0 %v3416_v18 }
 0x758   : > { %2908 = vpow2.f32 %v2536_v62 }
 0x75a   : > { %2632 = vmatpush3.bf16.msra.mxu0 %v2871_v63  ;;  %v2537_v63 = vmul.f32 -1.442695, %v2018_v59 }
 0x75b   : > { %2633 = vmatprep.subr.bf16.mxu0 %v3416_v18 }
 0x75c   : > { %2910 = vpow2.f32 %v2537_v63 }
 0x75e   : > { %2634 = vmatpush3.bf16.msra.mxu0 %v2872_v1 }
 0x75f   : > { %2635 = vmatprep.subr.bf16.mxu0 %v3416_v18 }
 0x762   : > { %2636 = vmatpush3.bf16.msra.mxu0 %v2873_v2 }
 0x763   : > { %2637 = vmatprep.subr.bf16.mxu0 %v3416_v18 }
 0x766   : > { %2638 = vmatpush3.bf16.msra.mxu0 %v2874_v3 }
 0x767   : > { %2639 = vmatprep.subr.bf16.mxu0 %v3416_v18 }
 0x76a   : > { %2640 = vmatpush3.bf16.msra.mxu0 %v2875_v4  ;;  %v2909_v4 = vpop.eup %2908 }
 0x76b   : > { %2641 = vmatprep.subr.bf16.mxu0 %v3416_v18  ;;  %v1457_v18 = vmul.f32 %v1456_v40, %v1456_v40 }
 0x76e   : > { %2642 = vmatpush3.bf16.msra.mxu0 %v2876_v5 }
 0x824   : > { %v1666_v7 = vpop.f32.mrb[20].mxu0 }
 0x825   : > { %v1672_v8 = vpack.c.bf16 %v1666_v7, %v1666_v7  ;;  %v2625_v9 = vpop.f32.mrb[21].mxu0  ;;  %v2911_v7 = vpop.eup %2910 }
 0x826   : > { %v1669_v10 = vpop.f32.mrb[22].mxu0  ;;  %v2033_v9 = vadd.f32 1.0, %v2909_v4 }
 0x827   : > { %v2626_v11 = vpop.f32.mrb[23].mxu0  ;;  %2644 = vmatmul.mubr.bf16.vlgmr.msra.gmra.mrb[24].mxu0 %v1672_v8  ;;  %v2040_v10 = vadd.f32 1.0, %v2911_v7 }
 0x8fa   : > { %v1778_v37 = vpop.f32.mrb[24].mxu0 }
 0x8fb   : > { %v1779_v38 = vadd.f32 %v2507_v35, %v1778_v37  ;;  %v2645_v39 = vpop.f32.mrb[25].mxu0 }
 0x8fc   : > { %v1781_v0 = vpop.f32.mrb[26].mxu0 }
 0x8fd   : > { %v2646_v41 = vpop.f32.mrb[27].mxu0  ;;  %v1784_v42 = vadd.f32 %v1779_v38, %v3988_v34  ;;  %v2023_v34 = vmul.f32 0.5, %v1977_v48 }
 0x8ff   : > { %1787 = vadd.xlane.f32.xlu1 %v1784_v42  ;;  %v2027_v57 = vmul.f32 %v2026_v55, %v2023_v34 }
 0x901   : > { %v2028_v58 = vpack.c.bf16 %v2027_v57, %v2027_v57 }
 0x903   : > { %1458 = vadd.xlane.f32.xlu1 %v1457_v18  ;;  %2029 = vst [vmem:[%s4042_s21 + $0x8] sm:$0xf] %v2028_v58 }
 0x98c   : > { %v1788_v23 = vpop.xlane.xlu1 %1787 }
 0x98d   : > { %v1789_v1 = vmul.f32 0.0078125, %v1788_v23 }
 0x98f   : > { %v4045_v2 = vsub.f32 %v1784_v42, %v1789_v1 }
 0x990   : > { %v1459_v3 = vpop.xlane.xlu1 %1458 }
 0x991   : > { %v1460_v5 = vmul.f32 0.0078125, %v1459_v3  ;;  %v1791_v6 = vmul.f32 %v4045_v2, %v4045_v2 }
 0x993   : > { %v1461_v8 = vadd.f32 1e-05, %v1460_v5  ;;  %1792 = vadd.xlane.f32.xlu1 %v1791_v6 }
 0x995   : > { %2912 = vrsqrt.f32 %v1461_v8 }
 0x996   : > { %2914 = vrcp.f32 %v2033_v9 }
 0x997   : > { %2916 = vrcp.f32 %v2040_v10 }
 0x99f   : > { %v2913_v11 = vpop.eup %2912 }
 0x9a0   : > { %v1463_v13 = vmul.f32 %v2913_v11, %v1456_v40  ;;  %v2915_v15 = vpop.eup %2914 }
 0x9a1   : > { %v2917_v19 = vpop.eup %2916  ;;  %2036 = vst [vmem:[%s926_s29] sm:$0xff] %v2915_v15 }
 0x9a2   : > { %v1470_v16 = vmul.f32 %v2496_v12, %v1463_v13  ;;  %2043 = vst [vmem:[%s4287_s15] sm:$0xff] %v2917_v19 }
 0x9a4   : > { %v1477_v22 = vadd.f32 %v2497_v14, %v1470_v16 }
 0x9a6   : > { %v1478_v24 = vpack.c.bf16 %v1477_v22, %v1477_v22 }
 0x9a8   : > { %1479 = vst [vmem:[%s4042_s21] sm:$0xf] %v1478_v24 }
 0x9a9   : > { %3189 = shalt.err (!%p3186_p1)
}
 0x9aa   : > { %s3190_s29 = scalar_lea.hbm %s4067_s18, 128  ;;  %s3194_s10 = scalar_lea.hbm %s4359_s8, 256 }
 0x9ab   : > { %p3191_p9 = scmp.ne.s32.totalorder %s4067_s18, %s3190_s29  ;;  %p3195_p12 = scmp.lt.u32.totalorder %s4067_s18, %s4359_s8 }
 0x9ac   : > { %p3196_p13 = scmp.lt.u32.totalorder %s3194_s10, %s3190_s29  ;;  %p3198_p7 = scmp.lt.u32.totalorder %s3190_s29, %s4067_s18 }
 0x9ad   : > { %p3192_p8 = pnand %p3191_p9, %p4360_p5 }
 0x9ae   : > { %p3197_p0 = por %p3196_p13, %p3195_p12 }
 0x9af   : > { %p3193_p3 = pneg %p3192_p8 }
 0x9b0   : > { %p3199_p2 = por %p3198_p7, %p3197_p0 }
 0x9b2   : > { %p3200_p4 = pnand %p3199_p2, %p3193_p3 }
 0x9b4   : > { %3203 = shalt.err (!%p3200_p4)
}
 0x9b5   : > { %2696 = dma.vmem_to_hbm [thread:$0]  (%p4360_p5), %s2096_s16, 128, %s4067_s18, %s4289_s24  }
 0x9b6   : > { %s4361_s15 = sld [smem:[#allocation61_spill]]  ;;  %s2123_s29 = sshll.u32 %s940_s1, 4  ;;  %s2124_s29 = int_to_ptr.vmem [resolvable:$true] %s2123_s29 }
 0x9b7   : > { %s2060_s19 = scalar_lea.sflag [#allocation24], %s3887_s28  ;;  %s3204_s10 = scalar_lea.vmem %s2124_s29, 128 }
 0x9b8   : > { %p3205_p11 = scmp.ne.s32.totalorder %s2124_s29, %s3204_s10  ;;  %s3420_s22 = smov [#allocation23]  }
 0x9b9   : > { %s3208_s8 = sshll.u32 %s3420_s22, 4  ;;  %s3209_s8 = int_to_ptr.vmem [resolvable:$false] %s3208_s8 }
 0x9ba   : > { %p3206_p6 = pnand %p3205_p11, %p4360_p5  ;;  %s3210_s9 = scalar_lea.vmem %s3209_s8, 256 }
 0x9bb   : > { %p3211_p1 = scmp.lt.s32.totalorder %s2124_s29, %s3209_s8  ;;  %p3212_p9 = scmp.lt.s32.totalorder %s3210_s9, %s3204_s10 }
 0x9bc   : > { %s4093_s3 = scalar_lea.hbm %s4361_s15, %s4061_s12  ;;  %p3207_p10 = pneg %p3206_p6 }
 0x9bd   : > { %p3213_p8 = por %p3212_p9, %p3211_p1 }
 0x9bf   : > { %p3214_p3 = pnand %p3213_p8, %p3207_p10 }
 0x9c1   : > { %3217 = shalt.err (!%p3214_p3)
}
 0x9c2   : > { %s3218_s1 = scalar_lea.hbm %s4093_s3, 128  ;;  %s3222_s0 = scalar_lea.hbm %s4361_s15, 256 }
 0x9c3   : > { %p3219_p12 = scmp.ne.s32.totalorder %s4093_s3, %s3218_s1  ;;  %p3223_p7 = scmp.lt.u32.totalorder %s4093_s3, %s4361_s15 }
 0x9c4   : > { %p3224_p2 = scmp.lt.u32.totalorder %s3222_s0, %s3218_s1  ;;  %p3226_p11 = scmp.lt.u32.totalorder %s3218_s1, %s4093_s3 }
 0x9c5   : > { %p3220_p13 = pnand %p3219_p12, %p4360_p5 }
 0x9c6   : > { %p3225_p4 = por %p3224_p2, %p3223_p7 }
 0x9c7   : > { %p3221_p0 = pneg %p3220_p13 }
 0x9c8   : > { %p3227_p6 = por %p3226_p11, %p3225_p4 }
 0x9ca   : > { %p3228_p10 = pnand %p3227_p6, %p3221_p0 }
 0x9cc   : > { %3231 = shalt.err (!%p3228_p10)
}
 0x9cd   : > { %2698 = dma.vmem_to_hbm [thread:$0]  (%p4360_p5), %s2124_s29, 128, %s4093_s3, %s2060_s19  }
 0x9ce   : > { %s4362_s22 = sld [smem:[#allocation60_spill]]  ;;  %s4363_s16 = scalar_lea.vmem [#allocation22], %s3967_s20 }
 0x9cf   : > { %s2109_s1 = sshll.u32 %s4363_s16, 4  ;;  %s4364_s8 = sld [smem:[#allocation62_spill]]  ;;  %s2110_s1 = int_to_ptr.vmem [resolvable:$true] %s2109_s1 }
 0x9d0   : > { %s3232_s11 = scalar_lea.vmem %s2110_s1, 128  ;;  %s3421_s13 = smov [#allocation22]  }
 0x9d1   : > { %p3233_p1 = scmp.ne.s32.totalorder %s2110_s1, %s3232_s11  ;;  %s3236_s3 = sshll.u32 %s3421_s13, 4  ;;  %s3237_s3 = int_to_ptr.vmem [resolvable:$false] %s3236_s3 }
 0x9d2   : > { %s3238_s29 = scalar_lea.vmem %s3237_s3, 256  ;;  %p3239_p3 = scmp.lt.s32.totalorder %s2110_s1, %s3237_s3 }
 0x9d3   : > { %p3234_p9 = pnand %p3233_p1, %p4360_p5  ;;  %p3240_p12 = scmp.lt.s32.totalorder %s3238_s29, %s3232_s11 }
 0x9d4   : > { %s4121_s18 = scalar_lea.hbm %s4362_s22, %s4061_s12 }
 0x9d5   : > { %s4129_s24 = scalar_lea.hbm %s4364_s8, %s4061_s12  ;;  %p3235_p8 = pneg %p3234_p9 }
 0x9d6   : > { %p3241_p13 = por %p3240_p12, %p3239_p3 }
 0x9d8   : > { %p3242_p0 = pnand %p3241_p13, %p3235_p8 }
 0x9da   : > { %3245 = shalt.err (!%p3242_p0)
}
 0x9db   : > { %s3246_s12 = scalar_lea.hbm %s4121_s18, 128  ;;  %s3250_s13 = scalar_lea.hbm %s4362_s22, 256 }
 0x9dc   : > { %p3247_p7 = scmp.ne.s32.totalorder %s4121_s18, %s3246_s12  ;;  %p3251_p11 = scmp.lt.u32.totalorder %s4121_s18, %s4362_s22 }
 0x9dd   : > { %p3252_p6 = scmp.lt.u32.totalorder %s3250_s13, %s3246_s12  ;;  %p3254_p1 = scmp.lt.u32.totalorder %s3246_s12, %s4121_s18 }
 0x9de   : > { %p3248_p2 = pnand %p3247_p7, %p4360_p5 }
 0x9df   : > { %p3253_p10 = por %p3252_p6, %p3251_p11 }
 0x9e0   : > { %p3249_p4 = pneg %p3248_p2 }
 0x9e1   : > { %p3255_p9 = por %p3254_p1, %p3253_p10 }
 0x9e3   : > { %p3256_p8 = pnand %p3255_p9, %p3249_p4 }
 0x9e5   : > { %3259 = shalt.err (!%p3256_p8)
}
 0x9e6   : > { %s4365_s11 = scalar_lea.sflag [#allocation21], %s3887_s28  ;;  %s4366_s25 = scalar_lea.vmem [#allocation25], %s3967_s20 }
 0x9e7   : > { %2697 = dma.vmem_to_hbm [thread:$0]  (%p4360_p5), %s2110_s1, 128, %s4121_s18, %s4365_s11  }
 0x9e8   : > { %s2137_s3 = sshll.u32 %s4366_s25, 4  ;;  %s3422_s12 = smov [#allocation25]   ;;  %s2138_s3 = int_to_ptr.vmem [resolvable:$true] %s2137_s3 }
 0x9e9   : > { %s3260_s29 = scalar_lea.vmem %s2138_s3, 128  ;;  %s3264_s9 = sshll.u32 %s3422_s12, 4  ;;  %s3265_s9 = int_to_ptr.vmem [resolvable:$false] %s3264_s9 }
 0x9ea   : > { %p3261_p3 = scmp.ne.s32.totalorder %s2138_s3, %s3260_s29  ;;  %s3266_s10 = scalar_lea.vmem %s3265_s9, 256 }
 0x9eb   : > { %p3267_p0 = scmp.lt.s32.totalorder %s2138_s3, %s3265_s9  ;;  %p3268_p7 = scmp.lt.s32.totalorder %s3266_s10, %s3260_s29 }
 0x9ec   : > { %p3262_p12 = pnand %p3261_p3, %p4360_p5 }
 0x9ed   : > { %p3269_p2 = por %p3268_p7, %p3267_p0 }
 0x9ee   : > { %p3263_p13 = pneg %p3262_p12 }
 0x9f0   : > { %p3270_p4 = pnand %p3269_p2, %p3263_p13 }
 0x9f2   : > { %3273 = shalt.err (!%p3270_p4)
}
 0x9f3   : > { %s3274_s20 = scalar_lea.hbm %s4129_s24, 128  ;;  %s3278_s13 = scalar_lea.hbm %s4364_s8, 256 }
 0x9f4   : > { %p3275_p11 = scmp.ne.s32.totalorder %s4129_s24, %s3274_s20  ;;  %p3279_p1 = scmp.lt.u32.totalorder %s4129_s24, %s4364_s8 }
 0x9f5   : > { %p3280_p9 = scmp.lt.u32.totalorder %s3278_s13, %s3274_s20  ;;  %p3282_p3 = scmp.lt.u32.totalorder %s3274_s20, %s4129_s24 }
 0x9f6   : > { %p3276_p6 = pnand %p3275_p11, %p4360_p5 }
 0x9f7   : > { %p3281_p8 = por %p3280_p9, %p3279_p1 }
 0x9f8   : > { %p3277_p10 = pneg %p3276_p6 }
 0x9f9   : > { %p3283_p12 = por %p3282_p3, %p3281_p8 }
 0x9fb   : > { %p3284_p13 = pnand %p3283_p12, %p3277_p10 }
 0x9fd   : > { %3287 = shalt.err (!%p3284_p13)
}
 0x9fe   : > { %2699 = dma.vmem_to_hbm [thread:$0]  (%p4360_p5), %s2138_s3, 128, %s4129_s24, %s2060_s19  }
 0x9ff   : > { %s4367_s29 = sld [smem:[#allocation56_spill]]  ;;  %s4368_s9 = sld [smem:[#allocation57_spill]] }
 0xa00   : > { %s2662_s24 = smul.u32 192, %s4356_s6  ;;  %s2081_s19 = sshll.u32 %s4042_s21, 4  ;;  %s4185_s19 = int_to_ptr.vmem [resolvable:$true] %s2081_s19 }
 0xa01   : > { %s4369_s20 = sld [smem:[#allocation58_spill]]  ;;  %s2045_s1 = scalar_lea.sflag [#allocation6], %s3876_s4 }
 0xa02   : > { %s3288_s13 = scalar_lea.vmem %s4185_s19, 192  ;;  %s3423_s6 = smov [#allocation19]  }
 0xa03   : > { %p3289_p0 = scmp.ne.s32.totalorder %s4185_s19, %s3288_s13  ;;  %s3292_s16 = sshll.u32 %s3423_s6, 4  ;;  %s3293_s16 = int_to_ptr.vmem [resolvable:$false] %s3292_s16 }
 0xa04   : > { %s3294_s0 = scalar_lea.vmem %s3293_s16, 384  ;;  %p3295_p4 = scmp.lt.s32.totalorder %s4185_s19, %s3293_s16 }
 0xa05   : > { %v2516_v29 = vld [vmem:[%s4367_s29] ss:$0 sm:$0xff]  ;;  %p3290_p7 = pnand %p3289_p0, %p4360_p5  ;;  %p3296_p11 = scmp.lt.s32.totalorder %s3294_s0, %s3288_s13 }
 0xa06   : > { %v2517_v31 = vld [vmem:[%s4368_s9] ss:$0 sm:$0xff] }
 0xa07   : > { %s4183_s18 = scalar_lea.hbm %s4369_s20, %s2662_s24  ;;  %p3291_p2 = pneg %p3290_p7 }
 0xa08   : > { %p3297_p6 = por %p3296_p11, %p3295_p4 }
 0xa0a   : > { %p3298_p10 = pnand %p3297_p6, %p3291_p2 }
 0xa20   : > { %v1793_v25 = vpop.xlane.xlu1 %1792 }
 0xa21   : > { %v1794_v26 = vmul.f32 0.0078125, %v1793_v25 }
 0xa23   : > { %v1795_v27 = vadd.f32 1e-05, %v1794_v26 }
 0xa25   : > { %2918 = vrsqrt.f32 %v1795_v27 }
 0xa2f   : > { %v2919_v28 = vpop.eup %2918 }
 0xa30   : > { %v1797_v30 = vmul.f32 %v2919_v28, %v4045_v2 }
 0xa32   : > { %v1804_v32 = vmul.f32 %v2516_v29, %v1797_v30 }
 0xa34   : > { %v1811_v17 = vadd.f32 %v2517_v31, %v1804_v32 }
 0xa36   : > { %v1812_v33 = vpack.c.bf16 %v1811_v17, %v1811_v17 }
 0xa38   : > { %1813 = vst [vmem:[%s4042_s21 + $0x4] sm:$0xf] %v1812_v33 }
 0xa39   : > { %3301 = shalt.err (!%p3298_p10)
}
 0xa3a   : > { %s3302_s4 = scalar_lea.hbm %s4183_s18, 192  ;;  %s3306_s25 = scalar_lea.hbm %s4369_s20, 384 }
 0xa3b   : > { %p3303_p1 = scmp.ne.s32.totalorder %s4183_s18, %s3302_s4  ;;  %p3307_p3 = scmp.lt.u32.totalorder %s4183_s18, %s4369_s20 }
 0xa3c   : > { %p3308_p12 = scmp.lt.u32.totalorder %s3306_s25, %s3302_s4  ;;  %p3310_p0 = scmp.lt.u32.totalorder %s3302_s4, %s4183_s18 }
 0xa3d   : > { %p3304_p9 = pnand %p3303_p1, %p4360_p5 }
 0xa3e   : > { %p3309_p13 = por %p3308_p12, %p3307_p3 }
 0xa3f   : > { %p3305_p8 = pneg %p3304_p9 }
 0xa40   : > { %p3311_p7 = por %p3310_p0, %p3309_p13 }
 0xa42   : > { %p3312_p2 = pnand %p3311_p7, %p3305_p8 }
 0xa44   : > { %3315 = shalt.err (!%p3312_p2)
}
 0xa45   : > { %2695 = dma.vmem_to_hbm [thread:$0]  (%p4360_p5), %s4185_s19, 192, %s4183_s18, %s2045_s1  }
 0xa46 PF: > { %s2149_s28 = sand.u32 1, %s3378_s5   ;;  %p4370_p4 = scmp.ne.s32.totalorder %s4335_s30, 0 }
 0xa47   : > { %p4371_p11 = scmp.ge.s32.totalorder %s3398_s2, 2  ;;  %s2150_s9 = scalar_lea.sflag [#allocation6], %s2149_s28 }
 0xa49   : > { %p2735_p6 = pnand %p4371_p11, %p4370_p4 }
 0xa4b   : > { %3365 = dma.done.wait (!%p2735_p6), %s2150_s9, 192  }
 0xa4c   : > { %3367 = vsyncadd (!%p2735_p6), %s2150_s9, 4294967104  ;;  %s4372_s24 = sadd.s32 4294967294, %s3398_s2  }
 0xa4d   : > { %s2158_s3 = sand.u32 1, %s4372_s24  }
 0xa4e   : > { %s2159_s10 = scalar_lea.sflag [#allocation21], %s2158_s3 }
 0xa4f   : > { %3369 = dma.done.wait (!%p2735_p6), %s2159_s10, 256  }
 0xa50   : > { %3371 = vsyncadd (!%p2735_p6), %s2159_s10, 4294967040  ;;  %s2177_s17 = scalar_lea.sflag [#allocation24], %s2158_s3 }
 0xa51   : > { %3373 = dma.done.wait (!%p2735_p6), %s2177_s17, 256  }
 0xa52   : > { %3375 = vsyncadd (!%p2735_p6), %s2177_s17, 4294967040  ;;  %s53_s2 = sadd.s32 1, %s3398_s2   ;;  %s4373_s28 = sld [smem:[#allocation36_spill]] }
 0xa53   : > { %p50_p5 = scmp.ge.s32.totalorder %s53_s2, 4   ;;  %s4374_s6 = sld [smem:[#allocation37_spill]] }
 0xa54   : > { %s4375_s5 = smov %s3382_s26  ;;  %s4376_s26 = smov %s3386_s27 }
 0xa55   : > { %s4377_s27 = smov %s3796_s7  ;;  %52 = sbr.rel (!%p50_p5) target bundleno = 41 (0x29), region = 256 }
 0xa5c   :  { %2191 = vsyncpa [#allocation5], 1 }
 0xa5d   :  { %2193 = vsyncpa [#allocation5 + $0x1], 1 }
 0xa5e   :  { %2194 = vsyncpa [#allocation8], 1 }
 0xa5f   :  { %2196 = vsyncpa [#allocation8 + $0x1], 1 }
 0xa60   :  { %2197 = vsyncpa [#allocation11], 1 }
 0xa61   :  { %2198 = vsyncpa [#allocation14], 1 }
 0xa62   :  { %2199 = vsyncpa [#allocation17], 1 }
 0xa63   :  { %2200 = vsyncpa [#allocation6], 1 }
 0xa64   :  { %2202 = vsyncpa [#allocation6 + $0x1], 1 }
 0xa65   :  { %2203 = vsyncpa [#allocation21], 1 }
 0xa66   :  { %2205 = vsyncpa [#allocation21 + $0x1], 1 }
 0xa67   :  { %2206 = vsyncpa [#allocation24], 1 }
 0xa68   :  { %2208 = vsyncpa [#allocation24 + $0x1], 1 }

// kernel: tpu_custom_call.1
= control target key start
LH: loop header
LB: loop body
LE: loop exit
PB: predicated region body
PF: predicated region fallthrough
CT: control target
= control target key end

     0   :  { %s4235_s0 = inlined_call_operand.hbm [shape: bf16[2,8,32], index: 0, kind: input, shape index: {}]   ;;  %s4236_s1 = inlined_call_operand.hbm [shape: bf16[2,8,48], index: 1, kind: input, shape index: {}]   ;;  %s4237_s2 = inlined_call_operand.hbm [shape: bf16[32,256], index: 2, kind: input, shape index: {}]   ;;  %s4238_s3 = inlined_call_operand.vmem [shape: f32[1,128], index: 3, kind: input, shape index: {}]   ;;  %s4239_s4 = inlined_call_operand.hbm [shape: bf16[32,256], index: 4, kind: input, shape index: {}]   ;;  %s4240_s5 = inlined_call_operand.vmem [shape: f32[1,256], index: 5, kind: input, shape index: {}]   ;;  %s4241_s6 = inlined_call_operand.hbm [shape: bf16[48,256], index: 6, kind: input, shape index: {}]   ;;  %s4242_s7 = inlined_call_operand.vmem [shape: f32[1,128], index: 7, kind: input, shape index: {}]   ;;  %s4243_s8 = inlined_call_operand.hbm [shape: bf16[48,256], index: 8, kind: input, shape index: {}]   ;;  %s4244_s9 = inlined_call_operand.vmem [shape: f32[1,256], index: 9, kind: input, shape index: {}]   ;;  %s4245_s10 = inlined_call_operand.hbm [shape: bf16[128,128], index: 10, kind: input, shape index: {}]   ;;  %s4246_s11 = inlined_call_operand.vmem [shape: f32[1,128], index: 11, kind: input, shape index: {}]   ;;  %s4247_s12 = inlined_call_operand.hbm [shape: bf16[128,128], index: 12, kind: input, shape index: {}]   ;;  %s4248_s13 = inlined_call_operand.vmem [shape: f32[1,128], index: 13, kind: input, shape index: {}]   ;;  %s4249_s14 = inlined_call_operand.hbm [shape: bf16[80,384], index: 14, kind: input, shape index: {}]   ;;  %s4250_s15 = inlined_call_operand.vmem [shape: f32[1,384], index: 15, kind: input, shape index: {}]   ;;  %s4251_s16 = inlined_call_operand.vmem [shape: f32[1,128], index: 16, kind: input, shape index: {}]   ;;  %s4252_s17 = inlined_call_operand.vmem [shape: f32[1,128], index: 17, kind: input, shape index: {}]   ;;  %s4253_s18 = inlined_call_operand.vmem [shape: f32[1,128], index: 18, kind: input, shape index: {}]   ;;  %s4254_s19 = inlined_call_operand.vmem [shape: f32[1,128], index: 19, kind: input, shape index: {}]   ;;  %s4255_s20 = inlined_call_operand.hbm [shape: bf16[2,8,384], index: 20, kind: output, shape index: {0}]   ;;  %s4256_s21 = inlined_call_operand.hbm [shape: f32[2,8,128], index: 21, kind: output, shape index: {1}]   ;;  %s4257_s22 = inlined_call_operand.hbm [shape: f32[2,8,128], index: 22, kind: output, shape index: {2}]   ;;  %s4258_s23 = inlined_call_operand.hbm [shape: f32[2,8,8], index: 23, kind: output, shape index: {3}]   ;;  %s4259_s24 = inlined_call_operand.hbm [shape: f32[2,8,8], index: 24, kind: output, shape index: {4}]  }
   0x1   :  { %4290 = sst [smem:[#allocation38_spill]] %s4235_s0 }
   0x2   :  { %4291 = sst [smem:[#allocation39_spill]] %s4236_s1 }
   0x3   :  { %4292 = sst [smem:[#allocation40_spill]] %s4237_s2 }
   0x4   :  { %4293 = sst [smem:[#allocation41_spill]] %s4238_s3 }
   0x5   :  { %4294 = sst [smem:[#allocation42_spill]] %s4239_s4 }
   0x6   :  { %4295 = sst [smem:[#allocation43_spill]] %s4240_s5 }
   0x7   :  { %4296 = sst [smem:[#allocation44_spill]] %s4241_s6 }
   0x8   :  { %4297 = sst [smem:[#allocation45_spill]] %s4242_s7 }
   0x9   :  { %4298 = sst [smem:[#allocation46_spill]] %s4243_s8 }
   0xa   :  { %4299 = sst [smem:[#allocation47_spill]] %s4244_s9 }
   0xb   :  { %4300 = sst [smem:[#allocation48_spill]] %s4245_s10 }
   0xc   :  { %4301 = sst [smem:[#allocation49_spill]] %s4246_s11 }
   0xd   :  { %4302 = sst [smem:[#allocation50_spill]] %s4247_s12 }
   0xe   :  { %4303 = sst [smem:[#allocation51_spill]] %s4248_s13 }
   0xf   :  { %4304 = sst [smem:[#allocation52_spill]] %s4249_s14 }
  0x10   :  { %4305 = sst [smem:[#allocation53_spill]] %s4250_s15 }
  0x11   :  { %4306 = sst [smem:[#allocation54_spill]] %s4251_s16 }
  0x12   :  { %4307 = sst [smem:[#allocation55_spill]] %s4252_s17 }
  0x13   :  { %4308 = sst [smem:[#allocation56_spill]] %s4253_s18 }
  0x14   :  { %4309 = sst [smem:[#allocation57_spill]] %s4254_s19 }
  0x15   :  { %4310 = sst [smem:[#allocation58_spill]] %s4255_s20 }
  0x16   :  { %4311 = sst [smem:[#allocation59_spill]] %s4256_s21 }
  0x17   :  { %4312 = sst [smem:[#allocation60_spill]] %s4257_s22 }
  0x18   :  { %4313 = sst [smem:[#allocation61_spill]] %s4258_s23 }
  0x19   :  { %4314 = sst [smem:[#allocation62_spill]] %s4259_s24 }
  0x1a   :  { %30 = vsyncpa [#allocation5], 0 }
  0x1b   :  { %32 = vsyncpa [#allocation5 + $0x1], 0 }
  0x1c   :  { %33 = vsyncpa [#allocation8], 0 }
  0x1d   :  { %35 = vsyncpa [#allocation8 + $0x1], 0 }
  0x1e   :  { %36 = vsyncpa [#allocation11], 0 }
  0x1f   :  { %37 = vsyncpa [#allocation14], 0 }
  0x20   :  { %38 = vsyncpa [#allocation17], 0 }
  0x21   :  { %39 = vsyncpa [#allocation6], 0 }
  0x22   :  { %41 = vsyncpa [#allocation6 + $0x1], 0 }
  0x23   :  { %42 = vsyncpa [#allocation21], 0 }
  0x24   :  { %44 = vsyncpa [#allocation21 + $0x1], 0 }
  0x25   :  { %45 = vsyncpa [#allocation24], 0 }
  0x26   :  { %47 = vsyncpa [#allocation24 + $0x1], 0  ;;  %s3549_s5 = smov 0   ;;  %s3551_s26 = smov 0  }
  0x27   :  { %s3553_s27 = smov 0   ;;  %s3555_s28 = smov 0  }
  0x28   :  { %s3557_s6 = smov 0   ;;  %s3559_s2 = smov 0  }
  0x29 LB: > { %4315 = sst [smem:[#allocation35_spill]] %s3390_s28  ;;  %s3580_s29 = sadd.s32 4294967295, %s3398_s2   ;;  %s3398_s2 = sphi %s3559_s2, %s53_s2   ;;  %s3394_s6 = sphi %s3557_s6, %s4374_s6   ;;  %s3390_s28 = sphi %s3555_s28, %s4373_s28   ;;  %s3386_s27 = sphi %s3553_s27, %s4377_s27   ;;  %s3382_s26 = sphi %s3551_s26, %s4376_s26   ;;  %s3378_s5 = sphi %s3549_s5, %s4375_s5  }
  0x2a   : > { %4316 = sst [smem:[#allocation36_spill]] %s3394_s6  ;;  %p2439_p0 = scmp.ge.s32.totalorder %s3398_s2, 1 }
  0x2b   : > { %p4272_p1 = scmp.eq.s32.totalorder %s3580_s29, 0  ;;  %p640_p2 = scmp.lt.s32.totalorder %s3398_s2, 3 }
  0x2c   : > { %s3400_s7 = smov [#allocation9]   ;;  %s3401_s25 = smov [#allocation10]  }
  0x2d   : > { %p3585_p3 = pnand %p2439_p0, %p640_p2  ;;  %s652_s30 = sshll.u32 %s3400_s7, 4  ;;  %s3589_s30 = int_to_ptr.vmem [resolvable:$true] %s652_s30 }
  0x2e   : > { %s668_s8 = sshll.u32 %s3401_s25, 4  ;;  %s3402_s4 = smov [#allocation13]   ;;  %s3600_s8 = int_to_ptr.vmem [resolvable:$true] %s668_s8 }
  0x2f   : > { %s4317_s0 = scalar_select %p3585_p3, 1, 0 }
  0x30   : > { %p2705_p4 = pneg %p3585_p3  ;;  %s3602_s1 = sshll.u32 %s3402_s4, 4  ;;  %s701_s1 = int_to_ptr.vmem [resolvable:$true] %s3602_s1 }
  0x31   : > { %s4319_s19 = sld [smem:[#allocation40_spill]] }
  0x32   : > { %p3596_p6 = pnand %p2705_p4, %p4272_p1 }
  0x34   : > { %p3612_p8 = pneg %p3596_p6 }
  0x37   : > { %s2920_s18 = scalar_lea.hbm %s4319_s19, 512 }
  0x38   : > { %p2921_p7 = scmp.ne.s32.totalorder %s4319_s19, %s2920_s18  ;;  %p2927_p11 = scmp.lt.u32.totalorder %s2920_s18, %s4319_s19 }
  0x3a   : > { %p2923_p9 = pnand %p3612_p8, %p2921_p7 }
  0x3c   : > { %p2924_p10 = pneg %p2923_p9 }
  0x3e   : > { %p2929_p12 = pnand %p2927_p11, %p2924_p10 }
  0x40   : > { %2932 = shalt.err (!%p2929_p12)
}
  0x41   : > { %s2933_s20 = scalar_lea.vmem %s3589_s30, 512  ;;  %p2941_p4 = scmp.lt.s32.totalorder %s3589_s30, %s3589_s30 }
  0x42   : > { %p2934_p13 = scmp.ne.s32.totalorder %s3589_s30, %s2933_s20  ;;  %p2942_p5 = scmp.lt.s32.totalorder %s2933_s20, %s2933_s20 }
  0x44   : > { %p2936_p0 = pnand %p2934_p13, %p3612_p8  ;;  %p2943_p7 = por %p2942_p5, %p2941_p4 }
  0x46   : > { %p2937_p2 = pneg %p2936_p0 }
  0x48   : > { %p2944_p9 = pnand %p2943_p7, %p2937_p2 }
  0x4a   : > { %2947 = shalt.err (!%p2944_p9)
}
  0x4b   : > { %s4276_s22 = smov 128   ;;  %s3404_s18 = smov 8  }
  0x4c   : > { %2708 = dma.hbm_to_vmem [thread:$0]  (!%p3596_p6), %s4319_s19, 512, %s3589_s30, [#allocation8], %s4276_s22, %s4276_s22, %s3404_s18  }
  0x4d   : > { %s4321_s21 = sld [smem:[#allocation42_spill]] }
  0x53   : > { %s2948_s20 = scalar_lea.hbm %s4321_s21, 512 }
  0x54   : > { %p2949_p5 = scmp.ne.s32.totalorder %s4321_s21, %s2948_s20  ;;  %p2955_p12 = scmp.lt.u32.totalorder %s2948_s20, %s4321_s21 }
  0x56   : > { %p2951_p10 = pnand %p2949_p5, %p3612_p8 }
  0x58   : > { %p2952_p11 = pneg %p2951_p10 }
  0x5a   : > { %p2957_p13 = pnand %p2955_p12, %p2952_p11 }
  0x5c   : > { %2960 = shalt.err (!%p2957_p13)
}
  0x5d   : > { %s2961_s30 = scalar_lea.vmem %s3600_s8, 512  ;;  %p2969_p7 = scmp.lt.s32.totalorder %s3600_s8, %s3600_s8 }
  0x5e   : > { %p2962_p0 = scmp.ne.s32.totalorder %s3600_s8, %s2961_s30  ;;  %p2970_p9 = scmp.lt.s32.totalorder %s2961_s30, %s2961_s30 }
  0x60   : > { %p2964_p2 = pnand %p2962_p0, %p3612_p8  ;;  %p2971_p5 = por %p2970_p9, %p2969_p7 }
  0x62   : > { %p2965_p4 = pneg %p2964_p2 }
  0x64   : > { %p2972_p10 = pnand %p2971_p5, %p2965_p4 }
  0x66   : > { %2975 = shalt.err (!%p2972_p10)
}
  0x67   : > { %2711 = dma.hbm_to_vmem [thread:$0]  (!%p3596_p6), %s4321_s21, 512, %s3600_s8, [#allocation11], %s4276_s22, %s4276_s22, %s3404_s18  }
  0x68   : > { %s4322_s24 = sld [smem:[#allocation46_spill]] }
  0x6e   : > { %s2976_s7 = scalar_lea.hbm %s4322_s24, 768 }
  0x6f   : > { %p2977_p11 = scmp.ne.s32.totalorder %s4322_s24, %s2976_s7  ;;  %p2983_p0 = scmp.lt.u32.totalorder %s2976_s7, %s4322_s24 }
  0x71   : > { %p2979_p12 = pnand %p2977_p11, %p3612_p8 }
  0x73   : > { %p2980_p13 = pneg %p2979_p12 }
  0x75   : > { %p2985_p2 = pnand %p2983_p0, %p2980_p13 }
  0x77   : > { %2988 = shalt.err (!%p2985_p2)
}
  0x78   : > { %s2989_s15 = scalar_lea.vmem %s701_s1, 768  ;;  %p2997_p5 = scmp.lt.s32.totalorder %s701_s1, %s701_s1 }
  0x79   : > { %p2990_p4 = scmp.ne.s32.totalorder %s701_s1, %s2989_s15  ;;  %p2998_p10 = scmp.lt.s32.totalorder %s2989_s15, %s2989_s15 }
  0x7b   : > { %p2992_p7 = pnand %p2990_p4, %p3612_p8  ;;  %p2999_p1 = por %p2998_p10, %p2997_p5 }
  0x7d   : > { %p2993_p9 = pneg %p2992_p7 }
  0x7f   : > { %p3000_p3 = pnand %p2999_p1, %p2993_p9 }
  0x81   : > { %3003 = shalt.err (!%p3000_p3)
}
  0x82   : > { %2717 = dma.hbm_to_vmem [thread:$0]  (!%p3596_p6), %s4322_s24, 768, %s701_s1, [#allocation14], %s4276_s22, %s4276_s22, %s3404_s18  }
  0x83   : > { %s3405_s17 = smov [#allocation16]   ;;  %s3406_s7 = smov [#allocation12]  }
  0x84   : > { %s732_s28 = sshll.u32 %s3405_s17, 4  ;;  %s684_s25 = sshll.u32 %s3406_s7, 4  ;;  %s733_s28 = int_to_ptr.vmem [resolvable:$true] %s732_s28  ;;  %s685_s25 = int_to_ptr.vmem [resolvable:$true] %s684_s25 }
  0x85   : > { %s4323_s12 = sld [smem:[#allocation50_spill]] }
  0x8b   : > { %s3004_s30 = scalar_lea.hbm %s4323_s12, 1024 }
  0x8c   : > { %p3005_p1 = scmp.ne.s32.totalorder %s4323_s12, %s3004_s30  ;;  %p3011_p12 = scmp.lt.u32.totalorder %s3004_s30, %s4323_s12 }
  0x8e   : > { %p3007_p3 = pnand %p3005_p1, %p3612_p8 }
  0x90   : > { %p3008_p11 = pneg %p3007_p3 }
  0x92   : > { %p3013_p13 = pnand %p3011_p12, %p3008_p11 }
  0x94   : > { %3016 = shalt.err (!%p3013_p13)
}
  0x95   : > { %s3017_s1 = scalar_lea.vmem %s733_s28, 1024  ;;  %p3025_p7 = scmp.lt.s32.totalorder %s733_s28, %s733_s28 }
  0x96   : > { %p3018_p0 = scmp.ne.s32.totalorder %s733_s28, %s3017_s1  ;;  %p3026_p9 = scmp.lt.s32.totalorder %s3017_s1, %s3017_s1 }
  0x98   : > { %p3020_p2 = pnand %p3018_p0, %p3612_p8  ;;  %p3027_p5 = por %p3026_p9, %p3025_p7 }
  0x9a   : > { %p3021_p4 = pneg %p3020_p2 }
  0x9c   : > { %p3028_p10 = pnand %p3027_p5, %p3021_p4 }
  0x9e   : > { %3031 = shalt.err (!%p3028_p10)
}
  0x9f   : > { %s4277_s19 = smov 64   ;;  %s4278_s16 = smov 4  }
  0xa0   : > { %2723 = dma.hbm_to_vmem [thread:$0]  (!%p3596_p6), %s4323_s12, 1024, %s733_s28, [#allocation17], %s4277_s19, %s4277_s19, %s4278_s16  }
  0xa1   : > { %s4324_s20 = sld [smem:[#allocation44_spill]] }
  0xa7   : > { %s3032_s30 = scalar_lea.hbm %s4324_s20, 768 }
  0xa8   : > { %p3033_p1 = scmp.ne.s32.totalorder %s4324_s20, %s3032_s30  ;;  %p3039_p12 = scmp.lt.u32.totalorder %s3032_s30, %s4324_s20 }
  0xaa   : > { %p3035_p3 = pnand %p3033_p1, %p3612_p8 }
  0xac   : > { %p3036_p11 = pneg %p3035_p3 }
  0xae   : > { %p3041_p13 = pnand %p3039_p12, %p3036_p11 }
  0xb0   : > { %3044 = shalt.err (!%p3041_p13)
}
  0xb1   : > { %s3045_s21 = scalar_lea.vmem %s685_s25, 768  ;;  %p3053_p7 = scmp.lt.s32.totalorder %s685_s25, %s685_s25 }
  0xb2   : > { %p3046_p0 = scmp.ne.s32.totalorder %s685_s25, %s3045_s21  ;;  %p3054_p9 = scmp.lt.s32.totalorder %s3045_s21, %s3045_s21 }
  0xb4   : > { %p3048_p2 = pnand %p3046_p0, %p3612_p8  ;;  %p3055_p5 = por %p3054_p9, %p3053_p7 }
  0xb6   : > { %p3049_p4 = pneg %p3048_p2 }
  0xb8   : > { %p3056_p10 = pnand %p3055_p5, %p3049_p4 }
  0xba   : > { %3059 = shalt.err (!%p3056_p10)
}
  0xbb   : > { %s4325_s28 = smov 128   ;;  %s3409_s7 = smov [#allocation15]  }
  0xbc   : > { %2714 = dma.hbm_to_vmem [thread:$0]  (!%p3596_p6), %s4324_s20, 768, %s685_s25, [#allocation11], %s4325_s28, %s4325_s28, %s3404_s18  }
  0xbd   : > { %s716_s4 = sshll.u32 %s3409_s7, 4  ;;  %s3410_s30 = smov [#allocation18]   ;;  %s717_s4 = int_to_ptr.vmem [resolvable:$true] %s716_s4 }
  0xbe   : > { %s748_s15 = sshll.u32 %s3410_s30, 4  ;;  %s4326_s10 = sld [smem:[#allocation48_spill]]  ;;  %s749_s15 = int_to_ptr.vmem [resolvable:$true] %s748_s15 }
  0xc4   : > { %s3060_s21 = scalar_lea.hbm %s4326_s10, 1024 }
  0xc5   : > { %p3061_p1 = scmp.ne.s32.totalorder %s4326_s10, %s3060_s21  ;;  %p3067_p12 = scmp.lt.u32.totalorder %s3060_s21, %s4326_s10 }
  0xc7   : > { %p3063_p3 = pnand %p3061_p1, %p3612_p8 }
  0xc9   : > { %p3064_p11 = pneg %p3063_p3 }
  0xcb   : > { %p3069_p13 = pnand %p3067_p12, %p3064_p11 }
  0xcd   : > { %3072 = shalt.err (!%p3069_p13)
}
  0xce   : > { %s3073_s18 = scalar_lea.vmem %s717_s4, 1024  ;;  %p3081_p7 = scmp.lt.s32.totalorder %s717_s4, %s717_s4 }
  0xcf   : > { %p3074_p0 = scmp.ne.s32.totalorder %s717_s4, %s3073_s18  ;;  %p3082_p9 = scmp.lt.s32.totalorder %s3073_s18, %s3073_s18 }
  0xd1   : > { %p3076_p2 = pnand %p3074_p0, %p3612_p8  ;;  %p3083_p5 = por %p3082_p9, %p3081_p7 }
  0xd3   : > { %p3077_p4 = pneg %p3076_p2 }
  0xd5   : > { %p3084_p10 = pnand %p3083_p5, %p3077_p4 }
  0xd7   : > { %3087 = shalt.err (!%p3084_p10)
}
  0xd8   : > { %s4327_s25 = smov 4   ;;  %s4328_s19 = smov 64  }
  0xd9   : > { %2720 = dma.hbm_to_vmem [thread:$0]  (!%p3596_p6), %s4326_s10, 1024, %s717_s4, [#allocation14], %s4328_s19, %s4328_s19, %s4327_s25  }
  0xda   : > { %s4329_s14 = sld [smem:[#allocation52_spill]] }
  0xe0   : > { %s3088_s7 = scalar_lea.hbm %s4329_s14, 1920 }
  0xe1   : > { %p3089_p1 = scmp.ne.s32.totalorder %s4329_s14, %s3088_s7  ;;  %p3095_p12 = scmp.lt.u32.totalorder %s3088_s7, %s4329_s14 }
  0xe3   : > { %p3091_p3 = pnand %p3089_p1, %p3612_p8 }
  0xe5   : > { %p3092_p11 = pneg %p3091_p3 }
  0xe7   : > { %p3097_p13 = pnand %p3095_p12, %p3092_p11 }
  0xe9   : > { %3100 = shalt.err (!%p3097_p13)
}
  0xea   : > { %s3101_s22 = scalar_lea.vmem %s749_s15, 1920  ;;  %p3109_p7 = scmp.lt.s32.totalorder %s749_s15, %s749_s15 }
  0xeb   : > { %p3102_p0 = scmp.ne.s32.totalorder %s749_s15, %s3101_s22  ;;  %p3110_p9 = scmp.lt.s32.totalorder %s3101_s22, %s3101_s22 }
  0xed   : > { %p3104_p2 = pnand %p3102_p0, %p3612_p8  ;;  %p3111_p5 = por %p3110_p9, %p3109_p7 }
  0xef   : > { %p3105_p4 = pneg %p3104_p2 }
  0xf1   : > { %p3112_p10 = pnand %p3111_p5, %p3105_p4 }
  0xf3   : > { %3115 = shalt.err (!%p3112_p10)
}
  0xf4   : > { %s3411_s4 = smov 192   ;;  %s3412_s23 = smov 12  }
  0xf5   : > { %2726 = dma.hbm_to_vmem [thread:$0]  (!%p3596_p6), %s4329_s14, 1920, %s749_s15, [#allocation17], %s3411_s4, %s3411_s4, %s3412_s23  }
  0xf6   : > { %s4279_s19 = sadd.s32 4294967294, %s3398_s2   ;;  %s65_s12 = sadd.s32 1, %s3394_s6 }
  0xf7   : > { %s72_s16 = sadd.s32 1, %s3386_s27  ;;  %p67_p8 = scmp.ge.s32.totalorder %s65_s12, 2 }
  0xf8   : > { %p79_p1 = scmp.ne.s32.totalorder %s3386_s27, %s3382_s26  ;;  %p80_p3 = scmp.eq.s32.totalorder %s3398_s2, 0 }
  0xf9   : > { %p85_p11 = scmp.ne.s32.totalorder %s3382_s26, %s3378_s5  ;;  %s4379_s12 = smov (%p67_p8, %s65_s12), 0 }
  0xfa   : > { %4330 = sst [smem:[#allocation37_spill]] %s4379_s12  ;;  %p3775_p12 = por %p80_p3, %p79_p1 }
  0xfb   : > { %p4332_p13 = scmp.eq.s32.totalorder %s3580_s29, 0  ;;  %s69_s28 = ssub.s32 %s3394_s6, %s4379_s12 }
  0xfc   : > { %p515_p0 = scmp.eq.s32.totalorder %s3580_s29, 1  ;;  %p70_p2 = scmp.eq.s32.totalorder %s69_s28, 0 }
  0xfd   : > { %p3781_p6 = por %p4332_p13, %p85_p11  ;;  %p521_p4 = scmp.eq.s32.totalorder %s4279_s19, 1 }
  0xfe   : > { %p3790_p7 = por %p515_p0, %p79_p1  ;;  %p2757_p9 = scmp.lt.s32.totalorder %s3398_s2, 2 }
  0xff   : > { %s4333_s15 = scalar_select %p3781_p6, 1, 0 }
 0x100   : > { %s4334_s17 = scalar_select %p3790_p7, 1, 0 }
 0x101   : > { %s3796_s7 = scalar_select %p70_p2, %s3386_s27, %s72_s16  }
 0x102   : > { %p3798_p5 = por %p521_p4, %p85_p11  ;;  %s777_s8 = sand.u32 1, %s3386_s27  }
 0x103   : > { %s3803_s1 = sshll.u32 %s777_s8, 2  ;;  %s2449_s21 = sshll.u32 %s3394_s6, 6 }
 0x104   : > { %s4335_s30 = scalar_select %p3798_p5, 1, 0 }
 0x105   : > { %s4336_s23 = sld [smem:[#allocation38_spill]]  ;;  %s781_s25 = scalar_lea.vmem [#allocation4], %s3803_s1 }
 0x106   : > { %s788_s16 = sshll.u32 %s781_s25, 4  ;;  %p3816_p10 = pnand %p2757_p9, %p3775_p12  ;;  %s3812_s16 = int_to_ptr.vmem [resolvable:$true] %s788_s16 }
 0x107   : > { %s4338_s14 = sld [smem:[#allocation39_spill]]  ;;  %s795_s4 = sand.u32 1, %s3398_s2  }
 0x108   : > { %s778_s20 = scalar_lea.sflag [#allocation5], %s777_s8  ;;  %p3118_p1 = pneg %p3816_p10 }
 0x10b   : > { %s3809_s18 = scalar_lea.hbm %s4336_s23, %s2449_s21  ;;  %s3121_s12 = scalar_lea.hbm %s4336_s23, 128 }
 0x10c   : > { %s3116_s24 = scalar_lea.hbm %s3809_s18, 64  ;;  %p3122_p12 = scmp.lt.u32.totalorder %s3809_s18, %s4336_s23 }
 0x10d   : > { %s3823_s22 = scalar_lea.hbm %s4338_s14, %s2449_s21  ;;  %p3117_p8 = scmp.ne.s32.totalorder %s3809_s18, %s3116_s24 }
 0x10e   : > { %p3123_p13 = scmp.lt.u32.totalorder %s3121_s12, %s3116_s24  ;;  %p3125_p2 = scmp.lt.u32.totalorder %s3116_s24, %s3809_s18 }
 0x10f   : > { %p3119_p3 = pnand %p3118_p1, %p3117_p8 }
 0x110   : > { %p3124_p0 = por %p3123_p13, %p3122_p12 }
 0x111   : > { %p3120_p11 = pneg %p3119_p3 }
 0x112   : > { %p3126_p4 = por %p3125_p2, %p3124_p0 }
 0x114   : > { %p3127_p9 = pnand %p3126_p4, %p3120_p11 }
 0x116   : > { %3130 = shalt.err (!%p3127_p9)
}
 0x117   : > { %s3131_s19 = scalar_lea.vmem %s3812_s16, 64  ;;  %s3413_s8 = smov [#allocation4]  }
 0x118   : > { %p3132_p8 = scmp.ne.s32.totalorder %s3812_s16, %s3131_s19  ;;  %s3136_s21 = sshll.u32 %s3413_s8, 4  ;;  %s3137_s21 = int_to_ptr.vmem [resolvable:$false] %s3136_s21 }
 0x119   : > { %s3138_s6 = scalar_lea.vmem %s3137_s21, 128  ;;  %p3139_p7 = scmp.lt.s32.totalorder %s3812_s16, %s3137_s21 }
 0x11a   : > { %p3134_p3 = pnand %p3132_p8, %p3118_p1  ;;  %p3140_p12 = scmp.lt.s32.totalorder %s3138_s6, %s3131_s19 }
 0x11c   : > { %p3135_p5 = pneg %p3134_p3  ;;  %p3141_p13 = por %p3140_p12, %p3139_p7 }
 0x11e   : > { %p3142_p0 = pnand %p3141_p13, %p3135_p5 }
 0x120   : > { %3145 = shalt.err (!%p3142_p0)
}
 0x121   : > { %2730 = dma.hbm_to_vmem [thread:$0]  (!%p3816_p10), %s3809_s18, 64, %s3812_s16, %s778_s20  }
 0x122   : > { %s799_s24 = scalar_lea.vmem [#allocation7], %s3803_s1  ;;  %s796_s3 = scalar_lea.sflag [#allocation8], %s795_s4 }
 0x123   : > { %s806_s12 = sshll.u32 %s799_s24, 4  ;;  %s3146_s25 = scalar_lea.hbm %s3823_s22, 64  ;;  %s807_s12 = int_to_ptr.vmem [resolvable:$true] %s806_s12 }
 0x124   : > { %p3147_p7 = scmp.ne.s32.totalorder %s3823_s22, %s3146_s25  ;;  %s3151_s8 = scalar_lea.hbm %s4338_s14, 128 }
 0x125   : > { %p3152_p2 = scmp.lt.u32.totalorder %s3823_s22, %s4338_s14  ;;  %p3153_p4 = scmp.lt.u32.totalorder %s3151_s8, %s3146_s25 }
 0x126   : > { %p3149_p5 = pnand %p3147_p7, %p3118_p1  ;;  %p3155_p8 = scmp.lt.u32.totalorder %s3146_s25, %s3823_s22 }
 0x127   : > { %p3154_p9 = por %p3153_p4, %p3152_p2 }
 0x128   : > { %p3150_p11 = pneg %p3149_p5 }
 0x129   : > { %p3156_p3 = por %p3155_p8, %p3154_p9 }
 0x12b   : > { %p3157_p12 = pnand %p3156_p3, %p3150_p11 }
 0x12d   : > { %3160 = shalt.err (!%p3157_p12)
}
 0x12e   : > { %s3161_s20 = scalar_lea.vmem %s807_s12, 64  ;;  %s3414_s1 = smov [#allocation7]  }
 0x12f   : > { %p3162_p13 = scmp.ne.s32.totalorder %s807_s12, %s3161_s20  ;;  %s3166_s18 = sshll.u32 %s3414_s1, 4  ;;  %s3167_s18 = int_to_ptr.vmem [resolvable:$false] %s3166_s18 }
 0x130   : > { %s3168_s16 = scalar_lea.vmem %s3167_s18, 128  ;;  %p3169_p5 = scmp.lt.s32.totalorder %s807_s12, %s3167_s18 }
 0x131   : > { %p3164_p0 = pnand %p3162_p13, %p3118_p1  ;;  %p3170_p6 = scmp.lt.s32.totalorder %s3168_s16, %s3161_s20 }
 0x133   : > { %p3165_p7 = pneg %p3164_p0  ;;  %p3171_p2 = por %p3170_p6, %p3169_p5 }
 0x135   : > { %p3172_p4 = pnand %p3171_p2, %p3165_p7 }
 0x137   : > { %3175 = shalt.err (!%p3172_p4)
}
 0x138   : > { %2733 = dma.hbm_to_vmem [thread:$0]  (!%p3816_p10), %s3823_s22, 64, %s807_s12, %s796_s3  }
 0x139   : > { %p4339_p11 = scmp.ne.s32.totalorder %s4317_s0, 0 }
 0x13a   : > { %s3876_s4 = sand.u32 (!%p4339_p11), 1, %s3382_s26   ;;  %p4340_p6 = scmp.ne.s32.totalorder (!%p4339_p11), %s4333_s15, 0 }
 0x13b   : > { %815 = sbr.rel (%p4339_p11) target bundleno = 2630 (0xa46), region = 100  ;;  %s2453_s24 = sshll.u32 (!%p4339_p11), %s3876_s4, 2 }
 0x13c   : > { %s818_s25 = scalar_lea.sflag (!%p4339_p11), [#allocation5], %s3876_s4  ;;  %s3880_s10 = scalar_lea.vmem (!%p4339_p11), [#allocation4], %s2453_s24 }
 0x142   : > { %3341 = dma.done.wait (%p4340_p6), %s818_s25, 64  }
 0x143   : > { %3343 = vsyncadd (%p4340_p6), %s818_s25, 4294967232  ;;  %s3887_s28 = sand.u32 1, %s3580_s29   ;;  %s3890_s22 = scalar_lea.vmem [#allocation7], %s2453_s24 }
 0x144   : > { %s827_s0 = scalar_lea.sflag [#allocation8], %s3887_s28 }
 0x145   : > { %3345 = dma.done.wait (%p4340_p6), %s827_s0, 64  }
 0x146   : > { %3347 = vsyncadd (%p4340_p6), %s827_s0, 4294967232  ;;  %p4341_p10 = scmp.eq.s32.totalorder %s3580_s29, 0 }
 0x148   : > { %3349 = dma.done.wait (%p4341_p10), [#allocation8], 512   ;;  %p4342_p1 = pmov %p4341_p10 }
 0x14a   : > { %3351 = vsyncadd (%p4342_p1), [#allocation8], 4294966784  ;;  %p4343_p9 = pmov %p4342_p1 }
 0x14b   : > { %p4344_p8 = pmov %p4342_p1 }
 0x14c   : > { %3353 = dma.done.wait (%p4343_p9), [#allocation11], 1280  }
 0x14d   : > { %3355 = vsyncadd (%p4344_p8), [#allocation11], 4294966016  ;;  %p4345_p3 = pmov %p4342_p1 }
 0x14e   : > { %p4346_p12 = pmov %p4342_p1 }
 0x14f   : > { %3357 = dma.done.wait (%p4345_p3), [#allocation14], 1792  }
 0x150   : > { %3359 = vsyncadd (%p4346_p12), [#allocation14], 4294965504  ;;  %p4347_p13 = pmov %p4342_p1 }
 0x151   : > { %p4348_p0 = pmov %p4342_p1 }
 0x152   : > { %3361 = dma.done.wait (%p4347_p13), [#allocation17], 2944  }
 0x153   : > { %3363 = vsyncadd (%p4348_p0), [#allocation17], 4294964352  ;;  %v3415_v0 = vmov 0   ;;  %v2831_v1 = vld [vmem:[#allocation13 + $0x4] ss:$8 sps:$4 sm:$0xff]   ;;  %vm1084_vm0 = vcmask 392192   ;;  %v961_v19 = vlaneseq }
 0x154   : > { %1120 = vmatprep.mubr.bf16.mxu1 %v3415_v0  ;;  %1027 = vmatprep.mubr.bf16.mxu0 %v3415_v0  ;;  %v2833_v2 = vld [vmem:[#allocation13] ss:$8 sps:$4 sm:$0xff]   ;;  %v2834_v3 = vld [vmem:[#allocation13 + $0x14] ss:$8 sps:$4 sm:$0xff]   ;;  %v2836_v4 = vld [vmem:[#allocation13 + $0x10] ss:$8 sps:$4 sm:$0xff]  }
 0x155   : > { %1088 = vmatprep.subr.bf16.mxu1 %v2831_v1  ;;  %v2837_v5 = vld [vmem:[#allocation13 + $0x24] ss:$8 sps:$4 sm:$0xff]   ;;  %v2840_v6 = vld [vmem:[#allocation10 + $0x4] ss:$8 sps:$4 sm:$0xff]   ;;  %v2842_v7 = vld [vmem:[#allocation10] ss:$8 sps:$4 sm:$0xff]  }
 0x156   : > { %1089 = vmatpush1.bf16.msra.mxu1 %v2833_v2  ;;  %v2839_v8 = vld [vmem:[#allocation13 + $0x20] ss:$8 sps:$4 sm:$0xff]   ;;  %995 = vmatprep.subr.bf16.mxu0 %v2840_v6  ;;  %v2843_v9 = vld [vmem:[#allocation10 + $0x14] ss:$8 sps:$4 sm:$0xff]   ;;  %v2848_v11 = vld [vmem:[#allocation9 + $0x4] ss:$8 sps:$4 sm:$0xff]  }
 0x157   : > { %1090 = vmatprep.subr.bf16.mxu1 %v2834_v3  ;;  %996 = vmatpush1.bf16.msra.mxu0 %v2842_v7  ;;  %v2845_v10 = vld [vmem:[#allocation10 + $0x10] ss:$8 sps:$4 sm:$0xff]   ;;  %v2846_v14 = vld [vmem:[#allocation9] ss:$8 sps:$4 sm:$0xff]   ;;  %v2851_v15 = vld [vmem:[#allocation9 + $0x14] ss:$8 sps:$4 sm:$0xff]  }
 0x158   : > { %997 = vmatprep.subr.bf16.mxu0 %v2843_v9  ;;  %v954_v12 = vld [vmem:[%s3890_s22] sm:$0xf]  ;;  %v953_v13 = vld [vmem:[%s3880_s10] sm:$0xf]  ;;  %vm991_vm1 = vcmask 261120   ;;  %v3416_v18 = vmov 0.0  }
 0x159   : > { %v2849_v16 = vld [vmem:[#allocation9 + $0x10] ss:$8 sps:$4 sm:$0xff]   ;;  %vm3417_vm2 = vmmov 0   ;;  %v3930_v20 = vshrl.u32 %v961_v19, 7  ;;  %s4349_s9 = sld [smem:[#allocation47_spill]]  ;;  %s4350_s19 = sld [smem:[#allocation43_spill]] }
 0x15a   : > { %1091 = vmatpush1.bf16.msra.mxu1 %v2836_v4  ;;  %v3920_v17 = vld [vmem:[%s3880_s10] sm:$0xf]  ;;  %s4351_s6 = sld [smem:[#allocation41_spill]]  ;;  %vm1293_vm3 = vcmask 1043456   ;;  %vm1277_vm4 = vcmask 64512   ;;  %v2861_v2 = vld [vmem:[#allocation15] sm:$0xff]  }
 0x15b   : > { %1092 = vmatprep.subr.bf16.mxu1 %v2837_v5  ;;  %998 = vmatpush1.bf16.msra.mxu0 %v2845_v10  ;;  %v3933_v21 = vsub.s32 0, %v3930_v20  ;;  %v3939_v23 = vsub.s32 1, %v3930_v20  ;;  %v2854_v1 = vld [vmem:[#allocation12 + $0x4] ss:$8 sps:$4 sm:$0xff]   ;;  %v2863_v4 = vld [vmem:[#allocation15 + $0x10] sm:$0xff]   ;;  %v2864_v5 = vld [vmem:[#allocation15 + $0x18] sm:$0xff]  }
 0x15c   : > { %1184 = vmatprep.subr.bf16.mxu0 %v2848_v11  ;;  %v2862_v3 = vld [vmem:[#allocation15 + $0x8] sm:$0xff]   ;;  %v2865_v6 = vld [vmem:[#allocation15 + $0x20] sm:$0xff]   ;;  %s3967_s20 = sshll.u32 %s3876_s4, 3  ;;  %s4352_s24 = sld [smem:[#allocation45_spill]]  ;;  %vm1939_vm5 = vcmask 654336  }
 0x15d   : > { %v2866_v7 = vld [vmem:[#allocation15 + $0x28] sm:$0xff]   ;;  %s940_s1 = scalar_lea.vmem [#allocation23], %s3967_s20  ;;  %s4353_s11 = sld [smem:[#allocation49_spill]] }
 0x15e   : > { %1093 = vmatpush1.bf16.msra.mxu1 %v2839_v8  ;;  %2470 = vmatmul.mubr.msk.bf16.vlgmr.msra.gmra.mrb[0].mxu0 %vm991_vm1, %v953_v13  ;;  %v2867_v8 = vld [vmem:[#allocation15 + $0x30] sm:$0xff]   ;;  %v2858_v19 = vld [vmem:[#allocation12 + $0x20] ss:$8 sps:$4 sm:$0xff]   ;;  %s4286_s0 = scalar_lea.vmem [#allocation25], %s3967_s20  ;;  %s4354_s13 = sld [smem:[#allocation51_spill]] }
 0x15f   : > { %1185 = vmatpush1.bf16.msra.mxu0 %v2846_v14  ;;  %1216 = vmatprep.mubr.bf16.mxu0 %v3415_v0  ;;  %v1042_v22 = vld [vmem:[%s4349_s9] sm:$0x3]  ;;  %v2857_v14 = vld [vmem:[#allocation12 + $0x14] ss:$8 sps:$4 sm:$0xff]   ;;  %s2661_s8 = smul.u32 12, %s3876_s4  ;;  %s926_s29 = scalar_lea.vmem [#allocation20], %s3967_s20 }
 0x160   : > { %1186 = vmatprep.subr.bf16.mxu0 %v2851_v15  ;;  %2583 = vmatprep.subr.bf16.mxu1 %v3416_v18  ;;  %v959_v24 = vld [vmem:[%s4350_s19] sm:$0x3]  ;;  %v1047_v25 = vrot.slane %v1042_v22, %v3933_v21  ;;  %v1051_v27 = vrot.slane %v1042_v22, %v3939_v23  ;;  %v2855_v15 = vld [vmem:[#allocation12 + $0x10] ss:$8 sps:$4 sm:$0xff]   ;;  %s4355_s19 = sld [smem:[#allocation53_spill]]  ;;  %s4287_s15 = scalar_lea.vmem [#allocation22], %s3967_s20 }
 0x161   : > { %2477 = vmatmul.mubr.msk.bf16.vlgmr.msra.gmra.mrb[0].mxu1 %vm1084_vm0, %v954_v12  ;;  %v964_v26 = vrot.slane %v959_v24, %v3933_v21  ;;  %v968_v28 = vrot.slane %v959_v24, %v3939_v23  ;;  %v2485_v45 = vld [vmem:[%s4351_s6] ss:$0 sm:$0xff]  ;;  %v3976_v22 = vld [vmem:[%s3890_s22] sm:$0xf]  ;;  %s3418_s22 = smov 32   ;;  %s4042_s21 = scalar_lea.vmem [#allocation19], %s2661_s8 }
 0x162   : > { %2585 = vmatprep.mubr.msk.bf16.mxu1 %vm3417_vm2, %v3416_v18  ;;  %v2852_v12 = vld [vmem:[#allocation12] ss:$8 sps:$4 sm:$0xff]   ;;  %s4356_s6 = sld [smem:[#allocation35_spill]]  ;;  %s4359_s8 = sld [smem:[#allocation59_spill]] }
 0x163   : > { %1187 = vmatpush1.bf16.msra.mxu0 %v2849_v16  ;;  %v2860_v16 = vld [vmem:[#allocation12 + $0x24] ss:$8 sps:$4 sm:$0xff]   ;;  %s2095_s16 = sshll.u32 %s926_s29, 4  ;;  %p4360_p5 = scmp.ne.s32.totalorder %s4334_s17, 0  ;;  %s2096_s16 = int_to_ptr.vmem [resolvable:$true] %s2095_s16 }
 0x164   : > { %2589 = vmatprep.subr.bf16.mxu0 %v3416_v18  ;;  %s3176_s25 = scalar_lea.vmem %s2096_s16, 128  ;;  %s3419_s10 = smov [#allocation20]  }
 0x165   : > { %p3177_p7 = scmp.ne.s32.totalorder %s2096_s16, %s3176_s25 }
 0x166   : > { %2484 = vmatmul.mubr.msk.bf16.vlgmr.msra.gmra.mrb[4].mxu0 %vm991_vm1, %v3920_v17 }
 0x167   : > { %2591 = vmatprep.mubr.msk.bf16.mxu0 %vm3417_vm2, %v3416_v18  ;;  %p3178_p2 = pnand %p3177_p7, %p4360_p5 }
 0x168   : > { %s4061_s12 = sshll.u32 %s4356_s6, 7 }
 0x169   : > { %s4067_s18 = scalar_lea.hbm %s4359_s8, %s4061_s12  ;;  %p3179_p4 = pneg %p3178_p2 }
 0x231   : > { %v1029_v30 = vpop.f32.mrb[0].mxu0 }
 0x232   : > { %v1030_v33 = vadd.f32 %v1029_v30, %v964_v26  ;;  %v1031_v34 = vpop.f32.mrb[1].mxu0 }
 0x233   : > { %v1032_v37 = vadd.f32 %v1031_v34, %v968_v28  ;;  %v1033_v38 = vpop.f32.mrb[2].mxu0 }
 0x234   : > { %v1122_v29 = vpop.f32.mrb[0].mxu1  ;;  %v1034_v40 = vpop.f32.mrb[3].mxu0 }
 0x235   : > { %v1123_v31 = vadd.f32 %v1122_v29, %v1047_v25  ;;  %v1124_v32 = vpop.f32.mrb[1].mxu1  ;;  %v2549_v42 = vpack.c.bf16 %v1032_v37, %v1030_v33  ;;  %v2868_v25 = vld [vmem:[#allocation15 + $0x38] sm:$0xff]  }
 0x236   : > { %v1125_v35 = vadd.f32 %v1124_v32, %v1051_v27  ;;  %v1126_v36 = vpop.f32.mrb[2].mxu1 }
 0x237   : > { %v1127_v39 = vpop.f32.mrb[3].mxu1  ;;  %1137 = vst [vmem:[#allocation2] sm:$0xff] %v2549_v42 }
 0x238   : > { %v2550_v41 = vpack.c.bf16 %v1125_v35, %v1123_v31  ;;  %v2505_v31 = vld [vmem:[%s4352_s24] ss:$0 sm:$0xff]  ;;  %s4357_s24 = sld [smem:[#allocation54_spill]] }
 0x239   : > { %v1218_v43 = vpop.f32.mrb[4].mxu0 }
 0x23a   : > { %1146 = vst [vmem:[#allocation3] sm:$0xff] %v2550_v41  ;;  %v3948_v44 = vpop.f32.mrb[5].mxu0  ;;  %v1232_v48 = vadd.f32 %v2485_v45, %v1218_v43 }
 0x23b   : > { %v1222_v46 = vpop.f32.mrb[6].mxu0 }
 0x23c   : > { %v1223_v47 = vpop.f32.mrb[7].mxu0  ;;  %v1233_v52 = vpack.c.bf16 %v1232_v48, %v1232_v48 }
 0x23e   : > { %v1571_v24 = vld [vmem:[#allocation2] sm:$0xf]  ;;  %v1572_v36 = vld [vmem:[#allocation2 + $0x4] sm:$0xf] }
 0x23f   : > { %v1630_v39 = vsel %vm1293_vm3, %v1572_v36, 0 }
 0x241   : > { %v1234_v49 = vld [vmem:[#allocation3] sm:$0xf]  ;;  %v1235_v50 = vld [vmem:[#allocation3 + $0x4] sm:$0xf] }
 0x242   : > { %2584 = vmatpush3.bf16.xpose.msra.mxu1 %v1234_v49  ;;  %v1295_v51 = vsel %vm1293_vm3, %v1235_v50, 0 }
 0x243   : > { %2590 = vmatpush3.bf16.msra.mxu0 %v1295_v51  ;;  %2595 = vmatprep.subr.bf16.mxu1 %v3416_v18 }
 0x244   : > { %1521 = vmatprep.subr.bf16.mxu0 %v2854_v1  ;;  %v2872_v1 = vld [vmem:[#allocation16 + $0x18] sm:$0xff]  }
 0x249   : > { %2586 = vmatmul.mubr.bf16.vlgmr.msra.gmra.mrb[4].mxu1 %v1233_v52 }
 0x24a   : > { %2611 = vmatprep.mubr.msk.bf16.mxu1 %vm3417_vm2, %v3416_v18  ;;  %2596 = vmatpush3.bf16.msra.mxu1 %v2861_v2  ;;  %v2873_v2 = vld [vmem:[#allocation16 + $0x20] sm:$0xff]  }
 0x24b   : > { %2597 = vmatprep.subr.bf16.mxu1 %v3416_v18 }
 0x24e   : > { %2598 = vmatpush3.bf16.msra.mxu1 %v2862_v3  ;;  %v2874_v3 = vld [vmem:[#allocation16 + $0x28] sm:$0xff]  }
 0x24f   : > { %2599 = vmatprep.subr.bf16.mxu1 %v3416_v18 }
 0x252   : > { %2600 = vmatpush3.bf16.msra.mxu1 %v2863_v4  ;;  %v2875_v4 = vld [vmem:[#allocation16 + $0x30] sm:$0xff]  }
 0x253   : > { %2601 = vmatprep.subr.bf16.mxu1 %v3416_v18 }
 0x256   : > { %2602 = vmatpush3.bf16.msra.mxu1 %v2864_v5  ;;  %v2876_v5 = vld [vmem:[#allocation16 + $0x38] sm:$0xff]  }
 0x257   : > { %2603 = vmatprep.subr.bf16.mxu1 %v3416_v18 }
 0x25a   : > { %2604 = vmatpush3.bf16.msra.mxu1 %v2865_v6  ;;  %v2518_v6 = vcombine.low %v3976_v22, %v3976_v22 }
 0x25b   : > { %2605 = vmatprep.subr.bf16.mxu1 %v3416_v18 }
 0x25e   : > { %2606 = vmatpush3.bf16.msra.mxu1 %v2866_v7 }
 0x25f   : > { %2607 = vmatprep.subr.bf16.mxu1 %v3416_v18 }
 0x262   : > { %2608 = vmatpush3.bf16.msra.mxu1 %v2867_v8 }
 0x263   : > { %2609 = vmatprep.subr.bf16.mxu1 %v3416_v18 }
 0x266   : > { %2610 = vmatpush3.bf16.msra.mxu1 %v2868_v25  ;;  %v2892_v25 = vld [vmem:[#allocation18 + $0x64] ss:$12 sps:$4 sm:$0xff]  }
 0x31c   : > { %v1270_v53 = vpop.f32.mrb[4].mxu1 }
 0x31d   : > { %v1276_v54 = vmul.f32 0.088388346, %v1270_v53  ;;  %v2587_v55 = vpop.f32.mrb[5].mxu1 }
 0x31e   : > { %v1273_v56 = vpop.f32.mrb[6].mxu1 }
 0x31f   : > { %v2588_v57 = vpop.f32.mrb[7].mxu1  ;;  %v1278_v58 = vsel %vm1277_vm4, %v1276_v54, -inf }
 0x320   : > { %1279 = vmax.xlane.f32.xlu0 %v1278_v58 }
 0x3ad   : > { %v1280_v59 = vpop.xlane.xlu0 %1279 }
 0x3ae   : > { %v1281_v60 = vsub.f32 %v1276_v54, %v1280_v59 }
 0x3b0   : > { %v1282_v61 = vmul.f32 1.442695, %v1281_v60  ;;  %v2869_v60 = vld [vmem:[#allocation16] sm:$0xff]  }
 0x3b2   : > { %2898 = vpow2.f32 %v1282_v61 }
 0x3bc   : > { %v2899_v62 = vpop.eup %2898 }
 0x3bd   : > { %v1284_v63 = vsel %vm1277_vm4, %v2899_v62, 0.0 }
 0x3be   : > { %1285 = vadd.xlane.f32.xlu0 %v1284_v63  ;;  %v2871_v63 = vld [vmem:[#allocation16 + $0x10] sm:$0xff]  }
 0x3d4   : > { %1818 = vrot.lane.b32.xlu0 %v2518_v6, %s3418_s22  ;;  %s4358_s22 = sld [smem:[#allocation55_spill]] }
 0x44b   : > { %v1286_v9 = vpop.xlane.xlu0 %1285 }
 0x44c   : > { %2900 = vrcp.f32 %v1286_v9 }
 0x456   : > { %v2901_v10 = vpop.eup %2900 }
 0x457   : > { %v1288_v11 = vmul.f32 %v2901_v10, %v2899_v62  ;;  %v2870_v62 = vld [vmem:[#allocation16 + $0x8] sm:$0xff]  }
 0x459   : > { %v1289_v13 = vpack.c.bf16 %v1288_v11, %v1288_v11  ;;  %1480 = vst.msk [vmem:[%s940_s1] sm:$0xff] %vm1277_vm4, %v1288_v11 }
 0x45b   : > { %2592 = vmatmul.mubr.msk.bf16.vlgmr.msra.gmra.mrb[8].mxu0 %vm1277_vm4, %v1289_v13  ;;  %v2880_v13 = vld [vmem:[#allocation18 + $0x4] ss:$12 sps:$4 sm:$0xff]  }
 0x45c   : > { %1522 = vmatpush1.bf16.msra.mxu0 %v2852_v12  ;;  %1553 = vmatprep.mubr.bf16.mxu0 %v3415_v0  ;;  %v2878_v12 = vld [vmem:[#allocation18] ss:$12 sps:$4 sm:$0xff]  }
 0x45d   : > { %1523 = vmatprep.subr.bf16.mxu0 %v2857_v14  ;;  %v2883_v14 = vld [vmem:[#allocation18 + $0x1c] ss:$12 sps:$4 sm:$0xff]   ;;  %1942 = vmatprep.subr.bf16.mxu1 %v2880_v13 }
 0x460   : > { %1524 = vmatpush1.bf16.msra.mxu0 %v2855_v15  ;;  %v2881_v15 = vld [vmem:[#allocation18 + $0x18] ss:$12 sps:$4 sm:$0xff]  }
 0x461   : > { %1525 = vmatprep.subr.bf16.mxu0 %v2860_v16  ;;  %v2886_v16 = vld [vmem:[#allocation18 + $0x34] ss:$12 sps:$4 sm:$0xff]  }
 0x464   : > { %1526 = vmatpush1.bf16.msra.mxu0 %v2858_v19  ;;  %v2884_v19 = vld [vmem:[#allocation18 + $0x30] ss:$12 sps:$4 sm:$0xff]  }
 0x465   : > { %2615 = vmatprep.subr.bf16.mxu0 %v3416_v18 }
 0x467   : > { %2504 = vmatmul.mubr.msk.bf16.vlgmr.msra.gmra.mrb[12].mxu0 %vm1084_vm0, %v3976_v22  ;;  %v2889_v22 = vld [vmem:[#allocation18 + $0x4c] ss:$12 sps:$4 sm:$0xff]  }
 0x468   : > { %2617 = vmatprep.mubr.msk.bf16.mxu0 %vm3417_vm2, %v3416_v18 }
 0x46d   : > { %2616 = vmatpush3.bf16.xpose.msra.mxu0 %v1571_v24  ;;  %v2887_v24 = vld [vmem:[#allocation18 + $0x48] ss:$12 sps:$4 sm:$0xff]  }
 0x46e   : > { %2621 = vmatprep.subr.bf16.mxu0 %v3416_v18 }
 0x52e   : > { %v1331_v26 = vpop.f32.mrb[8].mxu0 }
 0x52f   : > { %v1337_v27 = vpack.c.bf16 %v1331_v26, %v1331_v26  ;;  %v2593_v28 = vpop.f32.mrb[9].mxu0  ;;  %v2890_v26 = vld [vmem:[#allocation18 + $0x60] ss:$12 sps:$4 sm:$0xff]  }
 0x530   : > { %v1334_v29 = vpop.f32.mrb[10].mxu0 }
 0x531   : > { %v2594_v30 = vpop.f32.mrb[11].mxu0  ;;  %2612 = vmatmul.mubr.bf16.vlgmr.msra.gmra.mrb[8].mxu1 %v1337_v27  ;;  %v1819_v27 = vpop.permute.xlu0 %1818  ;;  %v2893_v29 = vld [vmem:[#allocation18 + $0x8] ss:$12 sps:$4 sm:$0xff]  }
 0x532   : > { %1974 = vmatprep.mubr.bf16.mxu1 %v3415_v0  ;;  %v2487_v0 = vld [vmem:[%s4353_s11] ss:$0 sm:$0xff]  ;;  %1943 = vmatpush1.bf16.msra.mxu1 %v2878_v12  ;;  %v1821_v28 = vsel %vm991_vm1, %v3920_v17, %v1819_v27  ;;  %v2897_v17 = vld [vmem:[#allocation18 + $0x68] ss:$12 sps:$4 sm:$0xff]  }
 0x533   : > { %1944 = vmatprep.subr.bf16.mxu1 %v2883_v14  ;;  %v2894_v30 = vld [vmem:[#allocation18 + $0x20] ss:$12 sps:$4 sm:$0xff]  }
 0x534   : > { %v2496_v12 = vld [vmem:[%s4357_s24] ss:$0 sm:$0xff]  ;;  %s4289_s24 = scalar_lea.sflag [#allocation21], %s3887_s28 }
 0x535   : > { %v2497_v14 = vld [vmem:[%s4358_s22] ss:$0 sm:$0xff]  ;;  %s3180_s22 = sshll.u32 %s3419_s10, 4  ;;  %s3181_s22 = int_to_ptr.vmem [resolvable:$false] %s3180_s22 }
 0x536   : > { %1945 = vmatpush1.bf16.msra.mxu1 %v2881_v15  ;;  %p3183_p11 = scmp.lt.s32.totalorder %s2096_s16, %s3181_s22 }
 0x537   : > { %1946 = vmatprep.subr.bf16.mxu1 %v2886_v16 }
 0x53a   : > { %v1555_v32 = vpop.f32.mrb[12].mxu0  ;;  %1947 = vmatpush1.bf16.msra.mxu1 %v2884_v19 }
 0x53b   : > { %v1569_v33 = vadd.f32 %v2505_v31, %v1555_v32  ;;  %v3988_v34 = vpop.f32.mrb[13].mxu0  ;;  %1948 = vmatprep.subr.bf16.mxu1 %v2889_v22  ;;  %v2895_v31 = vld [vmem:[#allocation18 + $0x38] ss:$12 sps:$4 sm:$0xff]   ;;  %v2896_v32 = vld [vmem:[#allocation18 + $0x50] ss:$12 sps:$4 sm:$0xff]  }
 0x53c   : > { %v1559_v35 = vpop.f32.mrb[14].mxu0 }
 0x53d   : > { %v1570_v37 = vpack.c.bf16 %v1569_v33, %v1569_v33  ;;  %v1560_v38 = vpop.f32.mrb[15].mxu0  ;;  %v2507_v35 = vld [vmem:[%s4354_s13] ss:$0 sm:$0xff] }
 0x53e   : > { %1949 = vmatpush1.bf16.msra.mxu1 %v2887_v24 }
 0x53f   : > { %2618 = vmatmul.mubr.bf16.vlgmr.msra.gmra.mrb[16].mxu0 %v1570_v37  ;;  %1950 = vmatprep.subr.bf16.mxu1 %v2892_v25 }
 0x540   : > { %2622 = vmatpush3.bf16.msra.mxu0 %v1630_v39  ;;  %2623 = vmatprep.mubr.msk.bf16.mxu0 %vm3417_vm2, %v3416_v18 }
 0x541   : > { %2627 = vmatprep.subr.bf16.mxu0 %v3416_v18 }
 0x542   : > { %1951 = vmatpush1.bf16.msra.mxu1 %v2890_v26 }
 0x543   : > { %2647 = vmatprep.subr.bf16.mxu1 %v3416_v18 }
 0x545   : > { %2534 = vmatmul.mubr.msk.bf16.vlgmr.msra.gmra.mrb[12].mxu1 %vm1939_vm5, %v1821_v28 }
 0x546   : > { %2648 = vmatpush3.bf16.msra.mxu1 %v2893_v29  ;;  %2657 = vmatprep.mubr.msk.bf16.mxu1 %vm3417_vm2, %v3416_v18 }
 0x547   : > { %2649 = vmatprep.subr.bf16.mxu1 %v3416_v18 }
 0x54a   : > { %2650 = vmatpush3.bf16.msra.mxu1 %v2894_v30 }
 0x54b   : > { %2651 = vmatprep.subr.bf16.mxu1 %v3416_v18 }
 0x54e   : > { %2652 = vmatpush3.bf16.msra.mxu1 %v2895_v31 }
 0x54f   : > { %2653 = vmatprep.subr.bf16.mxu1 %v3416_v18 }
 0x552   : > { %2654 = vmatpush3.bf16.msra.mxu1 %v2896_v32 }
 0x553   : > { %2655 = vmatprep.subr.bf16.mxu1 %v3416_v18 }
 0x556   : > { %2656 = vmatpush3.bf16.msra.mxu1 %v2897_v17 }
 0x559   : > { %2658 = vmatmul.mubr.msk.bf16.vlgmr.msra.gmra.mrb[16].mxu1 %vm1939_vm5, %v1821_v28 }
 0x604   : > { %v1443_v40 = vpop.f32.mrb[8].mxu1 }
 0x605   : > { %v1444_v41 = vadd.f32 %v2487_v0, %v1443_v40  ;;  %v2613_v42 = vpop.f32.mrb[9].mxu1 }
 0x606   : > { %v1446_v43 = vpop.f32.mrb[10].mxu1 }
 0x607   : > { %v2614_v45 = vpop.f32.mrb[11].mxu1  ;;  %v3998_v46 = vadd.f32 %v1444_v41, %v3948_v44  ;;  %v1842_v43 = vld [vmem:[%s4355_s19] sm:$0x7] }
 0x608   : > { %v1847_v45 = vrot.slane %v1842_v43, %v3933_v21 }
 0x612   : > { %v1607_v47 = vpop.f32.mrb[16].mxu0 }
 0x613   : > { %v1613_v48 = vmul.f32 0.088388346, %v1607_v47  ;;  %v2619_v49 = vpop.f32.mrb[17].mxu0 }
 0x614   : > { %v1610_v50 = vpop.f32.mrb[18].mxu0 }
 0x615   : > { %v2620_v51 = vpop.f32.mrb[19].mxu0  ;;  %v1614_v52 = vsel %vm1277_vm4, %v1613_v48, -inf }
 0x616   : > { %1615 = vmax.xlane.f32.xlu1 %v1614_v52 }
 0x618   : > { %v1976_v47 = vpop.f32.mrb[12].mxu1 }
 0x619   : > { %v1978_v49 = vpop.f32.mrb[13].mxu1 }
 0x61a   : > { %v1980_v50 = vpop.f32.mrb[14].mxu1 }
 0x61b   : > { %v1981_v52 = vpop.f32.mrb[15].mxu1 }
 0x62c   : > { %v2017_v21 = vpop.f32.mrb[16].mxu1 }
 0x6a3   : > { %v1616_v53 = vpop.xlane.xlu1 %1615 }
 0x6a4   : > { %v1617_v54 = vsub.f32 %v1613_v48, %v1616_v53  ;;  %v1977_v48 = vadd.f32 %v1976_v47, %v1847_v45 }
 0x6a6   : > { %v1618_v55 = vmul.f32 1.442695, %v1617_v54  ;;  %v2024_v51 = vmul.f32 0.70710677, %v1977_v48  ;;  %v1851_v54 = vrot.slane %v1842_v43, %v3939_v23 }
 0x6a8   : > { %2902 = vpow2.f32 %v1618_v55 }
 0x6b2   : > { %v2903_v56 = vpop.eup %2902 }
 0x6b3   : > { %v1620_v57 = vsel %vm1277_vm4, %v2903_v56, 0.0 }
 0x6b4   : > { %1621 = vadd.xlane.f32.xlu1 %v1620_v57 }
 0x6b8   : > { %1452 = vadd.xlane.f32.xlu1 %v3998_v46 }
 0x741   : > { %v1622_v44 = vpop.xlane.xlu1 %1621 }
 0x742   : > { %2904 = vrcp.f32 %v1622_v44  ;;  %v1979_v44 = vadd.f32 %v1978_v49, %v1851_v54 }
 0x743   : > { %2906 = verf.f32 %v2024_v51 }
 0x745   : > { %v1453_v33 = vpop.xlane.xlu1 %1452 }
 0x746   : > { %v1455_v36 = vmul.f32 0.0078125, %v1453_v33 }
 0x748   : > { %v1456_v40 = vsub.f32 %v3998_v46, %v1455_v36  ;;  %v1854_v46 = vsub.s32 2, %v3930_v20 }
 0x74c   : > { %v2905_v58 = vpop.eup %2904 }
 0x74d   : > { %v1624_v59 = vmul.f32 %v2905_v58, %v2903_v56  ;;  %v2907_v53 = vpop.eup %2906  ;;  %v1855_v56 = vrot.slane %v1842_v43, %v1854_v46 }
 0x74e   : > { %v2026_v55 = vadd.f32 1.0, %v2907_v53 }
 0x74f   : > { %v1625_v61 = vpack.c.bf16 %v1624_v59, %v1624_v59  ;;  %1814 = vst.msk [vmem:[%s4286_s0] sm:$0xff] %vm1277_vm4, %v1624_v59  ;;  %v2018_v59 = vadd.f32 %v2017_v21, %v1855_v56  ;;  %s3182_s0 = scalar_lea.vmem %s3181_s22, 256 }
 0x750   : > { %p3184_p6 = scmp.lt.s32.totalorder %s3182_s0, %s3176_s25 }
 0x751   : > { %2624 = vmatmul.mubr.msk.bf16.vlgmr.msra.gmra.mrb[20].mxu0 %vm1277_vm4, %v1625_v61 }
 0x752   : > { %2628 = vmatpush3.bf16.msra.mxu0 %v2869_v60  ;;  %2643 = vmatprep.mubr.msk.bf16.mxu0 %vm3417_vm2, %v3416_v18  ;;  %v2659_v60 = vpop.f32.mrb[17].mxu1  ;;  %p3185_p10 = por %p3184_p6, %p3183_p11 }
 0x753   : > { %2629 = vmatprep.subr.bf16.mxu0 %v3416_v18  ;;  %v2020_v61 = vpop.f32.mrb[18].mxu1 }
 0x754   : > { %v2660_v20 = vpop.f32.mrb[19].mxu1  ;;  %p3186_p1 = pnand %p3185_p10, %p3179_p4 }
 0x756   : > { %2630 = vmatpush3.bf16.msra.mxu0 %v2870_v62  ;;  %v2536_v62 = vmul.f32 -1.442695, %v1979_v44 }
 0x757   : > { %2631 = vmatprep.subr.bf16.mxu0 %v3416_v18 }
 0x758   : > { %2908 = vpow2.f32 %v2536_v62 }
 0x75a   : > { %2632 = vmatpush3.bf16.msra.mxu0 %v2871_v63  ;;  %v2537_v63 = vmul.f32 -1.442695, %v2018_v59 }
 0x75b   : > { %2633 = vmatprep.subr.bf16.mxu0 %v3416_v18 }
 0x75c   : > { %2910 = vpow2.f32 %v2537_v63 }
 0x75e   : > { %2634 = vmatpush3.bf16.msra.mxu0 %v2872_v1 }
 0x75f   : > { %2635 = vmatprep.subr.bf16.mxu0 %v3416_v18 }
 0x762   : > { %2636 = vmatpush3.bf16.msra.mxu0 %v2873_v2 }
 0x763   : > { %2637 = vmatprep.subr.bf16.mxu0 %v3416_v18 }
 0x766   : > { %2638 = vmatpush3.bf16.msra.mxu0 %v2874_v3 }
 0x767   : > { %2639 = vmatprep.subr.bf16.mxu0 %v3416_v18 }
 0x76a   : > { %2640 = vmatpush3.bf16.msra.mxu0 %v2875_v4  ;;  %v2909_v4 = vpop.eup %2908 }
 0x76b   : > { %2641 = vmatprep.subr.bf16.mxu0 %v3416_v18  ;;  %v1457_v18 = vmul.f32 %v1456_v40, %v1456_v40 }
 0x76e   : > { %2642 = vmatpush3.bf16.msra.mxu0 %v2876_v5 }
 0x824   : > { %v1666_v7 = vpop.f32.mrb[20].mxu0 }
 0x825   : > { %v1672_v8 = vpack.c.bf16 %v1666_v7, %v1666_v7  ;;  %v2625_v9 = vpop.f32.mrb[21].mxu0  ;;  %v2911_v7 = vpop.eup %2910 }
 0x826   : > { %v1669_v10 = vpop.f32.mrb[22].mxu0  ;;  %v2033_v9 = vadd.f32 1.0, %v2909_v4 }
 0x827   : > { %v2626_v11 = vpop.f32.mrb[23].mxu0  ;;  %2644 = vmatmul.mubr.bf16.vlgmr.msra.gmra.mrb[24].mxu0 %v1672_v8  ;;  %v2040_v10 = vadd.f32 1.0, %v2911_v7 }
 0x8fa   : > { %v1778_v37 = vpop.f32.mrb[24].mxu0 }
 0x8fb   : > { %v1779_v38 = vadd.f32 %v2507_v35, %v1778_v37  ;;  %v2645_v39 = vpop.f32.mrb[25].mxu0 }
 0x8fc   : > { %v1781_v0 = vpop.f32.mrb[26].mxu0 }
 0x8fd   : > { %v2646_v41 = vpop.f32.mrb[27].mxu0  ;;  %v1784_v42 = vadd.f32 %v1779_v38, %v3988_v34  ;;  %v2023_v34 = vmul.f32 0.5, %v1977_v48 }
 0x8ff   : > { %1787 = vadd.xlane.f32.xlu1 %v1784_v42  ;;  %v2027_v57 = vmul.f32 %v2026_v55, %v2023_v34 }
 0x901   : > { %v2028_v58 = vpack.c.bf16 %v2027_v57, %v2027_v57 }
 0x903   : > { %1458 = vadd.xlane.f32.xlu1 %v1457_v18  ;;  %2029 = vst [vmem:[%s4042_s21 + $0x8] sm:$0xf] %v2028_v58 }
 0x98c   : > { %v1788_v23 = vpop.xlane.xlu1 %1787 }
 0x98d   : > { %v1789_v1 = vmul.f32 0.0078125, %v1788_v23 }
 0x98f   : > { %v4045_v2 = vsub.f32 %v1784_v42, %v1789_v1 }
 0x990   : > { %v1459_v3 = vpop.xlane.xlu1 %1458 }
 0x991   : > { %v1460_v5 = vmul.f32 0.0078125, %v1459_v3  ;;  %v1791_v6 = vmul.f32 %v4045_v2, %v4045_v2 }
 0x993   : > { %v1461_v8 = vadd.f32 1e-05, %v1460_v5  ;;  %1792 = vadd.xlane.f32.xlu1 %v1791_v6 }
 0x995   : > { %2912 = vrsqrt.f32 %v1461_v8 }
 0x996   : > { %2914 = vrcp.f32 %v2033_v9 }
 0x997   : > { %2916 = vrcp.f32 %v2040_v10 }
 0x99f   : > { %v2913_v11 = vpop.eup %2912 }
 0x9a0   : > { %v1463_v13 = vmul.f32 %v2913_v11, %v1456_v40  ;;  %v2915_v15 = vpop.eup %2914 }
 0x9a1   : > { %v2917_v19 = vpop.eup %2916  ;;  %2036 = vst [vmem:[%s926_s29] sm:$0xff] %v2915_v15 }
 0x9a2   : > { %v1470_v16 = vmul.f32 %v2496_v12, %v1463_v13  ;;  %2043 = vst [vmem:[%s4287_s15] sm:$0xff] %v2917_v19 }
 0x9a4   : > { %v1477_v22 = vadd.f32 %v2497_v14, %v1470_v16 }
 0x9a6   : > { %v1478_v24 = vpack.c.bf16 %v1477_v22, %v1477_v22 }
 0x9a8   : > { %1479 = vst [vmem:[%s4042_s21] sm:$0xf] %v1478_v24 }
 0x9a9   : > { %3189 = shalt.err (!%p3186_p1)
}
 0x9aa   : > { %s3190_s29 = scalar_lea.hbm %s4067_s18, 128  ;;  %s3194_s10 = scalar_lea.hbm %s4359_s8, 256 }
 0x9ab   : > { %p3191_p9 = scmp.ne.s32.totalorder %s4067_s18, %s3190_s29  ;;  %p3195_p12 = scmp.lt.u32.totalorder %s4067_s18, %s4359_s8 }
 0x9ac   : > { %p3196_p13 = scmp.lt.u32.totalorder %s3194_s10, %s3190_s29  ;;  %p3198_p7 = scmp.lt.u32.totalorder %s3190_s29, %s4067_s18 }
 0x9ad   : > { %p3192_p8 = pnand %p3191_p9, %p4360_p5 }
 0x9ae   : > { %p3197_p0 = por %p3196_p13, %p3195_p12 }
 0x9af   : > { %p3193_p3 = pneg %p3192_p8 }
 0x9b0   : > { %p3199_p2 = por %p3198_p7, %p3197_p0 }
 0x9b2   : > { %p3200_p4 = pnand %p3199_p2, %p3193_p3 }
 0x9b4   : > { %3203 = shalt.err (!%p3200_p4)
}
 0x9b5   : > { %2696 = dma.vmem_to_hbm [thread:$0]  (%p4360_p5), %s2096_s16, 128, %s4067_s18, %s4289_s24  }
 0x9b6   : > { %s4361_s15 = sld [smem:[#allocation61_spill]]  ;;  %s2123_s29 = sshll.u32 %s940_s1, 4  ;;  %s2124_s29 = int_to_ptr.vmem [resolvable:$true] %s2123_s29 }
 0x9b7   : > { %s2060_s19 = scalar_lea.sflag [#allocation24], %s3887_s28  ;;  %s3204_s10 = scalar_lea.vmem %s2124_s29, 128 }
 0x9b8   : > { %p3205_p11 = scmp.ne.s32.totalorder %s2124_s29, %s3204_s10  ;;  %s3420_s22 = smov [#allocation23]  }
 0x9b9   : > { %s3208_s8 = sshll.u32 %s3420_s22, 4  ;;  %s3209_s8 = int_to_ptr.vmem [resolvable:$false] %s3208_s8 }
 0x9ba   : > { %p3206_p6 = pnand %p3205_p11, %p4360_p5  ;;  %s3210_s9 = scalar_lea.vmem %s3209_s8, 256 }
 0x9bb   : > { %p3211_p1 = scmp.lt.s32.totalorder %s2124_s29, %s3209_s8  ;;  %p3212_p9 = scmp.lt.s32.totalorder %s3210_s9, %s3204_s10 }
 0x9bc   : > { %s4093_s3 = scalar_lea.hbm %s4361_s15, %s4061_s12  ;;  %p3207_p10 = pneg %p3206_p6 }
 0x9bd   : > { %p3213_p8 = por %p3212_p9, %p3211_p1 }
 0x9bf   : > { %p3214_p3 = pnand %p3213_p8, %p3207_p10 }
 0x9c1   : > { %3217 = shalt.err (!%p3214_p3)
}
 0x9c2   : > { %s3218_s1 = scalar_lea.hbm %s4093_s3, 128  ;;  %s3222_s0 = scalar_lea.hbm %s4361_s15, 256 }
 0x9c3   : > { %p3219_p12 = scmp.ne.s32.totalorder %s4093_s3, %s3218_s1  ;;  %p3223_p7 = scmp.lt.u32.totalorder %s4093_s3, %s4361_s15 }
 0x9c4   : > { %p3224_p2 = scmp.lt.u32.totalorder %s3222_s0, %s3218_s1  ;;  %p3226_p11 = scmp.lt.u32.totalorder %s3218_s1, %s4093_s3 }
 0x9c5   : > { %p3220_p13 = pnand %p3219_p12, %p4360_p5 }
 0x9c6   : > { %p3225_p4 = por %p3224_p2, %p3223_p7 }
 0x9c7   : > { %p3221_p0 = pneg %p3220_p13 }
 0x9c8   : > { %p3227_p6 = por %p3226_p11, %p3225_p4 }
 0x9ca   : > { %p3228_p10 = pnand %p3227_p6, %p3221_p0 }
 0x9cc   : > { %3231 = shalt.err (!%p3228_p10)
}
 0x9cd   : > { %2698 = dma.vmem_to_hbm [thread:$0]  (%p4360_p5), %s2124_s29, 128, %s4093_s3, %s2060_s19  }
 0x9ce   : > { %s4362_s22 = sld [smem:[#allocation60_spill]]  ;;  %s4363_s16 = scalar_lea.vmem [#allocation22], %s3967_s20 }
 0x9cf   : > { %s2109_s1 = sshll.u32 %s4363_s16, 4  ;;  %s4364_s8 = sld [smem:[#allocation62_spill]]  ;;  %s2110_s1 = int_to_ptr.vmem [resolvable:$true] %s2109_s1 }
 0x9d0   : > { %s3232_s11 = scalar_lea.vmem %s2110_s1, 128  ;;  %s3421_s13 = smov [#allocation22]  }
 0x9d1   : > { %p3233_p1 = scmp.ne.s32.totalorder %s2110_s1, %s3232_s11  ;;  %s3236_s3 = sshll.u32 %s3421_s13, 4  ;;  %s3237_s3 = int_to_ptr.vmem [resolvable:$false] %s3236_s3 }
 0x9d2   : > { %s3238_s29 = scalar_lea.vmem %s3237_s3, 256  ;;  %p3239_p3 = scmp.lt.s32.totalorder %s2110_s1, %s3237_s3 }
 0x9d3   : > { %p3234_p9 = pnand %p3233_p1, %p4360_p5  ;;  %p3240_p12 = scmp.lt.s32.totalorder %s3238_s29, %s3232_s11 }
 0x9d4   : > { %s4121_s18 = scalar_lea.hbm %s4362_s22, %s4061_s12 }
 0x9d5   : > { %s4129_s24 = scalar_lea.hbm %s4364_s8, %s4061_s12  ;;  %p3235_p8 = pneg %p3234_p9 }
 0x9d6   : > { %p3241_p13 = por %p3240_p12, %p3239_p3 }
 0x9d8   : > { %p3242_p0 = pnand %p3241_p13, %p3235_p8 }
 0x9da   : > { %3245 = shalt.err (!%p3242_p0)
}
 0x9db   : > { %s3246_s12 = scalar_lea.hbm %s4121_s18, 128  ;;  %s3250_s13 = scalar_lea.hbm %s4362_s22, 256 }
 0x9dc   : > { %p3247_p7 = scmp.ne.s32.totalorder %s4121_s18, %s3246_s12  ;;  %p3251_p11 = scmp.lt.u32.totalorder %s4121_s18, %s4362_s22 }
 0x9dd   : > { %p3252_p6 = scmp.lt.u32.totalorder %s3250_s13, %s3246_s12  ;;  %p3254_p1 = scmp.lt.u32.totalorder %s3246_s12, %s4121_s18 }
 0x9de   : > { %p3248_p2 = pnand %p3247_p7, %p4360_p5 }
 0x9df   : > { %p3253_p10 = por %p3252_p6, %p3251_p11 }
 0x9e0   : > { %p3249_p4 = pneg %p3248_p2 }
 0x9e1   : > { %p3255_p9 = por %p3254_p1, %p3253_p10 }
 0x9e3   : > { %p3256_p8 = pnand %p3255_p9, %p3249_p4 }
 0x9e5   : > { %3259 = shalt.err (!%p3256_p8)
}
 0x9e6   : > { %s4365_s11 = scalar_lea.sflag [#allocation21], %s3887_s28  ;;  %s4366_s25 = scalar_lea.vmem [#allocation25], %s3967_s20 }
 0x9e7   : > { %2697 = dma.vmem_to_hbm [thread:$0]  (%p4360_p5), %s2110_s1, 128, %s4121_s18, %s4365_s11  }
 0x9e8   : > { %s2137_s3 = sshll.u32 %s4366_s25, 4  ;;  %s3422_s12 = smov [#allocation25]   ;;  %s2138_s3 = int_to_ptr.vmem [resolvable:$true] %s2137_s3 }
 0x9e9   : > { %s3260_s29 = scalar_lea.vmem %s2138_s3, 128  ;;  %s3264_s9 = sshll.u32 %s3422_s12, 4  ;;  %s3265_s9 = int_to_ptr.vmem [resolvable:$false] %s3264_s9 }
 0x9ea   : > { %p3261_p3 = scmp.ne.s32.totalorder %s2138_s3, %s3260_s29  ;;  %s3266_s10 = scalar_lea.vmem %s3265_s9, 256 }
 0x9eb   : > { %p3267_p0 = scmp.lt.s32.totalorder %s2138_s3, %s3265_s9  ;;  %p3268_p7 = scmp.lt.s32.totalorder %s3266_s10, %s3260_s29 }
 0x9ec   : > { %p3262_p12 = pnand %p3261_p3, %p4360_p5 }
 0x9ed   : > { %p3269_p2 = por %p3268_p7, %p3267_p0 }
 0x9ee   : > { %p3263_p13 = pneg %p3262_p12 }
 0x9f0   : > { %p3270_p4 = pnand %p3269_p2, %p3263_p13 }
 0x9f2   : > { %3273 = shalt.err (!%p3270_p4)
}
 0x9f3   : > { %s3274_s20 = scalar_lea.hbm %s4129_s24, 128  ;;  %s3278_s13 = scalar_lea.hbm %s4364_s8, 256 }
 0x9f4   : > { %p3275_p11 = scmp.ne.s32.totalorder %s4129_s24, %s3274_s20  ;;  %p3279_p1 = scmp.lt.u32.totalorder %s4129_s24, %s4364_s8 }
 0x9f5   : > { %p3280_p9 = scmp.lt.u32.totalorder %s3278_s13, %s3274_s20  ;;  %p3282_p3 = scmp.lt.u32.totalorder %s3274_s20, %s4129_s24 }
 0x9f6   : > { %p3276_p6 = pnand %p3275_p11, %p4360_p5 }
 0x9f7   : > { %p3281_p8 = por %p3280_p9, %p3279_p1 }
 0x9f8   : > { %p3277_p10 = pneg %p3276_p6 }
 0x9f9   : > { %p3283_p12 = por %p3282_p3, %p3281_p8 }
 0x9fb   : > { %p3284_p13 = pnand %p3283_p12, %p3277_p10 }
 0x9fd   : > { %3287 = shalt.err (!%p3284_p13)
}
 0x9fe   : > { %2699 = dma.vmem_to_hbm [thread:$0]  (%p4360_p5), %s2138_s3, 128, %s4129_s24, %s2060_s19  }
 0x9ff   : > { %s4367_s29 = sld [smem:[#allocation56_spill]]  ;;  %s4368_s9 = sld [smem:[#allocation57_spill]] }
 0xa00   : > { %s2662_s24 = smul.u32 192, %s4356_s6  ;;  %s2081_s19 = sshll.u32 %s4042_s21, 4  ;;  %s4185_s19 = int_to_ptr.vmem [resolvable:$true] %s2081_s19 }
 0xa01   : > { %s4369_s20 = sld [smem:[#allocation58_spill]]  ;;  %s2045_s1 = scalar_lea.sflag [#allocation6], %s3876_s4 }
 0xa02   : > { %s3288_s13 = scalar_lea.vmem %s4185_s19, 192  ;;  %s3423_s6 = smov [#allocation19]  }
 0xa03   : > { %p3289_p0 = scmp.ne.s32.totalorder %s4185_s19, %s3288_s13  ;;  %s3292_s16 = sshll.u32 %s3423_s6, 4  ;;  %s3293_s16 = int_to_ptr.vmem [resolvable:$false] %s3292_s16 }
 0xa04   : > { %s3294_s0 = scalar_lea.vmem %s3293_s16, 384  ;;  %p3295_p4 = scmp.lt.s32.totalorder %s4185_s19, %s3293_s16 }
 0xa05   : > { %v2516_v29 = vld [vmem:[%s4367_s29] ss:$0 sm:$0xff]  ;;  %p3290_p7 = pnand %p3289_p0, %p4360_p5  ;;  %p3296_p11 = scmp.lt.s32.totalorder %s3294_s0, %s3288_s13 }
 0xa06   : > { %v2517_v31 = vld [vmem:[%s4368_s9] ss:$0 sm:$0xff] }
 0xa07   : > { %s4183_s18 = scalar_lea.hbm %s4369_s20, %s2662_s24  ;;  %p3291_p2 = pneg %p3290_p7 }
 0xa08   : > { %p3297_p6 = por %p3296_p11, %p3295_p4 }
 0xa0a   : > { %p3298_p10 = pnand %p3297_p6, %p3291_p2 }
 0xa20   : > { %v1793_v25 = vpop.xlane.xlu1 %1792 }
 0xa21   : > { %v1794_v26 = vmul.f32 0.0078125, %v1793_v25 }
 0xa23   : > { %v1795_v27 = vadd.f32 1e-05, %v1794_v26 }
 0xa25   : > { %2918 = vrsqrt.f32 %v1795_v27 }
 0xa2f   : > { %v2919_v28 = vpop.eup %2918 }
 0xa30   : > { %v1797_v30 = vmul.f32 %v2919_v28, %v4045_v2 }
 0xa32   : > { %v1804_v32 = vmul.f32 %v2516_v29, %v1797_v30 }
 0xa34   : > { %v1811_v17 = vadd.f32 %v2517_v31, %v1804_v32 }
 0xa36   : > { %v1812_v33 = vpack.c.bf16 %v1811_v17, %v1811_v17 }
 0xa38   : > { %1813 = vst [vmem:[%s4042_s21 + $0x4] sm:$0xf] %v1812_v33 }
 0xa39   : > { %3301 = shalt.err (!%p3298_p10)
}
 0xa3a   : > { %s3302_s4 = scalar_lea.hbm %s4183_s18, 192  ;;  %s3306_s25 = scalar_lea.hbm %s4369_s20, 384 }
 0xa3b   : > { %p3303_p1 = scmp.ne.s32.totalorder %s4183_s18, %s3302_s4  ;;  %p3307_p3 = scmp.lt.u32.totalorder %s4183_s18, %s4369_s20 }
 0xa3c   : > { %p3308_p12 = scmp.lt.u32.totalorder %s3306_s25, %s3302_s4  ;;  %p3310_p0 = scmp.lt.u32.totalorder %s3302_s4, %s4183_s18 }
 0xa3d   : > { %p3304_p9 = pnand %p3303_p1, %p4360_p5 }
 0xa3e   : > { %p3309_p13 = por %p3308_p12, %p3307_p3 }
 0xa3f   : > { %p3305_p8 = pneg %p3304_p9 }
 0xa40   : > { %p3311_p7 = por %p3310_p0, %p3309_p13 }
 0xa42   : > { %p3312_p2 = pnand %p3311_p7, %p3305_p8 }
 0xa44   : > { %3315 = shalt.err (!%p3312_p2)
}
 0xa45   : > { %2695 = dma.vmem_to_hbm [thread:$0]  (%p4360_p5), %s4185_s19, 192, %s4183_s18, %s2045_s1  }
 0xa46 PF: > { %s2149_s28 = sand.u32 1, %s3378_s5   ;;  %p4370_p4 = scmp.ne.s32.totalorder %s4335_s30, 0 }
 0xa47   : > { %p4371_p11 = scmp.ge.s32.totalorder %s3398_s2, 2  ;;  %s2150_s9 = scalar_lea.sflag [#allocation6], %s2149_s28 }
 0xa49   : > { %p2735_p6 = pnand %p4371_p11, %p4370_p4 }
 0xa4b   : > { %3365 = dma.done.wait (!%p2735_p6), %s2150_s9, 192  }
 0xa4c   : > { %3367 = vsyncadd (!%p2735_p6), %s2150_s9, 4294967104  ;;  %s4372_s24 = sadd.s32 4294967294, %s3398_s2  }
 0xa4d   : > { %s2158_s3 = sand.u32 1, %s4372_s24  }
 0xa4e   : > { %s2159_s10 = scalar_lea.sflag [#allocation21], %s2158_s3 }
 0xa4f   : > { %3369 = dma.done.wait (!%p2735_p6), %s2159_s10, 256  }
 0xa50   : > { %3371 = vsyncadd (!%p2735_p6), %s2159_s10, 4294967040  ;;  %s2177_s17 = scalar_lea.sflag [#allocation24], %s2158_s3 }
 0xa51   : > { %3373 = dma.done.wait (!%p2735_p6), %s2177_s17, 256  }
 0xa52   : > { %3375 = vsyncadd (!%p2735_p6), %s2177_s17, 4294967040  ;;  %s53_s2 = sadd.s32 1, %s3398_s2   ;;  %s4373_s28 = sld [smem:[#allocation36_spill]] }
 0xa53   : > { %p50_p5 = scmp.ge.s32.totalorder %s53_s2, 4   ;;  %s4374_s6 = sld [smem:[#allocation37_spill]] }
 0xa54   : > { %s4375_s5 = smov %s3382_s26  ;;  %s4376_s26 = smov %s3386_s27 }
 0xa55   : > { %s4377_s27 = smov %s3796_s7  ;;  %52 = sbr.rel (!%p50_p5) target bundleno = 41 (0x29), region = 256 }
 0xa5c   :  { %2191 = vsyncpa [#allocation5], 1 }
 0xa5d   :  { %2193 = vsyncpa [#allocation5 + $0x1], 1 }
 0xa5e   :  { %2194 = vsyncpa [#allocation8], 1 }
 0xa5f   :  { %2196 = vsyncpa [#allocation8 + $0x1], 1 }
 0xa60   :  { %2197 = vsyncpa [#allocation11], 1 }
 0xa61   :  { %2198 = vsyncpa [#allocation14], 1 }
 0xa62   :  { %2199 = vsyncpa [#allocation17], 1 }
 0xa63   :  { %2200 = vsyncpa [#allocation6], 1 }
 0xa64   :  { %2202 = vsyncpa [#allocation6 + $0x1], 1 }
 0xa65   :  { %2203 = vsyncpa [#allocation21], 1 }
 0xa66   :  { %2205 = vsyncpa [#allocation21 + $0x1], 1 }
 0xa67   :  { %2206 = vsyncpa [#allocation24], 1 }
 0xa68   :  { %2208 = vsyncpa [#allocation24 + $0x1], 1 }

</bundles_post_ra>
